<compile_context>
chip_gen: v7x
topology: tpu7x:2x2x1
jax: 0.10.0
libtpu: 0.0.40
codegen_flags: <defaults>
</compile_context>

<pallas_src>
import functools

import jax
import jax.numpy as jnp
from jax.experimental import pallas as pl
from jax.experimental.pallas import tpu as pltpu

C_FEAT = 32
C_VGG = 16
SLAB1_C = 128       # f0|middle|decode|structure|inpaint|img|mask|gt|slbl|pad
SLAB1_USED = 3 * C_FEAT + 3 + 3 + 3 + 1 + 3 + 3          # 112
SLAB2_C = 128       # coarse|refine|comp|6 x vgg|pad
SLAB2_USED = 9 + 6 * C_VGG                                # 105
STORE_DTYPE = jnp.bfloat16
VMEM_LIMIT = 32 * 1024 * 1024


# ----------------------------------------------------------------------------
# tile pickers (prefer the largest strip/tile that still gives >=4 grid steps)
# ----------------------------------------------------------------------------
def _pick_strip(H, W, B, *, even=False, max_rows=2048):
    max_rows = max(max_rows, 2 * W)
    cands = [h for h in range(H, 0, -1)
             if H % h == 0 and h * W <= max_rows and (h * W) % 8 == 0
             and (not even or h % 2 == 0)]
    if not cands:
        raise ValueError(f"no valid strip height for H={H}, W={W}")
    for h in cands:                       # largest first
        if B * (H // h) >= 4:             # >=4 steps -> per-core pipelining
            return h
    return cands[0]


def _pick_rows(M, *, max_rows=2048):
    cands = [t for t in range(min(M, max_rows), 0, -1)
             if M % t == 0 and (t % 8 == 0 or t == M)]
    for t in cands:
        if M // t >= 4 and t >= 128:
            return t
    return cands[0]


def _cparams(ndim):
    return pltpu.CompilerParams(
        dimension_semantics=("parallel",) * ndim,
        vmem_limit_bytes=VMEM_LIMIT)


# ----------------------------------------------------------------------------
# Stage A: structure 3x3 conv + backbone level-0 + ffc_inpaint chain (full res)
# ----------------------------------------------------------------------------
def _stage_a_kernel(px_ref, strip_ref, ws_ref, bs_ref,
                    wb0i_ref, wb0s_ref, wb0m_ref, bb0_ref,
                    wf1i_ref, wf1m_ref, bf1_ref,
                    wf2_ref, bf2_ref, wf3_ref, bf3_ref,
                    slab_ref, *, hs, W):
    f32 = jnp.float32
    px = px_ref[...].astype(f32)                       # [hs*W, 11]
    img, soft, mask = px[:, 0:3], px[:, 3:4], px[:, 4:5]
    gt, slbl = px[:, 5:8], px[:, 8:11]

    # ffc_inpaint(cat(images * mask, 1 - mask))
    middle = jnp.maximum(
        jnp.dot(img * mask, wf1i_ref[...], preferred_element_type=f32)
        + (1.0 - mask) * wf1m_ref[...] + bf1_ref[...], 0.0)
    decode = jnp.maximum(
        jnp.dot(middle, wf2_ref[...], preferred_element_type=f32) + bf2_ref[...],
        0.0)
    inpaint = jnp.dot(decode, wf3_ref[...], preferred_element_type=f32) + bf3_ref[...]

    # structure_out = 3x3 conv of cat(structure_im, 1 - soft): the strip carries
    # a 1-row H halo and the 3 W shifts pre-packed -> in-VMEM im2col is just a
    # lane concat over the 3 H shifts, then one [TM,36]@[36,3] matmul.
    sv = strip_ref[0].astype(f32)                      # [hs+2, W, 12]
    cols = jnp.concatenate([sv[dy:dy + hs] for dy in range(3)], axis=-1)
    cols = cols.reshape(hs * W, 36)
    structure = jnp.dot(cols, ws_ref[...], preferred_element_type=f32) + bs_ref[...]

    # backbone level-0: relu(cat(images, structure_out, 1 - soft) @ W + b), split-K
    f0 = jnp.maximum(
        jnp.dot(img, wb0i_ref[...], preferred_element_type=f32)
        + jnp.dot(structure, wb0s_ref[...], preferred_element_type=f32)
        + (1.0 - soft) * wb0m_ref[...] + bb0_ref[...], 0.0)

    pad = jnp.zeros((hs * W, SLAB1_C - SLAB1_USED), f32)
    slab_ref[...] = jnp.concatenate(
        [f0, middle, decode, structure, inpaint, img, mask, gt, slbl, pad],
        axis=-1).astype(slab_ref.dtype)


def stage_a(px, strips, w, *, B, H, W, hs):
    nS = H // hs
    tm = hs * W
    M = B * H * W
    weights = [w["ws"], w["bs"], w["wb0i"], w["wb0s"], w["wb0m"], w["bb0"],
               w["wf1i"], w["wf1m"], w["bf1"], w["wf2"], w["bf2"], w["wf3"], w["bf3"]]
    row_map = lambda b, s: (b * nS + s, 0)
    in_specs = [
        pl.BlockSpec((tm, px.shape[1]), row_map),
        pl.BlockSpec((1, hs + 2, W, 12), lambda b, s: (b * nS + s, 0, 0, 0)),
    ] + [pl.BlockSpec(x.shape, lambda b, s: (0, 0)) for x in weights]
    return pl.pallas_call(
        functools.partial(_stage_a_kernel, hs=hs, W=W),
        out_shape=jax.ShapeDtypeStruct((M, SLAB1_C), STORE_DTYPE),
        grid_spec=pltpu.PrefetchScalarGridSpec(
            num_scalar_prefetch=0,
            grid=(B, nS),
            in_specs=in_specs,
            out_specs=pl.BlockSpec((tm, SLAB1_C), row_map),
        ),
        compiler_params=_cparams(2),
    )(px, strips, *weights)


# ----------------------------------------------------------------------------
# Stage B: backbone level-1 + transformer + half-res decoder contribution
# ----------------------------------------------------------------------------
def _stage_b_kernel(pooled_ref, wb1_ref, bb1_ref, wt1_ref, bt1_ref,
                    wt2_ref, bt2_ref, wdh_ref, wdi_ref, out_ref):
    f32 = jnp.float32
    pooled = pooled_ref[...].astype(f32)               # [tm, 64] = pool(f0)|pool(middle)
    f0p, midp = pooled[:, 0:C_FEAT], pooled[:, C_FEAT:2 * C_FEAT]

    f1 = jnp.maximum(
        jnp.dot(f0p, wb1_ref[...], preferred_element_type=f32) + bb1_ref[...], 0.0)
    tok = f1 + midp
    hs_ = jnp.maximum(
        jnp.dot(tok, wt1_ref[...], preferred_element_type=f32) + bt1_ref[...], 0.0)
    inter = jnp.dot(hs_, wt2_ref[...], preferred_element_type=f32) + bt2_ref[...]

    # pixel-decoder contribution of up2(hs)/up2(inter), computed at half res
    # (valid because upsample2(x) @ W == upsample2(x @ W) for 2x nearest).
    out_ref[...] = (jnp.dot(hs_, wdh_ref[...], preferred_element_type=f32)
                    + jnp.dot(inter, wdi_ref[...], preferred_element_type=f32)
                    ).astype(out_ref.dtype)


def stage_b(pooled, w):
    Mh = pooled.shape[0]
    tm = _pick_rows(Mh)
    weights = [w["wb1"], w["bb1"], w["wt1"], w["bt1"], w["wt2"], w["bt2"],
               w["wdh"], w["wdi"]]
    in_specs = [pl.BlockSpec((tm, 2 * C_FEAT), lambda i: (i, 0))]
    in_specs += [pl.BlockSpec(x.shape, lambda i: (0, 0)) for x in weights]
    return pl.pallas_call(
        _stage_b_kernel,
        out_shape=jax.ShapeDtypeStruct((Mh, C_FEAT), STORE_DTYPE),
        grid_spec=pltpu.PrefetchScalarGridSpec(
            num_scalar_prefetch=0,
            grid=(Mh // tm,),
            in_specs=in_specs,
            out_specs=pl.BlockSpec((tm, C_FEAT), lambda i: (i, 0)),
        ),
        compiler_params=_cparams(1),
    )(pooled, *weights)


# ----------------------------------------------------------------------------
# Stage C: pixel decoder + compose + all six vgg heads (full res)
# ----------------------------------------------------------------------------
def _stage_c_kernel(slab_ref, dwh_ref, wd96_ref, bd1_ref, wc_ref, bc_ref,
                    wrf_ref, wrc_ref, br_ref, wvbd_ref, bvbd_ref,
                    out_ref, *, hs, W):
    f32 = jnp.float32
    slab = slab_ref[...].astype(f32)                   # [hs*W, 128]
    fmd = slab[:, 0:3 * C_FEAT]                        # f0 | middle | decode
    structure = slab[:, 96:99]
    inpaint = slab[:, 99:102]
    img = slab[:, 102:105]
    mask = slab[:, 105:106]
    gt = slab[:, 106:109]
    slbl = slab[:, 109:112]

    # decoder contribution of up2(hs)/up2(inter): W already repeated (wrapper),
    # repeat along H in VMEM (leading-dim stack + reshape, no HBM round trip).
    d3 = dwh_ref[...].astype(f32).reshape(hs // 2, W, C_FEAT)
    d4 = jnp.concatenate([d3[:, None], d3[:, None]], axis=1)   # [hs//2, 2, W, 32]
    dup = d4.reshape(hs * W, C_FEAT)

    # dec_feat = relu(cat(up(hs), up(inter), middle, decode, f0) @ Wdec1 + b),
    # with the f0/middle/decode part as one [TM,96]@[96,32] matmul.
    dec_feat = jnp.maximum(
        dup + jnp.dot(fmd, wd96_ref[...], preferred_element_type=f32) + bd1_ref[...],
        0.0)
    coarse = jnp.dot(dec_feat, wc_ref[...], preferred_element_type=f32) + bc_ref[...]
    refine = (jnp.dot(dec_feat, wrf_ref[...], preferred_element_type=f32)
              + jnp.dot(coarse, wrc_ref[...], preferred_element_type=f32)
              + br_ref[...])

    # output_comp = mask * images + (1 - mask) * final_output[-1]
    comp = mask * img + (1.0 - mask) * refine

    # all six vgg heads as ONE block-diagonal [TM,18]@[18,96] matmul, results
    # already lane-contiguous for the packed output slab.
    vgg_in = jnp.concatenate([comp, refine, gt, inpaint, structure, slbl], axis=-1)
    vgg = jnp.maximum(
        jnp.dot(vgg_in, wvbd_ref[...], preferred_element_type=f32) + bvbd_ref[...],
        0.0)

    pad = jnp.zeros((hs * W, SLAB2_C - SLAB2_USED), f32)
    out_ref[...] = jnp.concatenate([coarse, refine, comp, vgg, pad],
                                   axis=-1).astype(out_ref.dtype)


def stage_c(slab1, dwh, w, *, B, H, W, hs):
    nS = H // hs
    tm = hs * W
    M = B * H * W
    weights = [w["wd96"], w["bd1"], w["wc"], w["bc"], w["wrf"], w["wrc"], w["br"],
               w["wvbd"], w["bvbd"]]
    row_map = lambda b, s: (b * nS + s, 0)
    in_specs = [
        pl.BlockSpec((tm, SLAB1_C), row_map),
        pl.BlockSpec((hs // 2 * W, C_FEAT), row_map),
    ] + [pl.BlockSpec(x.shape, lambda b, s: (0, 0)) for x in weights]
    return pl.pallas_call(
        functools.partial(_stage_c_kernel, hs=hs, W=W),
        out_shape=jax.ShapeDtypeStruct((M, SLAB2_C), STORE_DTYPE),
        grid_spec=pltpu.PrefetchScalarGridSpec(
            num_scalar_prefetch=0,
            grid=(B, nS),
            in_specs=in_specs,
            out_specs=pl.BlockSpec((tm, SLAB2_C), row_map),
        ),
        compiler_params=_cparams(2),
    )(slab1, dwh, *weights)


# ----------------------------------------------------------------------------
# Layout glue (module boundary only)
# ----------------------------------------------------------------------------
def nchw_to_nhwc(x):
    return jnp.transpose(x, (0, 2, 3, 1))


def rows_to_nchw(x, B, H, W):
    return jnp.transpose(x.reshape(B, H, W, x.shape[-1]), (0, 3, 1, 2))


# ----------------------------------------------------------------------------
# Parameters (deterministic synthetic init) and packing
# ----------------------------------------------------------------------------
# TODO(synk): real backbone/transformer/pixel_decoder/FFC/VGG16 architectures
# are injected constructor args in the reference and are not defined there;
# deterministic stand-ins are used, preserving forward()'s data flow.
def init_params(key):
    keys = jax.random.split(key, 12)

    def lin(k, fan_in, fan_out):
        w = jax.random.normal(k, (fan_in, fan_out), jnp.float32) / jnp.sqrt(float(fan_in))
        b = jnp.zeros((fan_out,), jnp.float32)
        return w, b

    return {
        "structure":  lin(keys[0], 9 * 4, 3),
        "backbone0":  lin(keys[1], 7, C_FEAT),
        "backbone1":  lin(keys[2], C_FEAT, C_FEAT),
        "ffc1":       lin(keys[3], 4, C_FEAT),
        "ffc2":       lin(keys[4], C_FEAT, C_FEAT),
        "ffc3":       lin(keys[5], C_FEAT, 3),
        "tr1":        lin(keys[6], C_FEAT, C_FEAT),
        "tr2":        lin(keys[7], C_FEAT, C_FEAT),
        "dec1":       lin(keys[8], 5 * C_FEAT, C_FEAT),
        "dec_coarse": lin(keys[9], C_FEAT, 3),
        "dec_refine": lin(keys[10], C_FEAT + 3, 3),
        "vgg":        lin(keys[11], 3, C_VGG),
    }


def pack_weights(p):
    def b2(b):
        return b.reshape(1, -1)

    ws, bs = p["structure"]
    wb0, bb0 = p["backbone0"]
    wf1, bf1 = p["ffc1"]
    wf2, bf2 = p["ffc2"]
    wf3, bf3 = p["ffc3"]
    wa = dict(ws=ws, bs=b2(bs),
              wb0i=wb0[0:3], wb0s=wb0[3:6], wb0m=wb0[6:7], bb0=b2(bb0),
              wf1i=wf1[0:3], wf1m=wf1[3:4], bf1=b2(bf1),
              wf2=wf2, bf2=b2(bf2), wf3=wf3, bf3=b2(bf3))

    wb1, bb1 = p["backbone1"]
    wt1, bt1 = p["tr1"]
    wt2, bt2 = p["tr2"]
    wd1, bd1 = p["dec1"]
    wb = dict(wb1=wb1, bb1=b2(bb1), wt1=wt1, bt1=b2(bt1), wt2=wt2, bt2=b2(bt2),
              wdh=wd1[0:32], wdi=wd1[32:64])

    wc_, bc_ = p["dec_coarse"]
    wr, br = p["dec_refine"]
    wv, bv = p["vgg"]
    # dec1 rows ordered (up(hs), up(inter), middle, decode, f0); slab1 is
    # f0|middle|decode -> stack rows (f0, middle, decode) for one K=96 matmul.
    wd96 = jnp.concatenate([wd1[128:160], wd1[64:96], wd1[96:128]], axis=0)
    # block-diagonal vgg weight for the six heads (comp,refine,gt,inpaint,struct,slbl)
    wvbd = jnp.zeros((18, 6 * C_VGG), jnp.float32)
    for i in range(6):
        wvbd = wvbd.at[3 * i:3 * i + 3, C_VGG * i:C_VGG * (i + 1)].set(wv)
    wc = dict(wd96=wd96, bd1=b2(bd1), wc=wc_, bc=b2(bc_),
              wrf=wr[0:32], wrc=wr[32:35], br=b2(br),
              wvbd=wvbd, bvbd=jnp.tile(b2(bv), (1, 6)))
    return wa, wb, wc


# ----------------------------------------------------------------------------
# Forward pass (mirrors CTRNetPP.forward wiring)
# ----------------------------------------------------------------------------
def ctrnetpp_forward(p, images, mask_label, gt, structure_im, structure_lbl,
                     soft_masks, training=True):
    B, _, H, W = images.shape
    assert H % 2 == 0 and W % 8 == 0, "requires H even and W a multiple of 8"
    Hh, Wh = H // 2, W // 2
    M, Mh = B * H * W, B * Hh * Wh

    hsA = _pick_strip(H, W, B)
    hsC = _pick_strip(H, W, B, even=True)
    nSA = H // hsA

    wa, wb, wc = pack_weights(p)

    # Packed per-pixel inputs (one lane-contiguous bf16 array, one DMA in stage A):
    #   images(3) | soft(1) | mask(1) | gt(3) | structure_lbl(3)
    px = jnp.concatenate(
        [nchw_to_nhwc(images), nchw_to_nhwc(soft_masks), nchw_to_nhwc(mask_label),
         nchw_to_nhwc(gt), nchw_to_nhwc(structure_lbl)],
        axis=-1).reshape(M, 11).astype(STORE_DTYPE)

    # Structure-generator input: cat(structure_im, 1 - soft_masks) zero-padded,
    # with the three W shifts packed on the channel axis and a 1-row H halo per
    # strip (tiny bf16 tensor; replaces the old [M,36] f32 im2col).
    sin = jnp.concatenate([nchw_to_nhwc(structure_im),
                           1.0 - nchw_to_nhwc(soft_masks)], axis=-1)          # [B,H,W,4]
    sp = jnp.pad(sin, ((0, 0), (1, 1), (1, 1), (0, 0)))                       # [B,H+2,W+2,4]
    spx = jnp.concatenate([sp[:, :, dx:dx + W, :] for dx in range(3)], axis=-1)
    strips = jnp.stack([spx[:, s * hsA:s * hsA + hsA + 2] for s in range(nSA)],
                       axis=1).reshape(B * nSA, hsA + 2, W, 12).astype(STORE_DTYPE)

    # Stage A: packed bf16 slab = f0|middle|decode|structure|inpaint|img|mask|gt|slbl
    slab1 = stage_a(px, strips, wa, B=B, H=H, W=W, hs=hsA)                    # [M,128]

    # TODO(synk): 2x2 avg-pool and the W-direction 2x upsample stay as cheap XLA
    # glue on narrow bf16 tensors (cross-sublane resample); f32 accumulation.
    pooled = (slab1[:, :2 * C_FEAT].astype(jnp.float32)
              .reshape(B, Hh, 2, Wh, 2, 2 * C_FEAT).mean(axis=(2, 4))
              .reshape(Mh, 2 * C_FEAT).astype(STORE_DTYPE))                   # [Mh,64]

    # Stage B: half-res chain -> decoder contribution of up(hs)/up(inter)
    dcontrib = stage_b(pooled, wb)                                            # [Mh,32]
    dwh = jnp.repeat(dcontrib.reshape(B, Hh, Wh, C_FEAT), 2, axis=2
                     ).reshape(B * Hh * W, C_FEAT)                            # [M/2,32]

    # Stage C: decoder + compose + all six vgg heads, packed lane-dense slab
    slab2 = stage_c(slab1, dwh, wc, B=B, H=H, W=W, hs=hsC)                    # [M,128]

    s1 = slab1[:, 96:102].astype(jnp.float32)
    s2 = slab2[:, :SLAB2_USED].astype(jnp.float32)
    structure_out = rows_to_nchw(s1[:, 0:3], B, H, W)
    inpaint_out = rows_to_nchw(s1[:, 3:6], B, H, W)
    coarse = rows_to_nchw(s2[:, 0:3], B, H, W)
    refine = rows_to_nchw(s2[:, 3:6], B, H, W)
    output_comp = rows_to_nchw(s2[:, 6:9], B, H, W)
    final_output = [coarse, refine]

    if not training:
        return final_output[-1]

    def feat(lo):
        return rows_to_nchw(s2[:, lo:lo + C_VGG], B, H, W)

    preds = {
        "output": final_output,
        "output_com": output_comp,
        "feat_output_comp": feat(9),
        "feat_output": feat(9 + C_VGG),
        "feat_gt": feat(9 + 2 * C_VGG),
        "structure_output": structure_out,
        "inpaint_out": inpaint_out,
        "feat_inpaint_out": feat(9 + 3 * C_VGG),
        "feat_structure_out": feat(9 + 4 * C_VGG),
        "feat_structure_lbl": feat(9 + 5 * C_VGG),
    }
    return preds


# ----------------------------------------------------------------------------
if __name__ == "__main__":
    key = jax.random.PRNGKey(0)
    k_in, k_par = jax.random.split(key)
    ks = jax.random.split(k_in, 6)

    B, H, W = 2, 16, 16
    images = jax.random.uniform(ks[0], (B, 3, H, W), jnp.float32)
    mask_label = (jax.random.uniform(ks[1], (B, 1, H, W)) > 0.5).astype(jnp.float32)
    gt = jax.random.uniform(ks[2], (B, 3, H, W), jnp.float32)
    structure_im = jax.random.uniform(ks[3], (B, 3, H, W), jnp.float32)
    structure_lbl = jax.random.uniform(ks[4], (B, 3, H, W), jnp.float32)
    soft_masks = jax.random.uniform(ks[5], (B, 1, H, W), jnp.float32)

    params = init_params(k_par)
    fwd = jax.jit(functools.partial(ctrnetpp_forward, training=True))
    preds = fwd(params, images, mask_label, gt, structure_im, structure_lbl, soft_masks)
    jax.block_until_ready(preds)

    assert preds["output"][-1].shape == (B, 3, H, W)
    assert preds["output_com"].shape == (B, 3, H, W)
    assert preds["feat_gt"].shape == (B, C_VGG, H, W)
    assert preds["structure_output"].shape == (B, 3, H, W)
    assert preds["inpaint_out"].shape == (B, 3, H, W)
    print("KERNEL_OK")
</pallas_src>

<mosaic_0001>
module attributes {stable_mosaic.version = 11 : i64} {
  func.func @_stage_a_kernel(%arg0: i32, %arg1: i32, %arg2: memref<128x11xbf16, #tpu.memory_space<vmem>>, %arg3: memref<1x10x16x12xbf16, #tpu.memory_space<vmem>>, %arg4: memref<36x3xf32, #tpu.memory_space<vmem>>, %arg5: memref<1x3xf32, #tpu.memory_space<vmem>>, %arg6: memref<3x32xf32, #tpu.memory_space<vmem>>, %arg7: memref<3x32xf32, #tpu.memory_space<vmem>>, %arg8: memref<1x32xf32, #tpu.memory_space<vmem>>, %arg9: memref<1x32xf32, #tpu.memory_space<vmem>>, %arg10: memref<3x32xf32, #tpu.memory_space<vmem>>, %arg11: memref<1x32xf32, #tpu.memory_space<vmem>>, %arg12: memref<1x32xf32, #tpu.memory_space<vmem>>, %arg13: memref<32x32xf32, #tpu.memory_space<vmem>>, %arg14: memref<1x32xf32, #tpu.memory_space<vmem>>, %arg15: memref<32x3xf32, #tpu.memory_space<vmem>>, %arg16: memref<1x3xf32, #tpu.memory_space<vmem>>, %arg17: memref<128x128xbf16, #tpu.memory_space<vmem>>) attributes {dimension_semantics = [#tpu.dimension_semantics<parallel>, #tpu.dimension_semantics<parallel>], iteration_bounds = array<i64: 2, 2>, scalar_prefetch = 0 : i64, scratch_operands = 0 : i64, tpu.core_type = #tpu.core_type<tc>, window_params = [{transform_indices = @transform_0, window_bounds = array<i64: 128, 11>}, {transform_indices = @transform_1, window_bounds = array<i64: 1, 10, 16, 12>}, {pipeline_mode = #tpu.pipeline_mode<synchronous>, transform_indices = @transform_2, window_bounds = array<i64: 36, 3>}, {pipeline_mode = #tpu.pipeline_mode<synchronous>, transform_indices = @transform_3, window_bounds = array<i64: 1, 3>}, {pipeline_mode = #tpu.pipeline_mode<synchronous>, transform_indices = @transform_4, window_bounds = array<i64: 3, 32>}, {pipeline_mode = #tpu.pipeline_mode<synchronous>, transform_indices = @transform_5, window_bounds = array<i64: 3, 32>}, {pipeline_mode = #tpu.pipeline_mode<synchronous>, transform_indices = @transform_6, window_bounds = array<i64: 1, 32>}, {pipeline_mode = #tpu.pipeline_mode<synchronous>, transform_indices = @transform_7, window_bounds = array<i64: 1, 32>}, {pipeline_mode = #tpu.pipeline_mode<synchronous>, transform_indices = @transform_8, window_bounds = array<i64: 3, 32>}, {pipeline_mode = #tpu.pipeline_mode<synchronous>, transform_indices = @transform_9, window_bounds = array<i64: 1, 32>}, {pipeline_mode = #tpu.pipeline_mode<synchronous>, transform_indices = @transform_10, window_bounds = array<i64: 1, 32>}, {pipeline_mode = #tpu.pipeline_mode<synchronous>, transform_indices = @transform_11, window_bounds = array<i64: 32, 32>}, {pipeline_mode = #tpu.pipeline_mode<synchronous>, transform_indices = @transform_12, window_bounds = array<i64: 1, 32>}, {pipeline_mode = #tpu.pipeline_mode<synchronous>, transform_indices = @transform_13, window_bounds = array<i64: 32, 3>}, {pipeline_mode = #tpu.pipeline_mode<synchronous>, transform_indices = @transform_14, window_bounds = array<i64: 1, 3>}, {transform_indices = @transform_15, window_bounds = array<i64: 128, 128>}]} {
    %c0 = arith.constant 0 : index
    %c0_0 = arith.constant 0 : index
    %0 = vector.load %arg2[%c0, %c0_0] : memref<128x11xbf16, #tpu.memory_space<vmem>>, vector<128x11xbf16>
    %1 = arith.extf %0 : vector<128x11xbf16> to vector<128x11xf32>
    %2 = vector.extract_strided_slice %1 {offsets = [0, 0], sizes = [128, 3], strides = [1, 1]} : vector<128x11xf32> to vector<128x3xf32>
    %3 = vector.extract_strided_slice %1 {offsets = [0, 3], sizes = [128, 1], strides = [1, 1]} : vector<128x11xf32> to vector<128x1xf32>
    %4 = vector.extract_strided_slice %1 {offsets = [0, 4], sizes = [128, 1], strides = [1, 1]} : vector<128x11xf32> to vector<128x1xf32>
    %5 = vector.extract_strided_slice %1 {offsets = [0, 5], sizes = [128, 3], strides = [1, 1]} : vector<128x11xf32> to vector<128x3xf32>
    %6 = vector.extract_strided_slice %1 {offsets = [0, 8], sizes = [128, 3], strides = [1, 1]} : vector<128x11xf32> to vector<128x3xf32>
    %7 = vector.broadcast %4 : vector<128x1xf32> to vector<128x3xf32>
    %8 = arith.mulf %2, %7 : vector<128x3xf32>
    %c0_1 = arith.constant 0 : index
    %c0_2 = arith.constant 0 : index
    %9 = vector.load %arg10[%c0_1, %c0_2] : memref<3x32xf32, #tpu.memory_space<vmem>>, vector<3x32xf32>
    %cst = arith.constant dense<0.000000e+00> : vector<128x32xf32>
    %10 = tpu.matmul %8, %9, %cst {dimension_numbers = #tpu.dot_dimension_numbers<[1], [0], [0], [1], [0, 0, 1, 1], [], []>} : vector<128x3xf32>, vector<3x32xf32>, vector<128x32xf32> -> vector<128x32xf32>
    %cst_3 = arith.constant 1.000000e+00 : f32
    %11 = vector.broadcast %cst_3 : f32 to vector<128x1xf32>
    %12 = arith.subf %11, %4 : vector<128x1xf32>
    %c0_4 = arith.constant 0 : index
    %c0_5 = arith.constant 0 : index
    %13 = vector.load %arg11[%c0_4, %c0_5] : memref<1x32xf32, #tpu.memory_space<vmem>>, vector<1x32xf32>
    %14 = vector.broadcast %12 : vector<128x1xf32> to vector<128x32xf32>
    %15 = vector.broadcast %13 : vector<1x32xf32> to vector<128x32xf32>
    %16 = arith.mulf %14, %15 : vector<128x32xf32>
    %17 = arith.addf %10, %16 : vector<128x32xf32>
    %c0_6 = arith.constant 0 : index
    %c0_7 = arith.constant 0 : index
    %18 = vector.load %arg12[%c0_6, %c0_7] : memref<1x32xf32, #tpu.memory_space<vmem>>, vector<1x32xf32>
    %19 = vector.broadcast %18 : vector<1x32xf32> to vector<128x32xf32>
    %20 = arith.addf %17, %19 : vector<128x32xf32>
    %cst_8 = arith.constant 0.000000e+00 : f32
    %21 = vector.broadcast %cst_8 : f32 to vector<128x32xf32>
    %22 = arith.maximumf %20, %21 : vector<128x32xf32>
    %c0_9 = arith.constant 0 : index
    %c0_10 = arith.constant 0 : index
    %23 = vector.load %arg13[%c0_9, %c0_10] : memref<32x32xf32, #tpu.memory_space<vmem>>, vector<32x32xf32>
    %cst_11 = arith.constant dense<0.000000e+00> : vector<128x32xf32>
    %24 = tpu.matmul %22, %23, %cst_11 {dimension_numbers = #tpu.dot_dimension_numbers<[1], [0], [0], [1], [0, 0, 1, 1], [], []>} : vector<128x32xf32>, vector<32x32xf32>, vector<128x32xf32> -> vector<128x32xf32>
    %c0_12 = arith.constant 0 : index
    %c0_13 = arith.constant 0 : index
    %25 = vector.load %arg14[%c0_12, %c0_13] : memref<1x32xf32, #tpu.memory_space<vmem>>, vector<1x32xf32>
    %26 = vector.broadcast %25 : vector<1x32xf32> to vector<128x32xf32>
    %27 = arith.addf %24, %26 : vector<128x32xf32>
    %cst_14 = arith.constant 0.000000e+00 : f32
    %28 = vector.broadcast %cst_14 : f32 to vector<128x32xf32>
    %29 = arith.maximumf %27, %28 : vector<128x32xf32>
    %c0_15 = arith.constant 0 : index
    %c0_16 = arith.constant 0 : index
    %30 = vector.load %arg15[%c0_15, %c0_16] : memref<32x3xf32, #tpu.memory_space<vmem>>, vector<32x3xf32>
    %cst_17 = arith.constant dense<0.000000e+00> : vector<128x3xf32>
    %31 = tpu.matmul %29, %30, %cst_17 {dimension_numbers = #tpu.dot_dimension_numbers<[1], [0], [0], [1], [0, 0, 1, 1], [], []>} : vector<128x32xf32>, vector<32x3xf32>, vector<128x3xf32> -> vector<128x3xf32>
    %c0_18 = arith.constant 0 : index
    %c0_19 = arith.constant 0 : index
    %32 = vector.load %arg16[%c0_18, %c0_19] : memref<1x3xf32, #tpu.memory_space<vmem>>, vector<1x3xf32>
    %33 = vector.broadcast %32 : vector<1x3xf32> to vector<128x3xf32>
    %34 = arith.addf %31, %33 : vector<128x3xf32>
    %c0_20 = arith.constant 0 : index
    %c0_21 = arith.constant 0 : index
    %c0_22 = arith.constant 0 : index
    %c0_23 = arith.constant 0 : index
    %35 = vector.load %arg3[%c0_20, %c0_21, %c0_22, %c0_23] : memref<1x10x16x12xbf16, #tpu.memory_space<vmem>>, vector<1x10x16x12xbf16>
    %36 = vector.shape_cast %35 : vector<1x10x16x12xbf16> to vector<10x16x12xbf16>
    %37 = arith.extf %36 : vector<10x16x12xbf16> to vector<10x16x12xf32>
    %38 = vector.extract_strided_slice %37 {offsets = [0, 0, 0], sizes = [8, 16, 12], strides = [1, 1, 1]} : vector<10x16x12xf32> to vector<8x16x12xf32>
    %39 = vector.extract_strided_slice %37 {offsets = [1, 0, 0], sizes = [8, 16, 12], strides = [1, 1, 1]} : vector<10x16x12xf32> to vector<8x16x12xf32>
    %40 = vector.extract_strided_slice %37 {offsets = [2, 0, 0], sizes = [8, 16, 12], strides = [1, 1, 1]} : vector<10x16x12xf32> to vector<8x16x12xf32>
    %41 = tpu.concatenate %38, %39, %40 in 2 : vector<8x16x12xf32>, vector<8x16x12xf32>, vector<8x16x12xf32> -> vector<8x16x36xf32>
    %42 = vector.shape_cast %41 : vector<8x16x36xf32> to vector<128x36xf32>
    %c0_24 = arith.constant 0 : index
    %c0_25 = arith.constant 0 : index
    %43 = vector.load %arg4[%c0_24, %c0_25] : memref<36x3xf32, #tpu.memory_space<vmem>>, vector<36x3xf32>
    %cst_26 = arith.constant dense<0.000000e+00> : vector<128x3xf32>
    %44 = tpu.matmul %42, %43, %cst_26 {dimension_numbers = #tpu.dot_dimension_numbers<[1], [0], [0], [1], [0, 0, 1, 1], [], []>} : vector<128x36xf32>, vector<36x3xf32>, vector<128x3xf32> -> vector<128x3xf32>
    %c0_27 = arith.constant 0 : index
    %c0_28 = arith.constant 0 : index
    %45 = vector.load %arg5[%c0_27, %c0_28] : memref<1x3xf32, #tpu.memory_space<vmem>>, vector<1x3xf32>
    %46 = vector.broadcast %45 : vector<1x3xf32> to vector<128x3xf32>
    %47 = arith.addf %44, %46 : vector<128x3xf32>
    %c0_29 = arith.constant 0 : index
    %c0_30 = arith.constant 0 : index
    %48 = vector.load %arg6[%c0_29, %c0_30] : memref<3x32xf32, #tpu.memory_space<vmem>>, vector<3x32xf32>
    %cst_31 = arith.constant dense<0.000000e+00> : vector<128x32xf32>
    %49 = tpu.matmul %2, %48, %cst_31 {dimension_numbers = #tpu.dot_dimension_numbers<[1], [0], [0], [1], [0, 0, 1, 1], [], []>} : vector<128x3xf32>, vector<3x32xf32>, vector<128x32xf32> -> vector<128x32xf32>
    %c0_32 = arith.constant 0 : index
    %c0_33 = arith.constant 0 : index
    %50 = vector.load %arg7[%c0_32, %c0_33] : memref<3x32xf32, #tpu.memory_space<vmem>>, vector<3x32xf32>
    %cst_34 = arith.constant dense<0.000000e+00> : vector<128x32xf32>
    %51 = tpu.matmul %47, %50, %cst_34 {dimension_numbers = #tpu.dot_dimension_numbers<[1], [0], [0], [1], [0, 0, 1, 1], [], []>} : vector<128x3xf32>, vector<3x32xf32>, vector<128x32xf32> -> vector<128x32xf32>
    %52 = arith.addf %49, %51 : vector<128x32xf32>
    %cst_35 = arith.constant 1.000000e+00 : f32
    %53 = vector.broadcast %cst_35 : f32 to vector<128x1xf32>
    %54 = arith.subf %53, %3 : vector<128x1xf32>
    %c0_36 = arith.constant 0 : index
    %c0_37 = arith.constant 0 : index
    %55 = vector.load %arg8[%c0_36, %c0_37] : memref<1x32xf32, #tpu.memory_space<vmem>>, vector<1x32xf32>
    %56 = vector.broadcast %54 : vector<128x1xf32> to vector<128x32xf32>
    %57 = vector.broadcast %55 : vector<1x32xf32> to vector<128x32xf32>
    %58 = arith.mulf %56, %57 : vector<128x32xf32>
    %59 = arith.addf %52, %58 : vector<128x32xf32>
    %c0_38 = arith.constant 0 : index
    %c0_39 = arith.constant 0 : index
    %60 = vector.load %arg9[%c0_38, %c0_39] : memref<1x32xf32, #tpu.memory_space<vmem>>, vector<1x32xf32>
    %61 = vector.broadcast %60 : vector<1x32xf32> to vector<128x32xf32>
    %62 = arith.addf %59, %61 : vector<128x32xf32>
    %cst_40 = arith.constant 0.000000e+00 : f32
    %63 = vector.broadcast %cst_40 : f32 to vector<128x32xf32>
    %64 = arith.maximumf %62, %63 : vector<128x32xf32>
    %cst_41 = arith.constant 0.000000e+00 : f32
    %65 = vector.broadcast %cst_41 : f32 to vector<128x16xf32>
    %66 = tpu.concatenate %64, %22, %29, %47, %34, %2, %4, %5, %6, %65 in 1 : vector<128x32xf32>, vector<128x32xf32>, vector<128x32xf32>, vector<128x3xf32>, vector<128x3xf32>, vector<128x3xf32>, vector<128x1xf32>, vector<128x3xf32>, vector<128x3xf32>, vector<128x16xf32> -> vector<128x128xf32>
    %67 = arith.truncf %66 : vector<128x128xf32> to vector<128x128xbf16>
    %c0_42 = arith.constant 0 : index
    %c0_43 = arith.constant 0 : index
    %68 = vector.load %arg17[%c0_42, %c0_43] : memref<128x128xbf16, #tpu.memory_space<vmem>>, vector<128x128xbf16>
    tpu.vector_store %arg17[%c0_42, %c0_43], %67 {strides = array<i32>} : memref<128x128xbf16, #tpu.memory_space<vmem>>, vector<128x128xbf16>,
    return
  }
  func.func @transform_0(%arg0: i32, %arg1: i32) -> (i32, i32) {
    %c2_i32 = arith.constant 2 : i32
    %0 = arith.muli %arg0, %c2_i32 : i32
    %1 = arith.addi %0, %arg1 : i32
    %c0_i32 = arith.constant 0 : i32
    %c0_i32_0 = arith.constant 0 : i32
    return %1, %c0_i32 : i32, i32
  }
  func.func @transform_1(%arg0: i32, %arg1: i32) -> (i32, i32, i32, i32) {
    %c2_i32 = arith.constant 2 : i32
    %0 = arith.muli %arg0, %c2_i32 : i32
    %1 = arith.addi %0, %arg1 : i32
    %c0_i32 = arith.constant 0 : i32
    %c0_i32_0 = arith.constant 0 : i32
    %c0_i32_1 = arith.constant 0 : i32
    %c0_i32_2 = arith.constant 0 : i32
    return %1, %c0_i32, %c0_i32_0, %c0_i32_1 : i32, i32, i32, i32
  }
  func.func @transform_2(%arg0: i32, %arg1: i32) -> (i32, i32) {
    %c0_i32 = arith.constant 0 : i32
    %c0_i32_0 = arith.constant 0 : i32
    %c0_i32_1 = arith.constant 0 : i32
    return %c0_i32, %c0_i32_0 : i32, i32
  }
  func.func @transform_3(%arg0: i32, %arg1: i32) -> (i32, i32) {
    %c0_i32 = arith.constant 0 : i32
    %c0_i32_0 = arith.constant 0 : i32
    %c0_i32_1 = arith.constant 0 : i32
    return %c0_i32, %c0_i32_0 : i32, i32
  }
  func.func @transform_4(%arg0: i32, %arg1: i32) -> (i32, i32) {
    %c0_i32 = arith.constant 0 : i32
    %c0_i32_0 = arith.constant 0 : i32
    %c0_i32_1 = arith.constant 0 : i32
    return %c0_i32, %c0_i32_0 : i32, i32
  }
  func.func @transform_5(%arg0: i32, %arg1: i32) -> (i32, i32) {
    %c0_i32 = arith.constant 0 : i32
    %c0_i32_0 = arith.constant 0 : i32
    %c0_i32_1 = arith.constant 0 : i32
    return %c0_i32, %c0_i32_0 : i32, i32
  }
  func.func @transform_6(%arg0: i32, %arg1: i32) -> (i32, i32) {
    %c0_i32 = arith.constant 0 : i32
    %c0_i32_0 = arith.constant 0 : i32
    %c0_i32_1 = arith.constant 0 : i32
    return %c0_i32, %c0_i32_0 : i32, i32
  }
  func.func @transform_7(%arg0: i32, %arg1: i32) -> (i32, i32) {
    %c0_i32 = arith.constant 0 : i32
    %c0_i32_0 = arith.constant 0 : i32
    %c0_i32_1 = arith.constant 0 : i32
    return %c0_i32, %c0_i32_0 : i32, i32
  }
  func.func @transform_8(%arg0: i32, %arg1: i32) -> (i32, i32) {
    %c0_i32 = arith.constant 0 : i32
    %c0_i32_0 = arith.constant 0 : i32
    %c0_i32_1 = arith.constant 0 : i32
    return %c0_i32, %c0_i32_0 : i32, i32
  }
  func.func @transform_9(%arg0: i32, %arg1: i32) -> (i32, i32) {
    %c0_i32 = arith.constant 0 : i32
    %c0_i32_0 = arith.constant 0 : i32
    %c0_i32_1 = arith.constant 0 : i32
    return %c0_i32, %c0_i32_0 : i32, i32
  }
  func.func @transform_10(%arg0: i32, %arg1: i32) -> (i32, i32) {
    %c0_i32 = arith.constant 0 : i32
    %c0_i32_0 = arith.constant 0 : i32
    %c0_i32_1 = arith.constant 0 : i32
    return %c0_i32, %c0_i32_0 : i32, i32
  }
  func.func @transform_11(%arg0: i32, %arg1: i32) -> (i32, i32) {
    %c0_i32 = arith.constant 0 : i32
    %c0_i32_0 = arith.constant 0 : i32
    %c0_i32_1 = arith.constant 0 : i32
    return %c0_i32, %c0_i32_0 : i32, i32
  }
  func.func @transform_12(%arg0: i32, %arg1: i32) -> (i32, i32) {
    %c0_i32 = arith.constant 0 : i32
    %c0_i32_0 = arith.constant 0 : i32
    %c0_i32_1 = arith.constant 0 : i32
    return %c0_i32, %c0_i32_0 : i32, i32
  }
  func.func @transform_13(%arg0: i32, %arg1: i32) -> (i32, i32) {
    %c0_i32 = arith.constant 0 : i32
    %c0_i32_0 = arith.constant 0 : i32
    %c0_i32_1 = arith.constant 0 : i32
    return %c0_i32, %c0_i32_0 : i32, i32
  }
  func.func @transform_14(%arg0: i32, %arg1: i32) -> (i32, i32) {
    %c0_i32 = arith.constant 0 : i32
    %c0_i32_0 = arith.constant 0 : i32
    %c0_i32_1 = arith.constant 0 : i32
    return %c0_i32, %c0_i32_0 : i32, i32
  }
  func.func @transform_15(%arg0: i32, %arg1: i32) -> (i32, i32) {
    %c2_i32 = arith.constant 2 : i32
    %0 = arith.muli %arg0, %c2_i32 : i32
    %1 = arith.addi %0, %arg1 : i32
    %c0_i32 = arith.constant 0 : i32
    %c0_i32_0 = arith.constant 0 : i32
    return %1, %c0_i32 : i32, i32
  }
}

module attributes {stable_mosaic.version = 11 : i64} {
  func.func @_stage_b_kernel(%arg0: i32, %arg1: memref<128x64xbf16, #tpu.memory_space<vmem>>, %arg2: memref<32x32xf32, #tpu.memory_space<vmem>>, %arg3: memref<1x32xf32, #tpu.memory_space<vmem>>, %arg4: memref<32x32xf32, #tpu.memory_space<vmem>>, %arg5: memref<1x32xf32, #tpu.memory_space<vmem>>, %arg6: memref<32x32xf32, #tpu.memory_space<vmem>>, %arg7: memref<1x32xf32, #tpu.memory_space<vmem>>, %arg8: memref<32x32xf32, #tpu.memory_space<vmem>>, %arg9: memref<32x32xf32, #tpu.memory_space<vmem>>, %arg10: memref<128x32xbf16, #tpu.memory_space<vmem>>) attributes {dimension_semantics = [#tpu.dimension_semantics<parallel>], iteration_bounds = array<i64: 1>, scalar_prefetch = 0 : i64, scratch_operands = 0 : i64, tpu.core_type = #tpu.core_type<tc>, window_params = [{transform_indices = @transform_0, window_bounds = array<i64: 128, 64>}, {pipeline_mode = #tpu.pipeline_mode<synchronous>, transform_indices = @transform_1, window_bounds = array<i64: 32, 32>}, {pipeline_mode = #tpu.pipeline_mode<synchronous>, transform_indices = @transform_2, window_bounds = array<i64: 1, 32>}, {pipeline_mode = #tpu.pipeline_mode<synchronous>, transform_indices = @transform_3, window_bounds = array<i64: 32, 32>}, {pipeline_mode = #tpu.pipeline_mode<synchronous>, transform_indices = @transform_4, window_bounds = array<i64: 1, 32>}, {pipeline_mode = #tpu.pipeline_mode<synchronous>, transform_indices = @transform_5, window_bounds = array<i64: 32, 32>}, {pipeline_mode = #tpu.pipeline_mode<synchronous>, transform_indices = @transform_6, window_bounds = array<i64: 1, 32>}, {pipeline_mode = #tpu.pipeline_mode<synchronous>, transform_indices = @transform_7, window_bounds = array<i64: 32, 32>}, {pipeline_mode = #tpu.pipeline_mode<synchronous>, transform_indices = @transform_8, window_bounds = array<i64: 32, 32>}, {transform_indices = @transform_9, window_bounds = array<i64: 128, 32>}]} {
    %c0 = arith.constant 0 : index
    %c0_0 = arith.constant 0 : index
    %0 = vector.load %arg1[%c0, %c0_0] : memref<128x64xbf16, #tpu.memory_space<vmem>>, vector<128x64xbf16>
    %1 = arith.extf %0 : vector<128x64xbf16> to vector<128x64xf32>
    %2 = vector.extract_strided_slice %1 {offsets = [0, 0], sizes = [128, 32], strides = [1, 1]} : vector<128x64xf32> to vector<128x32xf32>
    %3 = vector.extract_strided_slice %1 {offsets = [0, 32], sizes = [128, 32], strides = [1, 1]} : vector<128x64xf32> to vector<128x32xf32>
    %c0_1 = arith.constant 0 : index
    %c0_2 = arith.constant 0 : index
    %4 = vector.load %arg2[%c0_1, %c0_2] : memref<32x32xf32, #tpu.memory_space<vmem>>, vector<32x32xf32>
    %cst = arith.constant dense<0.000000e+00> : vector<128x32xf32>
    %5 = tpu.matmul %2, %4, %cst {dimension_numbers = #tpu.dot_dimension_numbers<[1], [0], [0], [1], [0, 0, 1, 1], [], []>} : vector<128x32xf32>, vector<32x32xf32>, vector<128x32xf32> -> vector<128x32xf32>
    %c0_3 = arith.constant 0 : index
    %c0_4 = arith.constant 0 : index
    %6 = vector.load %arg3[%c0_3, %c0_4] : memref<1x32xf32, #tpu.memory_space<vmem>>, vector<1x32xf32>
    %7 = vector.broadcast %6 : vector<1x32xf32> to vector<128x32xf32>
    %8 = arith.addf %5, %7 : vector<128x32xf32>
    %cst_5 = arith.constant 0.000000e+00 : f32
    %9 = vector.broadcast %cst_5 : f32 to vector<128x32xf32>
    %10 = arith.maximumf %8, %9 : vector<128x32xf32>
    %11 = arith.addf %10, %3 : vector<128x32xf32>
    %c0_6 = arith.constant 0 : index
    %c0_7 = arith.constant 0 : index
    %12 = vector.load %arg4[%c0_6, %c0_7] : memref<32x32xf32, #tpu.memory_space<vmem>>, vector<32x32xf32>
    %cst_8 = arith.constant dense<0.000000e+00> : vector<128x32xf32>
    %13 = tpu.matmul %11, %12, %cst_8 {dimension_numbers = #tpu.dot_dimension_numbers<[1], [0], [0], [1], [0, 0, 1, 1], [], []>} : vector<128x32xf32>, vector<32x32xf32>, vector<128x32xf32> -> vector<128x32xf32>
    %c0_9 = arith.constant 0 : index
    %c0_10 = arith.constant 0 : index
    %14 = vector.load %arg5[%c0_9, %c0_10] : memref<1x32xf32, #tpu.memory_space<vmem>>, vector<1x32xf32>
    %15 = vector.broadcast %14 : vector<1x32xf32> to vector<128x32xf32>
    %16 = arith.addf %13, %15 : vector<128x32xf32>
    %cst_11 = arith.constant 0.000000e+00 : f32
    %17 = vector.broadcast %cst_11 : f32 to vector<128x32xf32>
    %18 = arith.maximumf %16, %17 : vector<128x32xf32>
    %c0_12 = arith.constant 0 : index
    %c0_13 = arith.constant 0 : index
    %19 = vector.load %arg6[%c0_12, %c0_13] : memref<32x32xf32, #tpu.memory_space<vmem>>, vector<32x32xf32>
    %cst_14 = arith.constant dense<0.000000e+00> : vector<128x32xf32>
    %20 = tpu.matmul %18, %19, %cst_14 {dimension_numbers = #tpu.dot_dimension_numbers<[1], [0], [0], [1], [0, 0, 1, 1], [], []>} : vector<128x32xf32>, vector<32x32xf32>, vector<128x32xf32> -> vector<128x32xf32>
    %c0_15 = arith.constant 0 : index
    %c0_16 = arith.constant 0 : index
    %21 = vector.load %arg7[%c0_15, %c0_16] : memref<1x32xf32, #tpu.memory_space<vmem>>, vector<1x32xf32>
    %22 = vector.broadcast %21 : vector<1x32xf32> to vector<128x32xf32>
    %23 = arith.addf %20, %22 : vector<128x32xf32>
    %c0_17 = arith.constant 0 : index
    %c0_18 = arith.constant 0 : index
    %24 = vector.load %arg8[%c0_17, %c0_18] : memref<32x32xf32, #tpu.memory_space<vmem>>, vector<32x32xf32>
    %cst_19 = arith.constant dense<0.000000e+00> : vector<128x32xf32>
    %25 = tpu.matmul %18, %24, %cst_19 {dimension_numbers = #tpu.dot_dimension_numbers<[1], [0], [0], [1], [0, 0, 1, 1], [], []>} : vector<128x32xf32>, vector<32x32xf32>, vector<128x32xf32> -> vector<128x32xf32>
    %c0_20 = arith.constant 0 : index
    %c0_21 = arith.constant 0 : index
    %26 = vector.load %arg9[%c0_20, %c0_21] : memref<32x32xf32, #tpu.memory_space<vmem>>, vector<32x32xf32>
    %cst_22 = arith.constant dense<0.000000e+00> : vector<128x32xf32>
    %27 = tpu.matmul %23, %26, %cst_22 {dimension_numbers = #tpu.dot_dimension_numbers<[1], [0], [0], [1], [0, 0, 1, 1], [], []>} : vector<128x32xf32>, vector<32x32xf32>, vector<128x32xf32> -> vector<128x32xf32>
    %28 = arith.addf %25, %27 : vector<128x32xf32>
    %29 = arith.truncf %28 : vector<128x32xf32> to vector<128x32xbf16>
    %c0_23 = arith.constant 0 : index
    %c0_24 = arith.constant 0 : index
    %30 = vector.load %arg10[%c0_23, %c0_24] : memref<128x32xbf16, #tpu.memory_space<vmem>>, vector<128x32xbf16>
    tpu.vector_store %arg10[%c0_23, %c0_24], %29 {strides = array<i32>} : memref<128x32xbf16, #tpu.memory_space<vmem>>, vector<128x32xbf16>,
    return
  }
  func.func @transform_0(%arg0: i32) -> (i32, i32) {
    %c0_i32 = arith.constant 0 : i32
    %c0_i32_0 = arith.constant 0 : i32
    return %arg0, %c0_i32 : i32, i32
  }
  func.func @transform_1(%arg0: i32) -> (i32, i32) {
    %c0_i32 = arith.constant 0 : i32
    %c0_i32_0 = arith.constant 0 : i32
    %c0_i32_1 = arith.constant 0 : i32
    return %c0_i32, %c0_i32_0 : i32, i32
  }
  func.func @transform_2(%arg0: i32) -> (i32, i32) {
    %c0_i32 = arith.constant 0 : i32
    %c0_i32_0 = arith.constant 0 : i32
    %c0_i32_1 = arith.constant 0 : i32
    return %c0_i32, %c0_i32_0 : i32, i32
  }
  func.func @transform_3(%arg0: i32) -> (i32, i32) {
    %c0_i32 = arith.constant 0 : i32
    %c0_i32_0 = arith.constant 0 : i32
    %c0_i32_1 = arith.constant 0 : i32
    return %c0_i32, %c0_i32_0 : i32, i32
  }
  func.func @transform_4(%arg0: i32) -> (i32, i32) {
    %c0_i32 = arith.constant 0 : i32
    %c0_i32_0 = arith.constant 0 : i32
    %c0_i32_1 = arith.constant 0 : i32
    return %c0_i32, %c0_i32_0 : i32, i32
  }
  func.func @transform_5(%arg0: i32) -> (i32, i32) {
    %c0_i32 = arith.constant 0 : i32
    %c0_i32_0 = arith.constant 0 : i32
    %c0_i32_1 = arith.constant 0 : i32
    return %c0_i32, %c0_i32_0 : i32, i32
  }
  func.func @transform_6(%arg0: i32) -> (i32, i32) {
    %c0_i32 = arith.constant 0 : i32
    %c0_i32_0 = arith.constant 0 : i32
    %c0_i32_1 = arith.constant 0 : i32
    return %c0_i32, %c0_i32_0 : i32, i32
  }
  func.func @transform_7(%arg0: i32) -> (i32, i32) {
    %c0_i32 = arith.constant 0 : i32
    %c0_i32_0 = arith.constant 0 : i32
    %c0_i32_1 = arith.constant 0 : i32
    return %c0_i32, %c0_i32_0 : i32, i32
  }
  func.func @transform_8(%arg0: i32) -> (i32, i32) {
    %c0_i32 = arith.constant 0 : i32
    %c0_i32_0 = arith.constant 0 : i32
    %c0_i32_1 = arith.constant 0 : i32
    return %c0_i32, %c0_i32_0 : i32, i32
  }
  func.func @transform_9(%arg0: i32) -> (i32, i32) {
    %c0_i32 = arith.constant 0 : i32
    %c0_i32_0 = arith.constant 0 : i32
    return %arg0, %c0_i32 : i32, i32
  }
}

module attributes {stable_mosaic.version = 11 : i64} {
  func.func @_stage_c_kernel(%arg0: i32, %arg1: i32, %arg2: memref<128x128xbf16, #tpu.memory_space<vmem>>, %arg3: memref<64x32xbf16, #tpu.memory_space<vmem>>, %arg4: memref<96x32xf32, #tpu.memory_space<vmem>>, %arg5: memref<1x32xf32, #tpu.memory_space<vmem>>, %arg6: memref<32x3xf32, #tpu.memory_space<vmem>>, %arg7: memref<1x3xf32, #tpu.memory_space<vmem>>, %arg8: memref<32x3xf32, #tpu.memory_space<vmem>>, %arg9: memref<3x3xf32, #tpu.memory_space<vmem>>, %arg10: memref<1x3xf32, #tpu.memory_space<vmem>>, %arg11: memref<18x96xf32, #tpu.memory_space<vmem>>, %arg12: memref<1x96xf32, #tpu.memory_space<vmem>>, %arg13: memref<128x128xbf16, #tpu.memory_space<vmem>>) attributes {dimension_semantics = [#tpu.dimension_semantics<parallel>, #tpu.dimension_semantics<parallel>], iteration_bounds = array<i64: 2, 2>, scalar_prefetch = 0 : i64, scratch_operands = 0 : i64, tpu.core_type = #tpu.core_type<tc>, window_params = [{transform_indices = @transform_0, window_bounds = array<i64: 128, 128>}, {transform_indices = @transform_1, window_bounds = array<i64: 64, 32>}, {pipeline_mode = #tpu.pipeline_mode<synchronous>, transform_indices = @transform_2, window_bounds = array<i64: 96, 32>}, {pipeline_mode = #tpu.pipeline_mode<synchronous>, transform_indices = @transform_3, window_bounds = array<i64: 1, 32>}, {pipeline_mode = #tpu.pipeline_mode<synchronous>, transform_indices = @transform_4, window_bounds = array<i64: 32, 3>}, {pipeline_mode = #tpu.pipeline_mode<synchronous>, transform_indices = @transform_5, window_bounds = array<i64: 1, 3>}, {pipeline_mode = #tpu.pipeline_mode<synchronous>, transform_indices = @transform_6, window_bounds = array<i64: 32, 3>}, {pipeline_mode = #tpu.pipeline_mode<synchronous>, transform_indices = @transform_7, window_bounds = array<i64: 3, 3>}, {pipeline_mode = #tpu.pipeline_mode<synchronous>, transform_indices = @transform_8, window_bounds = array<i64: 1, 3>}, {pipeline_mode = #tpu.pipeline_mode<synchronous>, transform_indices = @transform_9, window_bounds = array<i64: 18, 96>}, {pipeline_mode = #tpu.pipeline_mode<synchronous>, transform_indices = @transform_10, window_bounds = array<i64: 1, 96>}, {transform_indices = @transform_11, window_bounds = array<i64: 128, 128>}]} {
    %c0 = arith.constant 0 : index
    %c0_0 = arith.constant 0 : index
    %0 = vector.load %arg2[%c0, %c0_0] : memref<128x128xbf16, #tpu.memory_space<vmem>>, vector<128x128xbf16>
    %1 = arith.extf %0 : vector<128x128xbf16> to vector<128x128xf32>
    %2 = vector.extract_strided_slice %1 {offsets = [0, 0], sizes = [128, 96], strides = [1, 1]} : vector<128x128xf32> to vector<128x96xf32>
    %3 = vector.extract_strided_slice %1 {offsets = [0, 96], sizes = [128, 3], strides = [1, 1]} : vector<128x128xf32> to vector<128x3xf32>
    %4 = vector.extract_strided_slice %1 {offsets = [0, 99], sizes = [128, 3], strides = [1, 1]} : vector<128x128xf32> to vector<128x3xf32>
    %5 = vector.extract_strided_slice %1 {offsets = [0, 102], sizes = [128, 3], strides = [1, 1]} : vector<128x128xf32> to vector<128x3xf32>
    %6 = vector.extract_strided_slice %1 {offsets = [0, 105], sizes = [128, 1], strides = [1, 1]} : vector<128x128xf32> to vector<128x1xf32>
    %7 = vector.extract_strided_slice %1 {offsets = [0, 106], sizes = [128, 3], strides = [1, 1]} : vector<128x128xf32> to vector<128x3xf32>
    %8 = vector.extract_strided_slice %1 {offsets = [0, 109], sizes = [128, 3], strides = [1, 1]} : vector<128x128xf32> to vector<128x3xf32>
    %c0_1 = arith.constant 0 : index
    %c0_2 = arith.constant 0 : index
    %9 = vector.load %arg3[%c0_1, %c0_2] : memref<64x32xbf16, #tpu.memory_space<vmem>>, vector<64x32xbf16>
    %10 = arith.extf %9 : vector<64x32xbf16> to vector<64x32xf32>
    %11 = vector.shape_cast %10 : vector<64x32xf32> to vector<4x16x32xf32>
    %12 = vector.shape_cast %11 : vector<4x16x32xf32> to vector<4x1x16x32xf32>
    %13 = vector.shape_cast %11 : vector<4x16x32xf32> to vector<4x1x16x32xf32>
    %14 = tpu.concatenate %12, %13 in 1 : vector<4x1x16x32xf32>, vector<4x1x16x32xf32> -> vector<4x2x16x32xf32>
    %15 = vector.shape_cast %14 : vector<4x2x16x32xf32> to vector<128x32xf32>
    %c0_3 = arith.constant 0 : index
    %c0_4 = arith.constant 0 : index
    %16 = vector.load %arg4[%c0_3, %c0_4] : memref<96x32xf32, #tpu.memory_space<vmem>>, vector<96x32xf32>
    %cst = arith.constant dense<0.000000e+00> : vector<128x32xf32>
    %17 = tpu.matmul %2, %16, %cst {dimension_numbers = #tpu.dot_dimension_numbers<[1], [0], [0], [1], [0, 0, 1, 1], [], []>} : vector<128x96xf32>, vector<96x32xf32>, vector<128x32xf32> -> vector<128x32xf32>
    %18 = arith.addf %15, %17 : vector<128x32xf32>
    %c0_5 = arith.constant 0 : index
    %c0_6 = arith.constant 0 : index
    %19 = vector.load %arg5[%c0_5, %c0_6] : memref<1x32xf32, #tpu.memory_space<vmem>>, vector<1x32xf32>
    %20 = vector.broadcast %19 : vector<1x32xf32> to vector<128x32xf32>
    %21 = arith.addf %18, %20 : vector<128x32xf32>
    %cst_7 = arith.constant 0.000000e+00 : f32
    %22 = vector.broadcast %cst_7 : f32 to vector<128x32xf32>
    %23 = arith.maximumf %21, %22 : vector<128x32xf32>
    %c0_8 = arith.constant 0 : index
    %c0_9 = arith.constant 0 : index
    %24 = vector.load %arg6[%c0_8, %c0_9] : memref<32x3xf32, #tpu.memory_space<vmem>>, vector<32x3xf32>
    %cst_10 = arith.constant dense<0.000000e+00> : vector<128x3xf32>
    %25 = tpu.matmul %23, %24, %cst_10 {dimension_numbers = #tpu.dot_dimension_numbers<[1], [0], [0], [1], [0, 0, 1, 1], [], []>} : vector<128x32xf32>, vector<32x3xf32>, vector<128x3xf32> -> vector<128x3xf32>
    %c0_11 = arith.constant 0 : index
    %c0_12 = arith.constant 0 : index
    %26 = vector.load %arg7[%c0_11, %c0_12] : memref<1x3xf32, #tpu.memory_space<vmem>>, vector<1x3xf32>
    %27 = vector.broadcast %26 : vector<1x3xf32> to vector<128x3xf32>
    %28 = arith.addf %25, %27 : vector<128x3xf32>
    %c0_13 = arith.constant 0 : index
    %c0_14 = arith.constant 0 : index
    %29 = vector.load %arg8[%c0_13, %c0_14] : memref<32x3xf32, #tpu.memory_space<vmem>>, vector<32x3xf32>
    %cst_15 = arith.constant dense<0.000000e+00> : vector<128x3xf32>
    %30 = tpu.matmul %23, %29, %cst_15 {dimension_numbers = #tpu.dot_dimension_numbers<[1], [0], [0], [1], [0, 0, 1, 1], [], []>} : vector<128x32xf32>, vector<32x3xf32>, vector<128x3xf32> -> vector<128x3xf32>
    %c0_16 = arith.constant 0 : index
    %c0_17 = arith.constant 0 : index
    %31 = vector.load %arg9[%c0_16, %c0_17] : memref<3x3xf32, #tpu.memory_space<vmem>>, vector<3x3xf32>
    %cst_18 = arith.constant dense<0.000000e+00> : vector<128x3xf32>
    %32 = tpu.matmul %28, %31, %cst_18 {dimension_numbers = #tpu.dot_dimension_numbers<[1], [0], [0], [1], [0, 0, 1, 1], [], []>} : vector<128x3xf32>, vector<3x3xf32>, vector<128x3xf32> -> vector<128x3xf32>
    %33 = arith.addf %30, %32 : vector<128x3xf32>
    %c0_19 = arith.constant 0 : index
    %c0_20 = arith.constant 0 : index
    %34 = vector.load %arg10[%c0_19, %c0_20] : memref<1x3xf32, #tpu.memory_space<vmem>>, vector<1x3xf32>
    %35 = vector.broadcast %34 : vector<1x3xf32> to vector<128x3xf32>
    %36 = arith.addf %33, %35 : vector<128x3xf32>
    %37 = vector.broadcast %6 : vector<128x1xf32> to vector<128x3xf32>
    %38 = arith.mulf %37, %5 : vector<128x3xf32>
    %cst_21 = arith.constant 1.000000e+00 : f32
    %39 = vector.broadcast %cst_21 : f32 to vector<128x1xf32>
    %40 = arith.subf %39, %6 : vector<128x1xf32>
    %41 = vector.broadcast %40 : vector<128x1xf32> to vector<128x3xf32>
    %42 = arith.mulf %41, %36 : vector<128x3xf32>
    %43 = arith.addf %38, %42 : vector<128x3xf32>
    %44 = tpu.concatenate %43, %36, %7, %4, %3, %8 in 1 : vector<128x3xf32>, vector<128x3xf32>, vector<128x3xf32>, vector<128x3xf32>, vector<128x3xf32>, vector<128x3xf32> -> vector<128x18xf32>
    %c0_22 = arith.constant 0 : index
    %c0_23 = arith.constant 0 : index
    %45 = vector.load %arg11[%c0_22, %c0_23] : memref<18x96xf32, #tpu.memory_space<vmem>>, vector<18x96xf32>
    %cst_24 = arith.constant dense<0.000000e+00> : vector<128x96xf32>
    %46 = tpu.matmul %44, %45, %cst_24 {dimension_numbers = #tpu.dot_dimension_numbers<[1], [0], [0], [1], [0, 0, 1, 1], [], []>} : vector<128x18xf32>, vector<18x96xf32>, vector<128x96xf32> -> vector<128x96xf32>
    %c0_25 = arith.constant 0 : index
    %c0_26 = arith.constant 0 : index
    %47 = vector.load %arg12[%c0_25, %c0_26] : memref<1x96xf32, #tpu.memory_space<vmem>>, vector<1x96xf32>
    %48 = vector.broadcast %47 : vector<1x96xf32> to vector<128x96xf32>
    %49 = arith.addf %46, %48 : vector<128x96xf32>
    %cst_27 = arith.constant 0.000000e+00 : f32
    %50 = vector.broadcast %cst_27 : f32 to vector<128x96xf32>
    %51 = arith.maximumf %49, %50 : vector<128x96xf32>
    %cst_28 = arith.constant 0.000000e+00 : f32
    %52 = vector.broadcast %cst_28 : f32 to vector<128x23xf32>
    %53 = tpu.concatenate %28, %36, %43, %51, %52 in 1 : vector<128x3xf32>, vector<128x3xf32>, vector<128x3xf32>, vector<128x96xf32>, vector<128x23xf32> -> vector<128x128xf32>
    %54 = arith.truncf %53 : vector<128x128xf32> to vector<128x128xbf16>
    %c0_29 = arith.constant 0 : index
    %c0_30 = arith.constant 0 : index
    %55 = vector.load %arg13[%c0_29, %c0_30] : memref<128x128xbf16, #tpu.memory_space<vmem>>, vector<128x128xbf16>
    tpu.vector_store %arg13[%c0_29, %c0_30], %54 {strides = array<i32>} : memref<128x128xbf16, #tpu.memory_space<vmem>>, vector<128x128xbf16>,
    return
  }
  func.func @transform_0(%arg0: i32, %arg1: i32) -> (i32, i32) {
    %c2_i32 = arith.constant 2 : i32
    %0 = arith.muli %arg0, %c2_i32 : i32
    %1 = arith.addi %0, %arg1 : i32
    %c0_i32 = arith.constant 0 : i32
    %c0_i32_0 = arith.constant 0 : i32
    return %1, %c0_i32 : i32, i32
  }
  func.func @transform_1(%arg0: i32, %arg1: i32) -> (i32, i32) {
    %c2_i32 = arith.constant 2 : i32
    %0 = arith.muli %arg0, %c2_i32 : i32
    %1 = arith.addi %0, %arg1 : i32
    %c0_i32 = arith.constant 0 : i32
    %c0_i32_0 = arith.constant 0 : i32
    return %1, %c0_i32 : i32, i32
  }
  func.func @transform_2(%arg0: i32, %arg1: i32) -> (i32, i32) {
    %c0_i32 = arith.constant 0 : i32
    %c0_i32_0 = arith.constant 0 : i32
    %c0_i32_1 = arith.constant 0 : i32
    return %c0_i32, %c0_i32_0 : i32, i32
  }
  func.func @transform_3(%arg0: i32, %arg1: i32) -> (i32, i32) {
    %c0_i32 = arith.constant 0 : i32
    %c0_i32_0 = arith.constant 0 : i32
    %c0_i32_1 = arith.constant 0 : i32
    return %c0_i32, %c0_i32_0 : i32, i32
  }
  func.func @transform_4(%arg0: i32, %arg1: i32) -> (i32, i32) {
    %c0_i32 = arith.constant 0 : i32
    %c0_i32_0 = arith.constant 0 : i32
    %c0_i32_1 = arith.constant 0 : i32
    return %c0_i32, %c0_i32_0 : i32, i32
  }
  func.func @transform_5(%arg0: i32, %arg1: i32) -> (i32, i32) {
    %c0_i32 = arith.constant 0 : i32
    %c0_i32_0 = arith.constant 0 : i32
    %c0_i32_1 = arith.constant 0 : i32
    return %c0_i32, %c0_i32_0 : i32, i32
  }
  func.func @transform_6(%arg0: i32, %arg1: i32) -> (i32, i32) {
    %c0_i32 = arith.constant 0 : i32
    %c0_i32_0 = arith.constant 0 : i32
    %c0_i32_1 = arith.constant 0 : i32
    return %c0_i32, %c0_i32_0 : i32, i32
  }
  func.func @transform_7(%arg0: i32, %arg1: i32) -> (i32, i32) {
    %c0_i32 = arith.constant 0 : i32
    %c0_i32_0 = arith.constant 0 : i32
    %c0_i32_1 = arith.constant 0 : i32
    return %c0_i32, %c0_i32_0 : i32, i32
  }
  func.func @transform_8(%arg0: i32, %arg1: i32) -> (i32, i32) {
    %c0_i32 = arith.constant 0 : i32
    %c0_i32_0 = arith.constant 0 : i32
    %c0_i32_1 = arith.constant 0 : i32
    return %c0_i32, %c0_i32_0 : i32, i32
  }
  func.func @transform_9(%arg0: i32, %arg1: i32) -> (i32, i32) {
    %c0_i32 = arith.constant 0 : i32
    %c0_i32_0 = arith.constant 0 : i32
    %c0_i32_1 = arith.constant 0 : i32
    return %c0_i32, %c0_i32_0 : i32, i32
  }
  func.func @transform_10(%arg0: i32, %arg1: i32) -> (i32, i32) {
    %c0_i32 = arith.constant 0 : i32
    %c0_i32_0 = arith.constant 0 : i32
    %c0_i32_1 = arith.constant 0 : i32
    return %c0_i32, %c0_i32_0 : i32, i32
  }
  func.func @transform_11(%arg0: i32, %arg1: i32) -> (i32, i32) {
    %c2_i32 = arith.constant 2 : i32
    %0 = arith.muli %arg0, %c2_i32 : i32
    %1 = arith.addi %0, %arg1 : i32
    %c0_i32 = arith.constant 0 : i32
    %c0_i32_0 = arith.constant 0 : i32
    return %1, %c0_i32 : i32, i32
  }
}

</mosaic_0001>

<bundles_post_ra>
// kernel: ctrnetpp_forward.4
= control target key start
LH: loop header
LB: loop body
LE: loop exit
PB: predicated region body
PF: predicated region fallthrough
CT: control target
= control target key end

     0   :  { %vm75_vm0 = vcmask 261120   ;;  %s1735_s15 = smov 96   ;;  %vm1183_vm1 = vcmask 257024   ;;  %s2161_s1 = inlined_call_operand.vmem [shape: f32[32,32], index: 1, kind: input, shape index: {}]   ;;  %s2162_s0 = inlined_call_operand.vmem [shape: bf16[128,64], index: 0, kind: input, shape index: {}]   ;;  %s2163_s3 = inlined_call_operand.vmem [shape: f32[32,32], index: 3, kind: input, shape index: {}]   ;;  %s2164_s5 = inlined_call_operand.vmem [shape: f32[32,32], index: 5, kind: input, shape index: {}]   ;;  %s2165_s2 = inlined_call_operand.vmem [shape: f32[1,32], index: 2, kind: input, shape index: {}]   ;;  %s2166_s8 = inlined_call_operand.vmem [shape: f32[32,32], index: 8, kind: input, shape index: {}]   ;;  %s2167_s4 = inlined_call_operand.vmem [shape: f32[1,32], index: 4, kind: input, shape index: {}]   ;;  %s2168_s7 = inlined_call_operand.vmem [shape: f32[32,32], index: 7, kind: input, shape index: {}]   ;;  %s2169_s6 = inlined_call_operand.vmem [shape: f32[1,32], index: 6, kind: input, shape index: {}]   ;;  %s2170_s9 = inlined_call_operand.vmem [shape: bf16[128,32], index: 9, kind: output, shape index: {}]  }
   0x1   :  { %v64_v0 = vld [vmem:[%s2161_s1] sm:$0xff]  ;;  %v65_v1 = vld [vmem:[%s2161_s1 + $0x8] sm:$0xff]  ;;  %v66_v2 = vld [vmem:[%s2161_s1 + $0x10] sm:$0xff] }
   0x2   :  { %v1618_v3 = vpack.c.bf16 %v65_v1, %v64_v0  ;;  %v67_v4 = vld [vmem:[%s2161_s1 + $0x18] sm:$0xff]  ;;  %v1320_v5 = vld [vmem:[%s2162_s0] sm:$0xff]   ;;  %v1352_v8 = vld [vmem:[%s2162_s0 + $0x10] sm:$0xff]  }
   0x3   :  { %v1622_v6 = vpack.c.bf16 %v67_v4, %v66_v2  ;;  %v1321_v7 = vunpack.c.l.bf16 %v1320_v5  ;;  %v1351_v9 = vld [vmem:[%s2162_s0 + $0x8] sm:$0xff]   ;;  %v1322_v10 = vunpack.c.h.bf16 %v1320_v5  ;;  %v1329_v11 = vunpack.c.l.bf16 %v1352_v8  ;;  %v1353_v13 = vld [vmem:[%s2162_s0 + $0x18] sm:$0xff]   ;;  %v349_v14 = vld [vmem:[%s2163_s3] sm:$0xff] }
   0x4   :  { %1619 = vmatprep.subr.bf16.mxu0 %v1618_v3  ;;  %v1330_v12 = vunpack.c.h.bf16 %v1352_v8  ;;  %v350_v15 = vld [vmem:[%s2163_s3 + $0x8] sm:$0xff]  ;;  %v1325_v16 = vunpack.c.l.bf16 %v1351_v9  ;;  %v1326_v17 = vunpack.c.h.bf16 %v1351_v9  ;;  %v1333_v20 = vunpack.c.l.bf16 %v1353_v13  ;;  %v1354_v22 = vld [vmem:[%s2162_s0 + $0x20] sm:$0xff]   ;;  %v351_v23 = vld [vmem:[%s2163_s3 + $0x10] sm:$0xff] }
   0x5   :  { %1621 = vmatpush3.bf16.msra.mxu0 %v1618_v3  ;;  %1466 = vmatprep.mubr.msk.f32.mxu0 %vm75_vm0, %v1321_v7  ;;  %v1679_v18 = vpack.i.bf16 %v1322_v10, %v1321_v7  ;;  %v1334_v21 = vunpack.c.h.bf16 %v1353_v13  ;;  %v352_v24 = vld [vmem:[%s2163_s3 + $0x18] sm:$0xff]  ;;  %v1355_v25 = vld [vmem:[%s2162_s0 + $0x28] sm:$0xff]   ;;  %v1626_v27 = vpack.c.bf16 %v350_v15, %v349_v14  ;;  %v1337_v29 = vunpack.c.l.bf16 %v1354_v22  ;;  %v1356_v34 = vld [vmem:[%s2162_s0 + $0x30] sm:$0xff]  }
   0x6   :  { %1623 = vmatprep.subr.bf16.mxu0 %v1622_v6  ;;  %v1689_v19 = vpack.i.bf16 %v1330_v12, %v1329_v11  ;;  %v1684_v26 = vpack.i.bf16 %v1326_v17, %v1325_v16  ;;  %v1338_v30 = vunpack.c.h.bf16 %v1354_v22  ;;  %v1630_v31 = vpack.c.bf16 %v352_v24, %v351_v23  ;;  %v1357_v35 = vld [vmem:[%s2162_s0 + $0x38] sm:$0xff]   ;;  %v569_v44 = vld [vmem:[%s2164_s5] sm:$0xff]  ;;  %v570_v45 = vld [vmem:[%s2164_s5 + $0x8] sm:$0xff] }
   0x7   :  { %1680 = vrot.lane.b32.xlu0 %v1679_v18, %s1735_s15  ;;  %v1694_v28 = vpack.i.bf16 %v1334_v21, %v1333_v20  ;;  %1658 = vmatprep.subr.bf16.mxu1 %v1626_v27  ;;  %v1341_v32 = vunpack.c.l.bf16 %v1355_v25  ;;  %v1342_v33 = vunpack.c.h.bf16 %v1355_v25  ;;  %v1345_v38 = vunpack.c.l.bf16 %v1356_v34  ;;  %v1867_v48 = vld [vmem:[%s2165_s2] ss:$0 sm:$0xff]  ;;  %v571_v57 = vld [vmem:[%s2164_s5 + $0x10] sm:$0xff]  ;;  %v572_v58 = vld [vmem:[%s2164_s5 + $0x18] sm:$0xff] }
   0x8   :  { %1690 = vrot.lane.b32.xlu1 %v1689_v19, %s1735_s15  ;;  %1660 = vmatpush3.bf16.msra.mxu1 %v1626_v27  ;;  %v1699_v36 = vpack.i.bf16 %v1338_v30, %v1337_v29  ;;  %v1346_v39 = vunpack.c.h.bf16 %v1356_v34  ;;  %v1349_v40 = vunpack.c.l.bf16 %v1357_v35  ;;  %v1350_v41 = vunpack.c.h.bf16 %v1357_v35 }
   0x9   :  { %1625 = vmatpush3.bf16.msra.mxu0 %v1622_v6  ;;  %v1704_v37 = vpack.i.bf16 %v1342_v33, %v1341_v32  ;;  %1659 = vmatprep.subr.bf16.mxu1 %v1630_v31  ;;  %v1634_v46 = vpack.c.bf16 %v570_v45, %v569_v44  ;;  %v1638_v2 = vpack.c.bf16 %v572_v58, %v571_v57 }
   0xa   :  { %1627 = vmatprep.subr.bf16.mxu0 %v1626_v27  ;;  %v1709_v42 = vpack.i.bf16 %v1346_v39, %v1345_v38  ;;  %v1714_v43 = vpack.i.bf16 %v1350_v41, %v1349_v40 }
   0xb   :  { %1685 = vrot.lane.b32.xlu0 %v1684_v26, %s1735_s15 }
   0xc   :  { %1467 = vmatmul.mubr.msk.f32.vlgmr.msra.gmra.mrb[0].mxu0 %vm75_vm0, %v1322_v10  ;;  %1695 = vrot.lane.b32.xlu1 %v1694_v28, %s1735_s15 }
   0xd   :  { %1469 = vmatprep.mubr.msk.f32.mxu0 %vm75_vm0, %v1325_v16  ;;  %1629 = vmatpush3.bf16.msra.mxu0 %v1626_v27 }
   0xe   :  { %1631 = vmatprep.subr.bf16.mxu0 %v1630_v31  ;;  %1661 = vmatpush3.bf16.msra.mxu1 %v1630_v31 }
   0xf   :  { %1700 = vrot.lane.b32.xlu0 %v1699_v36, %s1735_s15 }
  0x10   :  { %1470 = vmatmul.mubr.msk.f32.gmra.mrb[2].mxu0 %vm75_vm0, %v1326_v17  ;;  %1705 = vrot.lane.b32.xlu1 %v1704_v37, %s1735_s15 }
  0x11   :  { %1472 = vmatprep.mubr.msk.f32.mxu0 %vm75_vm0, %v1329_v11  ;;  %1633 = vmatpush3.bf16.msra.mxu0 %v1630_v31 }
  0x12   :  { %1635 = vmatprep.subr.bf16.mxu0 %v1634_v46 }
  0x13   :  { %1710 = vrot.lane.b32.xlu0 %v1709_v42, %s1735_s15 }
  0x14   :  { %1473 = vmatmul.mubr.msk.f32.gmra.mrb[4].mxu0 %vm75_vm0, %v1330_v12  ;;  %1715 = vrot.lane.b32.xlu1 %v1714_v43, %s1735_s15 }
  0x15   :  { %1475 = vmatprep.mubr.msk.f32.mxu0 %vm75_vm0, %v1333_v20 }
  0x18   :  { %1476 = vmatmul.mubr.msk.f32.gmra.mrb[6].mxu0 %vm75_vm0, %v1334_v21 }
  0x19   :  { %1478 = vmatprep.mubr.msk.f32.mxu0 %vm75_vm0, %v1337_v29 }
  0x1c   :  { %1479 = vmatmul.mubr.msk.f32.gmra.mrb[8].mxu0 %vm75_vm0, %v1338_v30 }
  0x1d   :  { %1481 = vmatprep.mubr.msk.f32.mxu0 %vm75_vm0, %v1341_v32 }
  0x20   :  { %1482 = vmatmul.mubr.msk.f32.gmra.mrb[10].mxu0 %vm75_vm0, %v1342_v33 }
  0x21   :  { %1484 = vmatprep.mubr.msk.f32.mxu0 %vm75_vm0, %v1345_v38 }
  0x24   :  { %1485 = vmatmul.mubr.msk.f32.gmra.mrb[12].mxu0 %vm75_vm0, %v1346_v39 }
  0x25   :  { %1487 = vmatprep.mubr.msk.f32.mxu0 %vm75_vm0, %v1349_v40 }
  0x28   :  { %1488 = vmatmul.mubr.msk.f32.gmra.mrb[14].mxu0 %vm75_vm0, %v1350_v41 }
  0x79   :  { %v1681_v47 = vpop.permute.xlu0 %1680 }
  0x7a   :  { %v1691_v61 = vpop.permute.xlu1 %1690 }
  0x7d   :  { %v1686_v54 = vpop.permute.xlu0 %1685 }
  0x7e   :  { %v1696_v11 = vpop.permute.xlu1 %1695 }
  0x81   :  { %v1701_v20 = vpop.permute.xlu0 %1700 }
  0x82   :  { %v1706_v29 = vpop.permute.xlu1 %1705 }
  0x85   :  { %v1711_v38 = vpop.permute.xlu0 %1710 }
  0xdf   :  { %v1468_v49 = vpop.f32.mrb[0].mxu0 }
  0xe0   :  { %v196_v50 = vadd.f32 %v1468_v49, %v1867_v48  ;;  %v190_v51 = vpop.f32.mrb[1].mxu0 }
  0xe1   :  { %v191_v52 = vadd.f32 %v1867_v48, %v190_v51 }
  0xe2   :  { %v270_v53 = vmax.f32 %v196_v50, 0.0 }
  0xe3   :  { %v269_v55 = vmax.f32 %v191_v52, 0.0  ;;  %v1471_v56 = vpop.f32.mrb[2].mxu0 }
  0xe4   :  { %v206_v59 = vadd.f32 %v1471_v56, %v1867_v48  ;;  %v200_v60 = vpop.f32.mrb[3].mxu0  ;;  %v1720_v0 = vadd.high.f32.bf16 %v270_v53, %v1681_v47 }
  0xe5   :  { %v1719_v62 = vadd.low.f32.bf16 %v269_v55, %v1681_v47  ;;  %v201_v63 = vadd.f32 %v1867_v48, %v200_v60  ;;  %v1716_v47 = vpop.permute.xlu1 %1715  ;;  %v777_v60 = vld [vmem:[%s2166_s8] sm:$0xff] }
  0xe6   :  { %v272_v1 = vmax.f32 %v206_v59, 0.0 }
  0xe7   :  { %v271_v3 = vmax.f32 %v201_v63, 0.0  ;;  %v1474_v4 = vpop.f32.mrb[4].mxu0  ;;  %1498 = vmatprep.mubr.msk.f32.mxu0 %vm75_vm0, %v1719_v62  ;;  %v780_v63 = vld [vmem:[%s2166_s8 + $0x18] sm:$0xff] }
  0xe8   :  { %v216_v5 = vadd.f32 %v1474_v4, %v1867_v48  ;;  %v210_v6 = vpop.f32.mrb[5].mxu0  ;;  %1499 = vmatmul.mubr.msk.f32.vlgmr.msra.gmra.mrb[16].mxu0 %vm75_vm0, %v1720_v0  ;;  %v1722_v9 = vadd.high.f32.bf16 %v272_v1, %v1686_v54  ;;  %v1221_v1 = vld [vmem:[%s2167_s4] ss:$0 sm:$0xff] }
  0xe9   :  { %v1721_v7 = vadd.low.f32.bf16 %v271_v3, %v1686_v54  ;;  %v211_v8 = vadd.f32 %v1867_v48, %v210_v6  ;;  %1637 = vmatpush3.bf16.msra.mxu0 %v1634_v46 }
  0xea   :  { %v274_v10 = vmax.f32 %v216_v5, 0.0  ;;  %1639 = vmatprep.subr.bf16.mxu0 %v1638_v2 }
  0xeb   :  { %v273_v12 = vmax.f32 %v211_v8, 0.0  ;;  %v1477_v13 = vpop.f32.mrb[6].mxu0  ;;  %1501 = vmatprep.mubr.msk.f32.mxu0 %vm75_vm0, %v1721_v7 }
  0xec   :  { %v226_v14 = vadd.f32 %v1477_v13, %v1867_v48  ;;  %v220_v15 = vpop.f32.mrb[7].mxu0  ;;  %1502 = vmatmul.mubr.msk.f32.gmra.mrb[18].mxu0 %vm75_vm0, %v1722_v9  ;;  %v1724_v18 = vadd.high.f32.bf16 %v274_v10, %v1691_v61 }
  0xed   :  { %v1723_v16 = vadd.low.f32.bf16 %v273_v12, %v1691_v61  ;;  %v221_v17 = vadd.f32 %v1867_v48, %v220_v15  ;;  %1641 = vmatpush3.bf16.msra.mxu0 %v1638_v2  ;;  %v779_v61 = vld [vmem:[%s2166_s8 + $0x10] sm:$0xff] }
  0xee   :  { %v276_v19 = vmax.f32 %v226_v14, 0.0  ;;  %v1646_v0 = vpack.c.bf16 %v780_v63, %v779_v61 }
  0xef   :  { %v275_v21 = vmax.f32 %v221_v17, 0.0  ;;  %v1480_v22 = vpop.f32.mrb[8].mxu0  ;;  %1504 = vmatprep.mubr.msk.f32.mxu0 %vm75_vm0, %v1723_v16 }
  0xf0   :  { %v236_v23 = vadd.f32 %v1480_v22, %v1867_v48  ;;  %v230_v24 = vpop.f32.mrb[9].mxu0  ;;  %1505 = vmatmul.mubr.msk.f32.gmra.mrb[20].mxu0 %vm75_vm0, %v1724_v18  ;;  %v1726_v27 = vadd.high.f32.bf16 %v276_v19, %v1696_v11 }
  0xf1   :  { %v1725_v25 = vadd.low.f32.bf16 %v275_v21, %v1696_v11  ;;  %v231_v26 = vadd.f32 %v1867_v48, %v230_v24 }
  0xf2   :  { %v278_v28 = vmax.f32 %v236_v23, 0.0 }
  0xf3   :  { %v277_v30 = vmax.f32 %v231_v26, 0.0  ;;  %v1483_v31 = vpop.f32.mrb[10].mxu0  ;;  %1507 = vmatprep.mubr.msk.f32.mxu0 %vm75_vm0, %v1725_v25 }
  0xf4   :  { %v246_v32 = vadd.f32 %v1483_v31, %v1867_v48  ;;  %v240_v33 = vpop.f32.mrb[11].mxu0  ;;  %1508 = vmatmul.mubr.msk.f32.gmra.mrb[22].mxu0 %vm75_vm0, %v1726_v27  ;;  %v1728_v36 = vadd.high.f32.bf16 %v278_v28, %v1701_v20 }
  0xf5   :  { %v241_v34 = vadd.f32 %v1867_v48, %v240_v33  ;;  %v1727_v35 = vadd.low.f32.bf16 %v277_v30, %v1701_v20 }
  0xf6   :  { %v280_v37 = vmax.f32 %v246_v32, 0.0 }
  0xf7   :  { %v279_v39 = vmax.f32 %v241_v34, 0.0  ;;  %v1486_v40 = vpop.f32.mrb[12].mxu0  ;;  %1510 = vmatprep.mubr.msk.f32.mxu1 %vm75_vm0, %v1727_v35 }
  0xf8   :  { %v256_v41 = vadd.f32 %v1486_v40, %v1867_v48  ;;  %v250_v42 = vpop.f32.mrb[13].mxu0  ;;  %1511 = vmatmul.mubr.msk.f32.vlgmr.msra.gmra.mrb[0].mxu1 %vm75_vm0, %v1728_v36  ;;  %v1730_v45 = vadd.high.f32.bf16 %v280_v37, %v1706_v29 }
  0xf9   :  { %v1729_v43 = vadd.low.f32.bf16 %v279_v39, %v1706_v29  ;;  %v251_v44 = vadd.f32 %v1867_v48, %v250_v42 }
  0xfa   :  { %v282_v46 = vmax.f32 %v256_v41, 0.0 }
  0xfb   :  { %v281_v49 = vmax.f32 %v251_v44, 0.0  ;;  %v1489_v50 = vpop.f32.mrb[14].mxu0  ;;  %1513 = vmatprep.mubr.msk.f32.mxu1 %vm75_vm0, %v1729_v43 }
  0xfc   :  { %v266_v51 = vadd.f32 %v1489_v50, %v1867_v48  ;;  %v260_v52 = vpop.f32.mrb[15].mxu0  ;;  %1514 = vmatmul.mubr.msk.f32.gmra.mrb[2].mxu1 %vm75_vm0, %v1730_v45  ;;  %v1732_v55 = vadd.high.f32.bf16 %v282_v46, %v1711_v38 }
  0xfd   :  { %v1731_v53 = vadd.low.f32.bf16 %v281_v49, %v1711_v38  ;;  %v261_v54 = vadd.f32 %v1867_v48, %v260_v52  ;;  %v778_v48 = vld [vmem:[%s2166_s8 + $0x8] sm:$0xff] }
  0xfe   :  { %v284_v56 = vmax.f32 %v266_v51, 0.0  ;;  %v1642_v62 = vpack.c.bf16 %v778_v48, %v777_v60  ;;  %v773_v51 = vld [vmem:[%s2168_s7] sm:$0xff]  ;;  %v774_v52 = vld [vmem:[%s2168_s7 + $0x8] sm:$0xff] }
  0xff   :  { %v283_v57 = vmax.f32 %v261_v54, 0.0  ;;  %1516 = vmatprep.mubr.msk.f32.mxu1 %vm75_vm0, %v1731_v53  ;;  %v1650_v53 = vpack.c.bf16 %v774_v52, %v773_v51  ;;  %v1238_v54 = vld [vmem:[%s2169_s6] ss:$0 sm:$0xff] }
 0x100   :  { %1517 = vmatmul.mubr.msk.f32.gmra.mrb[4].mxu1 %vm75_vm0, %v1732_v55  ;;  %v1734_v59 = vadd.high.f32.bf16 %v284_v56, %v1716_v47  ;;  %1643 = vmatprep.subr.bf16.mxu1 %v1642_v62  ;;  %v775_v56 = vld [vmem:[%s2168_s7 + $0x10] sm:$0xff] }
 0x101   :  { %v1733_v58 = vadd.low.f32.bf16 %v283_v57, %v1716_v47  ;;  %1645 = vmatpush3.bf16.msra.mxu1 %v1642_v62  ;;  %v776_v57 = vld [vmem:[%s2168_s7 + $0x18] sm:$0xff] }
 0x102   :  { %1647 = vmatprep.subr.bf16.mxu1 %v1646_v0  ;;  %v1654_v48 = vpack.c.bf16 %v776_v57, %v775_v56 }
 0x103   :  { %1519 = vmatprep.mubr.msk.f32.mxu1 %vm75_vm0, %v1733_v58 }
 0x104   :  { %1520 = vmatmul.mubr.msk.f32.gmra.mrb[6].mxu1 %vm75_vm0, %v1734_v59 }
 0x105   :  { %1649 = vmatpush3.bf16.msra.mxu1 %v1646_v0 }
 0x106   :  { %1651 = vmatprep.subr.bf16.mxu1 %v1650_v53 }
 0x1bb   :  { %v1500_v2 = vpop.f32.mrb[16].mxu0 }
 0x1bc   :  { %v1922_v3 = vadd.f32 %v1500_v2, %v1221_v1  ;;  %v474_v4 = vpop.f32.mrb[17].mxu0 }
 0x1bd   :  { %v1924_v5 = vadd.f32 %v1221_v1, %v474_v4 }
 0x1be   :  { %v554_v8 = vmax.f32 %v1922_v3, 0.0 }
 0x1bf   :  { %v553_v6 = vmax.f32 %v1924_v5, 0.0  ;;  %v1503_v7 = vpop.f32.mrb[18].mxu0 }
 0x1c0   :  { %v1928_v9 = vadd.f32 %v1503_v7, %v1221_v1  ;;  %v484_v10 = vpop.f32.mrb[19].mxu0 }
 0x1c1   :  { %v1930_v11 = vadd.f32 %v1221_v1, %v484_v10  ;;  %1530 = vmatprep.mubr.msk.f32.mxu0 %vm75_vm0, %v553_v6 }
 0x1c2   :  { %1531 = vmatmul.mubr.msk.f32.vlgmr.msra.gmra.mrb[24].mxu0 %vm75_vm0, %v554_v8  ;;  %v556_v14 = vmax.f32 %v1928_v9, 0.0 }
 0x1c3   :  { %v555_v12 = vmax.f32 %v1930_v11, 0.0  ;;  %v1506_v13 = vpop.f32.mrb[20].mxu0 }
 0x1c4   :  { %v1940_v15 = vadd.f32 %v1506_v13, %v1221_v1  ;;  %v494_v16 = vpop.f32.mrb[21].mxu0 }
 0x1c5   :  { %v1942_v17 = vadd.f32 %v1221_v1, %v494_v16  ;;  %1533 = vmatprep.mubr.msk.f32.mxu0 %vm75_vm0, %v555_v12 }
 0x1c6   :  { %1534 = vmatmul.mubr.msk.f32.gmra.mrb[26].mxu0 %vm75_vm0, %v556_v14  ;;  %v558_v20 = vmax.f32 %v1940_v15, 0.0 }
 0x1c7   :  { %v557_v18 = vmax.f32 %v1942_v17, 0.0  ;;  %v1509_v19 = vpop.f32.mrb[22].mxu0 }
 0x1c8   :  { %v1952_v21 = vadd.f32 %v1509_v19, %v1221_v1  ;;  %v504_v22 = vpop.f32.mrb[23].mxu0 }
 0x1c9   :  { %v1954_v23 = vadd.f32 %v1221_v1, %v504_v22  ;;  %1536 = vmatprep.mubr.msk.f32.mxu0 %vm75_vm0, %v557_v18 }
 0x1ca   :  { %1537 = vmatmul.mubr.msk.f32.gmra.mrb[28].mxu0 %vm75_vm0, %v558_v20  ;;  %v560_v26 = vmax.f32 %v1952_v21, 0.0 }
 0x1cb   :  { %v559_v24 = vmax.f32 %v1954_v23, 0.0  ;;  %v1512_v25 = vpop.f32.mrb[0].mxu1 }
 0x1cc   :  { %v1964_v27 = vadd.f32 %v1512_v25, %v1221_v1  ;;  %v514_v28 = vpop.f32.mrb[1].mxu1 }
 0x1cd   :  { %v1966_v29 = vadd.f32 %v1221_v1, %v514_v28  ;;  %1539 = vmatprep.mubr.msk.f32.mxu0 %vm75_vm0, %v559_v24 }
 0x1ce   :  { %1540 = vmatmul.mubr.msk.f32.gmra.mrb[30].mxu0 %vm75_vm0, %v560_v26  ;;  %v562_v32 = vmax.f32 %v1964_v27, 0.0 }
 0x1cf   :  { %v561_v30 = vmax.f32 %v1966_v29, 0.0  ;;  %v1515_v31 = vpop.f32.mrb[2].mxu1 }
 0x1d0   :  { %v1976_v33 = vadd.f32 %v1515_v31, %v1221_v1  ;;  %v524_v34 = vpop.f32.mrb[3].mxu1 }
 0x1d1   :  { %v1978_v35 = vadd.f32 %v1221_v1, %v524_v34  ;;  %1542 = vmatprep.mubr.msk.f32.mxu0 %vm75_vm0, %v561_v30 }
 0x1d2   :  { %1543 = vmatmul.mubr.msk.f32.gmra.mrb[32].mxu0 %vm75_vm0, %v562_v32  ;;  %v564_v38 = vmax.f32 %v1976_v33, 0.0 }
 0x1d3   :  { %v563_v36 = vmax.f32 %v1978_v35, 0.0  ;;  %v1518_v37 = vpop.f32.mrb[4].mxu1 }
 0x1d4   :  { %v1988_v39 = vadd.f32 %v1518_v37, %v1221_v1  ;;  %v534_v40 = vpop.f32.mrb[5].mxu1 }
 0x1d5   :  { %v1990_v41 = vadd.f32 %v1221_v1, %v534_v40  ;;  %1545 = vmatprep.mubr.msk.f32.mxu0 %vm75_vm0, %v563_v36 }
 0x1d6   :  { %1546 = vmatmul.mubr.msk.f32.gmra.mrb[34].mxu0 %vm75_vm0, %v564_v38  ;;  %v566_v44 = vmax.f32 %v1988_v39, 0.0 }
 0x1d7   :  { %v565_v42 = vmax.f32 %v1990_v41, 0.0  ;;  %v1521_v43 = vpop.f32.mrb[6].mxu1 }
 0x1d8   :  { %v2000_v45 = vadd.f32 %v1521_v43, %v1221_v1  ;;  %v544_v46 = vpop.f32.mrb[7].mxu1 }
 0x1d9   :  { %v2002_v47 = vadd.f32 %v1221_v1, %v544_v46  ;;  %1548 = vmatprep.mubr.msk.f32.mxu0 %vm75_vm0, %v565_v42 }
 0x1da   :  { %1549 = vmatmul.mubr.msk.f32.gmra.mrb[36].mxu0 %vm75_vm0, %v566_v44  ;;  %v568_v50 = vmax.f32 %v2000_v45, 0.0 }
 0x1db   :  { %v567_v49 = vmax.f32 %v2002_v47, 0.0 }
 0x1dd   :  { %1551 = vmatprep.mubr.msk.f32.mxu0 %vm75_vm0, %v567_v49 }
 0x1de   :  { %1552 = vmatmul.mubr.msk.f32.gmra.mrb[38].mxu0 %vm75_vm0, %v568_v50 }
 0x295   :  { %v1532_v55 = vpop.f32.mrb[24].mxu0 }
 0x296   :  { %v694_v58 = vpop.f32.mrb[25].mxu0  ;;  %v700_v60 = vadd.f32 %v1532_v55, %v1238_v54 }
 0x297   :  { %v695_v59 = vadd.f32 %v1238_v54, %v694_v58 }
 0x299   :  { %v1535_v61 = vpop.f32.mrb[26].mxu0  ;;  %1562 = vmatprep.mubr.msk.f32.mxu1 %vm75_vm0, %v695_v59 }
 0x29a   :  { %v704_v62 = vpop.f32.mrb[27].mxu0  ;;  %1563 = vmatmul.mubr.msk.f32.vlgmr.msra.gmra.mrb[8].mxu1 %vm75_vm0, %v700_v60  ;;  %v710_v0 = vadd.f32 %v1535_v61, %v1238_v54 }
 0x29b   :  { %v705_v63 = vadd.f32 %v1238_v54, %v704_v62  ;;  %1653 = vmatpush3.bf16.msra.mxu1 %v1650_v53 }
 0x29c   :  { %1655 = vmatprep.subr.bf16.mxu1 %v1654_v48 }
 0x29d   :  { %v1538_v1 = vpop.f32.mrb[28].mxu0  ;;  %1565 = vmatprep.mubr.msk.f32.mxu1 %vm75_vm0, %v705_v63 }
 0x29e   :  { %v714_v2 = vpop.f32.mrb[29].mxu0  ;;  %1566 = vmatmul.mubr.msk.f32.gmra.mrb[10].mxu1 %vm75_vm0, %v710_v0  ;;  %v720_v7 = vadd.f32 %v1538_v1, %v1238_v54 }
 0x29f   :  { %v715_v4 = vadd.f32 %v1238_v54, %v714_v2  ;;  %1657 = vmatpush3.bf16.msra.mxu1 %v1654_v48 }
 0x2a1   :  { %v1541_v10 = vpop.f32.mrb[30].mxu0  ;;  %1568 = vmatprep.mubr.msk.f32.mxu1 %vm75_vm0, %v715_v4 }
 0x2a2   :  { %v724_v13 = vpop.f32.mrb[31].mxu0  ;;  %1569 = vmatmul.mubr.msk.f32.gmra.mrb[12].mxu1 %vm75_vm0, %v720_v7  ;;  %v730_v19 = vadd.f32 %v1541_v10, %v1238_v54 }
 0x2a3   :  { %v725_v16 = vadd.f32 %v1238_v54, %v724_v13 }
 0x2a5   :  { %v1544_v22 = vpop.f32.mrb[32].mxu0  ;;  %1571 = vmatprep.mubr.msk.f32.mxu1 %vm75_vm0, %v725_v16 }
 0x2a6   :  { %v734_v25 = vpop.f32.mrb[33].mxu0  ;;  %1572 = vmatmul.mubr.msk.f32.gmra.mrb[14].mxu1 %vm75_vm0, %v730_v19  ;;  %v740_v31 = vadd.f32 %v1544_v22, %v1238_v54 }
 0x2a7   :  { %v735_v28 = vadd.f32 %v1238_v54, %v734_v25 }
 0x2a9   :  { %v1547_v34 = vpop.f32.mrb[34].mxu0  ;;  %1574 = vmatprep.mubr.msk.f32.mxu1 %vm75_vm0, %v735_v28 }
 0x2aa   :  { %v744_v37 = vpop.f32.mrb[35].mxu0  ;;  %1575 = vmatmul.mubr.msk.f32.gmra.mrb[16].mxu1 %vm75_vm0, %v740_v31  ;;  %v750_v43 = vadd.f32 %v1547_v34, %v1238_v54 }
 0x2ab   :  { %v745_v40 = vadd.f32 %v1238_v54, %v744_v37 }
 0x2ad   :  { %v1550_v46 = vpop.f32.mrb[36].mxu0  ;;  %1577 = vmatprep.mubr.msk.f32.mxu1 %vm75_vm0, %v745_v40 }
 0x2ae   :  { %v754_v51 = vpop.f32.mrb[37].mxu0  ;;  %1578 = vmatmul.mubr.msk.f32.gmra.mrb[18].mxu1 %vm75_vm0, %v750_v43  ;;  %v760_v53 = vadd.f32 %v1550_v46, %v1238_v54 }
 0x2af   :  { %v755_v52 = vadd.f32 %v1238_v54, %v754_v51 }
 0x2b1   :  { %v1553_v55 = vpop.f32.mrb[38].mxu0  ;;  %1580 = vmatprep.mubr.msk.f32.mxu1 %vm75_vm0, %v755_v52 }
 0x2b2   :  { %v764_v56 = vpop.f32.mrb[39].mxu0  ;;  %1581 = vmatmul.mubr.msk.f32.gmra.mrb[20].mxu1 %vm75_vm0, %v760_v53  ;;  %v770_v58 = vadd.f32 %v1553_v55, %v1238_v54 }
 0x2b3   :  { %v765_v57 = vadd.f32 %v1238_v54, %v764_v56 }
 0x2b5   :  { %1583 = vmatprep.mubr.msk.f32.mxu1 %vm75_vm0, %v765_v57 }
 0x2b6   :  { %1584 = vmatmul.mubr.msk.f32.gmra.mrb[22].mxu1 %vm75_vm0, %v770_v58 }
 0x2b7   :  { %1594 = vmatprep.mubr.msk.f32.mxu1 %vm75_vm0, %v553_v6 }
 0x2ba   :  { %1595 = vmatmul.mubr.msk.f32.vlgmr.msra.gmra.mrb[8].mxu1 %vm75_vm0, %v554_v8 }
 0x2bb   :  { %1597 = vmatprep.mubr.msk.f32.mxu1 %vm75_vm0, %v555_v12 }
 0x2be   :  { %1598 = vmatmul.mubr.msk.f32.gmra.mrb[10].mxu1 %vm75_vm0, %v556_v14 }
 0x2bf   :  { %1600 = vmatprep.mubr.msk.f32.mxu1 %vm75_vm0, %v557_v18 }
 0x2c2   :  { %1601 = vmatmul.mubr.msk.f32.gmra.mrb[12].mxu1 %vm75_vm0, %v558_v20 }
 0x2c3   :  { %1603 = vmatprep.mubr.msk.f32.mxu1 %vm75_vm0, %v559_v24 }
 0x2c6   :  { %1604 = vmatmul.mubr.msk.f32.gmra.mrb[14].mxu1 %vm75_vm0, %v560_v26 }
 0x2c7   :  { %1606 = vmatprep.mubr.msk.f32.mxu1 %vm75_vm0, %v561_v30 }
 0x2ca   :  { %1607 = vmatmul.mubr.msk.f32.gmra.mrb[16].mxu1 %vm75_vm0, %v562_v32 }
 0x2cb   :  { %1609 = vmatprep.mubr.msk.f32.mxu1 %vm75_vm0, %v563_v36 }
 0x2ce   :  { %1610 = vmatmul.mubr.msk.f32.gmra.mrb[18].mxu1 %vm75_vm0, %v564_v38 }
 0x2cf   :  { %1612 = vmatprep.mubr.msk.f32.mxu1 %vm75_vm0, %v565_v42 }
 0x2d2   :  { %1613 = vmatmul.mubr.msk.f32.gmra.mrb[20].mxu1 %vm75_vm0, %v566_v44 }
 0x2d3   :  { %1615 = vmatprep.mubr.msk.f32.mxu1 %vm75_vm0, %v567_v49 }
 0x2d6   :  { %1616 = vmatmul.mubr.msk.f32.gmra.mrb[22].mxu1 %vm75_vm0, %v568_v50 }
 0x38d   :  { %v1596_v3 = vpop.f32.mrb[8].mxu1 }
 0x38e   :  { %v1304_v5 = vpack.c.bf16 %v1596_v3, %v1596_v3  ;;  %v1040_v6 = vpop.f32.mrb[9].mxu1 }
 0x38f   :  { %v1303_v8 = vpack.c.bf16 %v1040_v6, %v1040_v6 }
 0x390   :  { %1185 = vst.msk [vmem:[%s2170_s9 + $0x4] sm:$0xf] %vm1183_vm1, %v1304_v5 }
 0x391   :  { %1184 = vst.msk [vmem:[%s2170_s9] sm:$0xf] %vm1183_vm1, %v1303_v8  ;;  %v1599_v9 = vpop.f32.mrb[10].mxu1 }
 0x392   :  { %v1306_v11 = vpack.c.bf16 %v1599_v9, %v1599_v9  ;;  %v1050_v12 = vpop.f32.mrb[11].mxu1 }
 0x393   :  { %v1305_v14 = vpack.c.bf16 %v1050_v12, %v1050_v12 }
 0x394   :  { %1187 = vst.msk [vmem:[%s2170_s9 + $0xc] sm:$0xf] %vm1183_vm1, %v1306_v11 }
 0x395   :  { %1186 = vst.msk [vmem:[%s2170_s9 + $0x8] sm:$0xf] %vm1183_vm1, %v1305_v14  ;;  %v1602_v15 = vpop.f32.mrb[12].mxu1 }
 0x396   :  { %v1308_v17 = vpack.c.bf16 %v1602_v15, %v1602_v15  ;;  %v1060_v18 = vpop.f32.mrb[13].mxu1 }
 0x397   :  { %v1307_v20 = vpack.c.bf16 %v1060_v18, %v1060_v18 }
 0x398   :  { %1189 = vst.msk [vmem:[%s2170_s9 + $0x14] sm:$0xf] %vm1183_vm1, %v1308_v17 }
 0x399   :  { %1188 = vst.msk [vmem:[%s2170_s9 + $0x10] sm:$0xf] %vm1183_vm1, %v1307_v20  ;;  %v1605_v21 = vpop.f32.mrb[14].mxu1 }
 0x39a   :  { %v1310_v23 = vpack.c.bf16 %v1605_v21, %v1605_v21  ;;  %v1070_v24 = vpop.f32.mrb[15].mxu1 }
 0x39b   :  { %v1309_v26 = vpack.c.bf16 %v1070_v24, %v1070_v24 }
 0x39c   :  { %1191 = vst.msk [vmem:[%s2170_s9 + $0x1c] sm:$0xf] %vm1183_vm1, %v1310_v23 }
 0x39d   :  { %1190 = vst.msk [vmem:[%s2170_s9 + $0x18] sm:$0xf] %vm1183_vm1, %v1309_v26  ;;  %v1608_v27 = vpop.f32.mrb[16].mxu1 }
 0x39e   :  { %v1312_v29 = vpack.c.bf16 %v1608_v27, %v1608_v27  ;;  %v1080_v30 = vpop.f32.mrb[17].mxu1 }
 0x39f   :  { %v1311_v32 = vpack.c.bf16 %v1080_v30, %v1080_v30 }
 0x3a0   :  { %1193 = vst.msk [vmem:[%s2170_s9 + $0x24] sm:$0xf] %vm1183_vm1, %v1312_v29 }
 0x3a1   :  { %1192 = vst.msk [vmem:[%s2170_s9 + $0x20] sm:$0xf] %vm1183_vm1, %v1311_v32  ;;  %v1611_v33 = vpop.f32.mrb[18].mxu1 }
 0x3a2   :  { %v1314_v35 = vpack.c.bf16 %v1611_v33, %v1611_v33  ;;  %v1090_v36 = vpop.f32.mrb[19].mxu1 }
 0x3a3   :  { %v1313_v38 = vpack.c.bf16 %v1090_v36, %v1090_v36 }
 0x3a4   :  { %1195 = vst.msk [vmem:[%s2170_s9 + $0x2c] sm:$0xf] %vm1183_vm1, %v1314_v35 }
 0x3a5   :  { %1194 = vst.msk [vmem:[%s2170_s9 + $0x28] sm:$0xf] %vm1183_vm1, %v1313_v38  ;;  %v1614_v39 = vpop.f32.mrb[20].mxu1 }
 0x3a6   :  { %v1316_v41 = vpack.c.bf16 %v1614_v39, %v1614_v39  ;;  %v1100_v42 = vpop.f32.mrb[21].mxu1 }
 0x3a7   :  { %v1315_v44 = vpack.c.bf16 %v1100_v42, %v1100_v42 }
 0x3a8   :  { %1197 = vst.msk [vmem:[%s2170_s9 + $0x34] sm:$0xf] %vm1183_vm1, %v1316_v41 }
 0x3a9   :  { %1196 = vst.msk [vmem:[%s2170_s9 + $0x30] sm:$0xf] %vm1183_vm1, %v1315_v44  ;;  %v1617_v45 = vpop.f32.mrb[22].mxu1 }
 0x3aa   :  { %v1318_v47 = vpack.c.bf16 %v1617_v45, %v1617_v45  ;;  %v1110_v49 = vpop.f32.mrb[23].mxu1 }
 0x3ab   :  { %v1317_v50 = vpack.c.bf16 %v1110_v49, %v1110_v49 }
 0x3ac   :  { %1199 = vst.msk [vmem:[%s2170_s9 + $0x3c] sm:$0xf] %vm1183_vm1, %v1318_v47 }
 0x3ad   :  { %1198 = vst.msk [vmem:[%s2170_s9 + $0x38] sm:$0xf] %vm1183_vm1, %v1317_v50 }

// kernel: ctrnetpp_forward.3
= control target key start
LH: loop header
LB: loop body
LE: loop exit
PB: predicated region body
PF: predicated region fallthrough
CT: control target
= control target key end

     0   :  { %s4190_s18 = smov 0   ;;  %s4192_s19 = smov 0   ;;  %s5544_s0 = inlined_call_operand.vmem [shape: bf16[512,11], index: 0, kind: input, shape index: {}]   ;;  %s5545_s1 = inlined_call_operand.vmem [shape: bf16[4,10,16,12], index: 1, kind: input, shape index: {}]   ;;  %s5546_s2 = inlined_call_operand.vmem [shape: f32[36,3], index: 2, kind: input, shape index: {}]   ;;  %s5547_s3 = inlined_call_operand.vmem [shape: f32[1,3], index: 3, kind: input, shape index: {}]   ;;  %s5548_s4 = inlined_call_operand.vmem [shape: f32[3,32], index: 4, kind: input, shape index: {}]   ;;  %s5549_s5 = inlined_call_operand.vmem [shape: f32[3,32], index: 5, kind: input, shape index: {}]   ;;  %s5550_s6 = inlined_call_operand.vmem [shape: f32[1,32], index: 6, kind: input, shape index: {}]   ;;  %s5551_s7 = inlined_call_operand.vmem [shape: f32[1,32], index: 7, kind: input, shape index: {}]   ;;  %s5552_s8 = inlined_call_operand.vmem [shape: f32[3,32], index: 8, kind: input, shape index: {}]   ;;  %s5553_s9 = inlined_call_operand.vmem [shape: f32[1,32], index: 9, kind: input, shape index: {}]   ;;  %s5554_s10 = inlined_call_operand.vmem [shape: f32[1,32], index: 10, kind: input, shape index: {}]   ;;  %s5555_s11 = inlined_call_operand.vmem [shape: f32[32,32], index: 11, kind: input, shape index: {}]   ;;  %s5556_s12 = inlined_call_operand.vmem [shape: f32[1,32], index: 12, kind: input, shape index: {}]   ;;  %s5557_s13 = inlined_call_operand.vmem [shape: f32[32,3], index: 13, kind: input, shape index: {}]   ;;  %s5558_s14 = inlined_call_operand.vmem [shape: f32[1,3], index: 14, kind: input, shape index: {}]   ;;  %s5559_s15 = inlined_call_operand.vmem [shape: bf16[512,128], index: 15, kind: output, shape index: {}]  }
   0x1   :  { %5602 = sst [smem:[#allocation24_spill]] %s5544_s0  ;;  %s4194_s20 = smov 0  }
   0x2   :  { %s4196_s21 = smov 0   ;;  %s4198_s22 = smov 0  }
   0x3 LB: > { %s34_s23 = sadd.s32 1, %s4090_s20  ;;  %s37_s24 = sadd.s32 1, %s4094_s21  ;;  %s4098_s22 = sphi %s4198_s22, %s25_s22   ;;  %s4094_s21 = sphi %s4196_s21, %s5739_s21   ;;  %s4090_s20 = sphi %s4194_s20, %s5738_s20   ;;  %s4086_s19 = sphi %s4192_s19, %s5737_s19   ;;  %s4082_s18 = sphi %s4190_s18, %s5736_s18  }
   0x4   : > { %p35_p0 = scmp.ge.s32.totalorder %s34_s23, 2  ;;  %p3028_p1 = scmp.ge.s32.totalorder %s4098_s22, 1 }
   0x5   : > { %p480_p2 = scmp.lt.s32.totalorder %s4098_s22, 5 }
   0x6   : > { %s5741_s23 = smov (%p35_p0, %s34_s23), 0  ;;  %s5743_s24 = smov (!%p35_p0, %s37_s24), %s4094_s21 }
   0x7   : > { %p481_p3 = pnand %p3028_p1, %p480_p2  ;;  %p39_p4 = scmp.ge.s32.totalorder %s5743_s24, 2 }
   0x9   : > { %s5745_s24 = smov (%p39_p4, %s5743_s24), 0  ;;  %484 = sbr.rel (%p481_p3) target bundleno = 1172 (0x494), region = 80 }
  0x10   : > { %s3029_s25 = sshll.u32 %s4086_s19, 1  ;;  %v4100_v0 = vmov 4   ;;  %s5603_s0 = sld [smem:[#allocation24_spill]]  ;;  %v696_v31 = vld [vmem:[%s5552_s8] sm:$0x7]  ;;  %vm865_vm0 = vcmask 1042432  }
  0x11   : > { %3707 = vset.pattern.permute.xlu1 %v4100_v0  ;;  %3696 = vset.pattern.permute.xlu0 %v4100_v0  ;;  %s4220_s26 = sadd.s32 %s4082_s18, %s3029_s25  ;;  %v4101_v50 = vmov 3   ;;  %s4104_s17 = smov 102   ;;  %vm816_vm1 = vcmask 23552   ;;  %vm1064_vm2 = vcmask 261120   ;;  %vm1727_vm3 = vcmask 1043456  }
  0x12   : > { %s3030_s27 = sshll.u32 %s4220_s26, 4  ;;  %3425 = vmatprep.subr.msk.mxu0 %vm865_vm0, %v696_v31  ;;  %p551_p6 = scmp.lt.s32.totalorder %s4220_s26, 3  ;;  %vm1632_vm4 = vcmask 97280   ;;  %vm1649_vm5 = vcmask 195584   ;;  %vm1678_vm6 = vcmask 293888   ;;  %vm2716_vm7 = vcmask 523264  }
  0x13   : > { %p542_p5 = scmp.lt.s32.totalorder %s3030_s27, 63  ;;  %3426 = vmatpush3.msk.msra.mxu0 %vm865_vm0, %v696_v31  ;;  %s5569_s18 = smov 101   ;;  %vm2733_vm8 = vcmask 785408   ;;  %vm2750_vm9 = vcmask 809984   ;;  %vm2767_vm10 = vcmask 834560   ;;  %vm2784_vm11 = vcmask 859136  }
  0x14   : > { %s5749_s26 = smov (!%p551_p6, %s4220_s26), 3  ;;  %s4106_s29 = smov 32   ;;  %vm2801_vm12 = vcmask 867328   ;;  %vm2818_vm13 = vcmask 891904   ;;  %vm2835_vm14 = vcmask 916480  }
  0x15   : > { %s5747_s27 = smov (!%p542_p5, %s3030_s27), 63  ;;  %s3645_s19 = smul.u32 80, %s5749_s26 }
  0x16   : > { %s5568_s28 = sshll.u32 %s5747_s27, 2  ;;  %s4102_s26 = smov 24  }
  0x17   : > { %s545_s16 = scalar_lea.vmem %s5603_s0, %s5568_s28  ;;  %s4361_s30 = scalar_lea.vmem %s5545_s1, %s3645_s19 }
  0x18   : > { %v3291_v1 = vld [vmem:[%s545_s16 + $0x10] sm:$0xff]   ;;  %v3179_v2 = vld [vmem:[%s545_s16] sm:$0xff]   ;;  %v3292_v3 = vld [vmem:[%s545_s16 + $0x18] sm:$0xff]   ;;  %s5653_s25 = sshll.u32 %s5747_s27, 2 }
  0x19   : > { %v4231_v4 = vunpack.c.l.bf16 %v3291_v1  ;;  %v4233_v5 = vunpack.c.h.bf16 %v3291_v1  ;;  %v4235_v6 = vunpack.c.l.bf16 %v3179_v2  ;;  %v4237_v7 = vunpack.c.h.bf16 %v3179_v2  ;;  %v3290_v8 = vld [vmem:[%s545_s16 + $0x8] sm:$0xff]   ;;  %v3293_v14 = vld [vmem:[%s545_s16 + $0x20] sm:$0xff]   ;;  %v3296_v23 = vld [vmem:[%s545_s16 + $0x38] sm:$0xff]  }
  0x1a   : > { %v3294_v9 = vld [vmem:[%s545_s16 + $0x28] sm:$0xff]   ;;  %v4239_v10 = vunpack.c.l.bf16 %v3292_v3  ;;  %v4241_v11 = vunpack.c.h.bf16 %v3292_v3  ;;  %v4243_v12 = vunpack.c.l.bf16 %v3290_v8  ;;  %v4245_v13 = vunpack.c.h.bf16 %v3290_v8  ;;  %v3295_v24 = vld [vmem:[%s545_s16 + $0x30] sm:$0xff]   ;;  %v4367_v52 = vld [vmem:[%s4361_s30 + $0x18] sm:$0xff]   ;;  %s4103_s16 = smov 12  }
  0x1b   : > { %v4249_v15 = vpack.i.bf16 %v4233_v5, %v4231_v4  ;;  %v4253_v16 = vpack.i.bf16 %v4237_v7, %v4235_v6  ;;  %v4255_v17 = vunpack.c.l.bf16 %v3294_v9  ;;  %v4257_v18 = vunpack.c.h.bf16 %v3294_v9  ;;  %v4364_v51 = vld [vmem:[%s4361_s30 + $0x10] sm:$0xff]   ;;  %v4370_v53 = vld [vmem:[%s4361_s30 + $0x8] sm:$0xff]   ;;  %v4379_v60 = vld [vmem:[%s4361_s30 + $0x20] sm:$0xff]  }
  0x1c   : > { %v4263_v19 = vpack.i.bf16 %v4241_v11, %v4239_v10  ;;  %v4267_v20 = vpack.i.bf16 %v4245_v13, %v4243_v12  ;;  %v4269_v21 = vunpack.c.l.bf16 %v3293_v14  ;;  %v4271_v22 = vunpack.c.h.bf16 %v3293_v14  ;;  %v4398_v2 = vld [vmem:[%s4361_s30 + $0x28] sm:$0xff]   ;;  %v4409_v14 = vld [vmem:[%s4361_s30 + $0x30] sm:$0xff]  }
  0x1d   : > { %3709 = vperm.xlu1 %3707, %v4249_v15   ;;  %3698 = vperm.xlu0 %3696, %v4253_v16   ;;  %v4275_v25 = vpack.i.bf16 %v4257_v18, %v4255_v17  ;;  %v4277_v26 = vunpack.c.l.bf16 %v3296_v23  ;;  %v4285_v28 = vunpack.c.h.bf16 %v3296_v23  ;;  %v4287_v29 = vunpack.c.l.bf16 %v3295_v24 }
  0x1e   : > { %v4283_v27 = vpack.i.bf16 %v4271_v22, %v4269_v21  ;;  %v4289_v30 = vunpack.c.h.bf16 %v3295_v24  ;;  %v698_v34 = vsub.f32 1.0, %v4237_v7  ;;  %v697_v35 = vsub.f32 1.0, %v4235_v6 }
  0x1f   : > { %v4299_v32 = vpack.i.bf16 %v4285_v28, %v4277_v26  ;;  %v700_v36 = vsub.f32 1.0, %v4245_v13  ;;  %v699_v37 = vsub.f32 1.0, %v4243_v12  ;;  %v702_v38 = vsub.f32 1.0, %v4233_v5 }
  0x20   : > { %v4303_v33 = vpack.i.bf16 %v4289_v30, %v4287_v29  ;;  %v701_v39 = vsub.f32 1.0, %v4231_v4  ;;  %v704_v40 = vsub.f32 1.0, %v4241_v11  ;;  %v703_v41 = vsub.f32 1.0, %v4239_v10 }
  0x21   : > { %3714 = vperm.xlu1 %3707, %v4263_v19   ;;  %3703 = vperm.xlu0 %3696, %v4267_v20   ;;  %v706_v42 = vsub.f32 1.0, %v4271_v22  ;;  %v705_v43 = vsub.f32 1.0, %v4269_v21  ;;  %v708_v44 = vsub.f32 1.0, %v4257_v18  ;;  %v707_v45 = vsub.f32 1.0, %v4255_v17 }
  0x22   : > { %v710_v46 = vsub.f32 1.0, %v4289_v30  ;;  %v709_v47 = vsub.f32 1.0, %v4287_v29  ;;  %v712_v48 = vsub.f32 1.0, %v4285_v28  ;;  %v711_v49 = vsub.f32 1.0, %v4277_v26 }
  0x23   : > { %v3220_v54 = vunpack.c.l.bf16 %v4364_v51  ;;  %v3221_v55 = vunpack.c.h.bf16 %v4364_v51  ;;  %v5567_v56 = vunpack.c.l.bf16 %v4367_v52  ;;  %v5564_v57 = vunpack.c.h.bf16 %v4367_v52 }
  0x24   : > { %v3216_v58 = vunpack.c.l.bf16 %v4370_v53  ;;  %v3217_v59 = vunpack.c.h.bf16 %v4370_v53  ;;  %v5563_v0 = vunpack.c.l.bf16 %v4379_v60  ;;  %v5562_v1 = vunpack.c.h.bf16 %v4379_v60 }
  0x25   : > { %3724 = vperm.xlu1 %3707, %v4275_v25   ;;  %3719 = vperm.xlu0 %3696, %v4283_v27   ;;  %v3743_v61 = vpack.i.bf16 %v3221_v55, %v3220_v54  ;;  %v3753_v63 = vpack.i.bf16 %v5564_v57, %v5567_v56  ;;  %v5561_v8 = vunpack.c.l.bf16 %v4398_v2  ;;  %v5560_v9 = vunpack.c.h.bf16 %v4398_v2  ;;  %v3305_v57 = vld [vmem:[%s4361_s30 + $0x48] sm:$0xff]  }
  0x26   : > { %v3738_v62 = vpack.i.bf16 %v3217_v59, %v3216_v58  ;;  %v3763_v3 = vpack.i.bf16 %v5562_v1, %v5563_v0  ;;  %v5566_v24 = vunpack.c.l.bf16 %v4409_v14  ;;  %v5565_v31 = vunpack.c.h.bf16 %v4409_v14 }
  0x27   : > { %v3773_v23 = vpack.i.bf16 %v5560_v9, %v5561_v8  ;;  %v3304_v8 = vld [vmem:[%s4361_s30 + $0x40] sm:$0xff]   ;;  %v3249_v56 = vunpack.c.h.bf16 %v3305_v57  ;;  %v5605_v51 = vunpack.c.h.bf16 %v4367_v52 }
  0x28   : > { %v3244_v1 = vunpack.c.l.bf16 %v3304_v8  ;;  %v3245_v0 = vunpack.c.h.bf16 %v3304_v8 }
  0x29   : > { %3734 = vperm.xlu1 %3707, %v4299_v32   ;;  %3729 = vperm.xlu0 %3696, %v4303_v33  }
  0x2d   : > { %721 = vperm.xlu1 %3707, %v698_v34   ;;  %716 = vperm.xlu0 %3696, %v697_v35  }
  0x31   : > { %731 = vperm.xlu1 %3707, %v700_v36   ;;  %726 = vperm.xlu0 %3696, %v699_v37  }
  0x35   : > { %741 = vperm.xlu1 %3707, %v702_v38   ;;  %736 = vperm.xlu0 %3696, %v701_v39  }
  0x39   : > { %751 = vperm.xlu1 %3707, %v704_v40   ;;  %746 = vperm.xlu0 %3696, %v703_v41  }
  0x3d   : > { %761 = vperm.xlu1 %3707, %v706_v42   ;;  %756 = vperm.xlu0 %3696, %v705_v43  }
  0x41   : > { %771 = vperm.xlu1 %3707, %v708_v44   ;;  %766 = vperm.xlu0 %3696, %v707_v45  }
  0x45   : > { %781 = vperm.xlu1 %3707, %v710_v46   ;;  %776 = vperm.xlu0 %3696, %v709_v47  }
  0x49   : > { %791 = vperm.xlu1 %3707, %v712_v48   ;;  %786 = vperm.xlu0 %3696, %v711_v49  }
  0x4d   : > { %3819 = vset.pattern.permute.xlu1 %v4101_v50  ;;  %3818 = vset.pattern.permute.xlu0 %v4101_v50  ;;  %v4420_v50 = vld [vmem:[%s4361_s30 + $0x38] sm:$0xff]  }
  0x4e   : > { %3744 = vrot.lane.b32.xlu1 %v3743_v61, %s4102_s26  ;;  %3739 = vrot.lane.b32.xlu0 %v3738_v62, %s4103_s16  ;;  %v3240_v62 = vunpack.c.l.bf16 %v4420_v50  ;;  %v3241_v9 = vunpack.c.h.bf16 %v4420_v50  ;;  %v3073_v50 = vld [vmem:[%s5558_s14] ss:$0 sm:$0xff] }
  0x52   : > { %3754 = vrot.lane.b32.xlu1 %v3753_v63, %s4102_s26  ;;  %3749 = vrot.lane.b32.xlu0 %v3743_v61, %s4103_s16  ;;  %v3783_v61 = vpack.i.bf16 %v5565_v31, %v5566_v24  ;;  %v3803_v31 = vpack.i.bf16 %v3245_v0, %v3244_v1  ;;  %v3248_v24 = vunpack.c.l.bf16 %v3305_v57 }
  0x56   : > { %3764 = vrot.lane.b32.xlu1 %v3763_v3, %s4102_s26  ;;  %3759 = vrot.lane.b32.xlu0 %v3753_v63, %s4103_s16  ;;  %v3793_v63 = vpack.i.bf16 %v3241_v9, %v3240_v62 }
  0x5a   : > { %3774 = vrot.lane.b32.xlu1 %v3773_v23, %s4102_s26  ;;  %3769 = vrot.lane.b32.xlu0 %v3763_v3, %s4103_s16  ;;  %v3813_v3 = vpack.i.bf16 %v3249_v56, %v3248_v24 }
  0x5e   : > { %3784 = vrot.lane.b32.xlu1 %v3783_v61, %s4102_s26  ;;  %3779 = vrot.lane.b32.xlu0 %v3773_v23, %s4103_s16 }
  0x62   : > { %3794 = vrot.lane.b32.xlu1 %v3793_v63, %s4102_s26  ;;  %3789 = vrot.lane.b32.xlu0 %v3783_v61, %s4103_s16 }
  0x66   : > { %3804 = vrot.lane.b32.xlu1 %v3803_v31, %s4102_s26  ;;  %3799 = vrot.lane.b32.xlu0 %v3793_v63, %s4103_s16 }
  0x6a   : > { %3814 = vrot.lane.b32.xlu1 %v3813_v3, %s4102_s26  ;;  %3809 = vrot.lane.b32.xlu0 %v3803_v31, %s4103_s16  ;;  %s4107_s26 = smov 64   ;;  %s5224_s16 = scalar_lea.vmem %s5559_s15, %s5653_s25 }
  0x6e   : > { %2260 = vperm.xlu1 %3819, %v698_v34   ;;  %2256 = vperm.xlu0 %3818, %v697_v35  }
  0x72   : > { %2264 = vperm.xlu1 %3819, %v699_v37   ;;  %2268 = vperm.xlu0 %3818, %v700_v36  }
  0x76   : > { %2272 = vperm.xlu1 %3819, %v701_v39   ;;  %2276 = vperm.xlu0 %3818, %v702_v38  }
  0x7a   : > { %2280 = vperm.xlu1 %3819, %v703_v41   ;;  %2284 = vperm.xlu0 %3818, %v704_v40  }
  0x7e   : > { %2288 = vperm.xlu1 %3819, %v705_v43   ;;  %2292 = vperm.xlu0 %3818, %v706_v42  }
  0x82   : > { %2296 = vperm.xlu1 %3819, %v707_v45   ;;  %2300 = vperm.xlu0 %3818, %v708_v44  }
  0x86   : > { %2304 = vperm.xlu1 %3819, %v709_v47   ;;  %2308 = vperm.xlu0 %3818, %v710_v46  }
  0x8a   : > { %2312 = vperm.xlu1 %3819, %v711_v49   ;;  %2316 = vperm.xlu0 %3818, %v712_v48  }
  0x8e   : > { %3821 = vrot.lane.b32.xlu1 %v4253_v16, %s4104_s17  ;;  %3826 = vrot.lane.b32.xlu0 %v4267_v20, %s4104_s17 }
  0x92   : > { %3831 = vrot.lane.b32.xlu1 %v4249_v15, %s4104_s17  ;;  %3836 = vrot.lane.b32.xlu0 %v4263_v19, %s4104_s17 }
  0x96   : > { %3841 = vrot.lane.b32.xlu1 %v4283_v27, %s4104_s17  ;;  %3846 = vrot.lane.b32.xlu0 %v4275_v25, %s4104_s17 }
  0x9a   : > { %3851 = vrot.lane.b32.xlu1 %v4303_v33, %s4104_s17  ;;  %3856 = vrot.lane.b32.xlu0 %v4299_v32, %s4104_s17  ;;  %s4109_s17 = smov 96  }
  0x9c   : > { %v3699_v34 = vpop.permute.xlu0 %3698  ;;  %v3710_v37 = vpop.permute.xlu1 %3709 }
  0x9d   : > { %v3701_v35 = vunpack.i.h.bf16 %v3699_v34  ;;  %v3700_v36 = vunpack.i.l.bf16 %v3699_v34  ;;  %v3711_v38 = vunpack.i.l.bf16 %v3710_v37  ;;  %v3712_v44 = vunpack.i.h.bf16 %v3710_v37 }
  0x9e   : > { %3861 = vrot.lane.b32.xlu1 %v4253_v16, %s5569_s18  ;;  %3866 = vrot.lane.b32.xlu0 %v4267_v20, %s5569_s18  ;;  %v4543_v20 = vld [vmem:[%s5553_s9] ss:$0 sm:$0xff] }
  0x9f   : > { %v681_v39 = vmul.f32 %v3701_v35, %v4237_v7  ;;  %v680_v40 = vmul.f32 %v3700_v36, %v4235_v6  ;;  %v684_v45 = vmul.f32 %v3711_v38, %v4231_v4  ;;  %v685_v56 = vmul.f32 %v3712_v44, %v4233_v5 }
  0xa0   : > { %v3704_v41 = vpop.permute.xlu0 %3703  ;;  %v3715_v48 = vpop.permute.xlu1 %3714 }
  0xa1   : > { %v3706_v42 = vunpack.i.h.bf16 %v3704_v41  ;;  %v3705_v43 = vunpack.i.l.bf16 %v3704_v41  ;;  %3427 = vmatprep.mubr.msk.f32.mxu0 %vm816_vm1, %v680_v40  ;;  %v3716_v49 = vunpack.i.l.bf16 %v3715_v48  ;;  %v3717_v0 = vunpack.i.h.bf16 %v3715_v48 }
  0xa2   : > { %3428 = vmatmul.mubr.msk.f32.vlgmr.msra.gmra.mrb[0].mxu0 %vm816_vm1, %v681_v39  ;;  %3871 = vrot.lane.b32.xlu1 %v4249_v15, %s5569_s18 }
  0xa3   : > { %v683_v46 = vmul.f32 %v3706_v42, %v4245_v13  ;;  %v682_v47 = vmul.f32 %v3705_v43, %v4243_v12  ;;  %v686_v1 = vmul.f32 %v3716_v49, %v4239_v10  ;;  %v687_v24 = vmul.f32 %v3717_v0, %v4241_v11  ;;  %v1055_v49 = vld [vmem:[%s5555_s11 + $0x10] sm:$0xff]  ;;  %3876 = vrot.lane.b32.xlu0 %v4263_v19, %s5569_s18 }
  0xa4   : > { %v3720_v57 = vpop.permute.xlu0 %3719  ;;  %v3725_v23 = vpop.permute.xlu1 %3724 }
  0xa5   : > { %3430 = vmatprep.mubr.msk.f32.mxu0 %vm816_vm1, %v682_v47  ;;  %v3721_v8 = vunpack.i.l.bf16 %v3720_v57  ;;  %v3722_v31 = vunpack.i.h.bf16 %v3720_v57  ;;  %v3726_v16 = vunpack.i.l.bf16 %v3725_v23  ;;  %v3727_v3 = vunpack.i.h.bf16 %v3725_v23  ;;  %v1054_v47 = vld [vmem:[%s5555_s11 + $0x8] sm:$0xff] }
  0xa6   : > { %3431 = vmatmul.mubr.msk.f32.gmra.mrb[2].mxu0 %vm816_vm1, %v683_v46  ;;  %v1053_v46 = vld [vmem:[%s5555_s11] sm:$0xff]  ;;  %3881 = vrot.lane.b32.xlu1 %v4283_v27, %s5569_s18 }
  0xa7   : > { %3433 = vmatprep.mubr.msk.f32.mxu0 %vm816_vm1, %v684_v45  ;;  %v688_v61 = vmul.f32 %v3721_v8, %v4269_v21  ;;  %v689_v34 = vmul.f32 %v3722_v31, %v4271_v22  ;;  %v690_v35 = vmul.f32 %v3726_v16, %v4255_v17  ;;  %v691_v38 = vmul.f32 %v3727_v3, %v4257_v18 }
  0xa8   : > { %v3730_v63 = vpop.permute.xlu0 %3729  ;;  %v3735_v37 = vpop.permute.xlu1 %3734  ;;  %v3601_v48 = vpack.c.bf16 %v1054_v47, %v1053_v46  ;;  %3886 = vrot.lane.b32.xlu0 %v4275_v25, %s5569_s18  ;;  %v4550_v25 = vld [vmem:[%s5554_s10] ss:$0 sm:$0xff]  ;;  %s4108_s18 = smov 99  }
  0xa9   : > { %v3731_v36 = vunpack.i.l.bf16 %v3730_v63  ;;  %v3732_v39 = vunpack.i.h.bf16 %v3730_v63  ;;  %v3736_v40 = vunpack.i.l.bf16 %v3735_v37  ;;  %v3737_v42 = vunpack.i.h.bf16 %v3735_v37 }
  0xaa   : > { %3434 = vmatmul.mubr.msk.f32.gmra.mrb[4].mxu0 %vm816_vm1, %v685_v56  ;;  %3602 = vmatprep.subr.bf16.mxu1 %v3601_v48  ;;  %v1056_v56 = vld [vmem:[%s5555_s11 + $0x18] sm:$0xff] }
  0xab   : > { %3436 = vmatprep.mubr.msk.f32.mxu0 %vm816_vm1, %v686_v1  ;;  %v692_v41 = vmul.f32 %v3731_v36, %v4287_v29  ;;  %v693_v43 = vmul.f32 %v3732_v39, %v4289_v30  ;;  %v694_v44 = vmul.f32 %v3736_v40, %v4277_v26  ;;  %v695_v45 = vmul.f32 %v3737_v42, %v4285_v28 }
  0xac   : > { %3604 = vmatpush3.bf16.msra.mxu1 %v3601_v48  ;;  %v3605_v57 = vpack.c.bf16 %v1056_v56, %v1055_v49  ;;  %v722_v15 = vpop.permute.xlu1 %721  ;;  %v717_v0 = vpop.permute.xlu0 %716 }
  0xad   : > { %v801_v31 = vmul.f32 %v4543_v20, %v722_v15  ;;  %v800_v16 = vmul.f32 %v4543_v20, %v717_v0 }
  0xae   : > { %3437 = vmatmul.mubr.msk.f32.gmra.mrb[6].mxu0 %vm816_vm1, %v687_v24  ;;  %3606 = vmatprep.subr.bf16.mxu1 %v3605_v57 }
  0xaf   : > { %3439 = vmatprep.mubr.msk.f32.mxu0 %vm816_vm1, %v688_v61 }
  0xb0   : > { %3608 = vmatpush3.bf16.msra.mxu1 %v3605_v57  ;;  %v732_v1 = vpop.permute.xlu1 %731  ;;  %v727_v8 = vpop.permute.xlu0 %726 }
  0xb1   : > { %v802_v37 = vmul.f32 %v4543_v20, %v727_v8 }
  0xb2   : > { %3440 = vmatmul.mubr.msk.f32.gmra.mrb[8].mxu0 %vm816_vm1, %v689_v34 }
  0xb3   : > { %3442 = vmatprep.mubr.msk.f32.mxu0 %vm816_vm1, %v690_v35  ;;  %v803_v35 = vmul.f32 %v4543_v20, %v732_v1 }
  0xb4   : > { %v742_v23 = vpop.permute.xlu1 %741  ;;  %v737_v24 = vpop.permute.xlu0 %736 }
  0xb5   : > { %v805_v47 = vmul.f32 %v4543_v20, %v742_v23  ;;  %v804_v49 = vmul.f32 %v4543_v20, %v737_v24 }
  0xb6   : > { %3443 = vmatmul.mubr.msk.f32.gmra.mrb[10].mxu0 %vm816_vm1, %v691_v38 }
  0xb7   : > { %3445 = vmatprep.mubr.msk.f32.mxu0 %vm816_vm1, %v692_v41 }
  0xb8   : > { %v752_v27 = vpop.permute.xlu1 %751  ;;  %v747_v19 = vpop.permute.xlu0 %746 }
  0xb9   : > { %v807_v23 = vmul.f32 %v4543_v20, %v752_v27 }
  0xba   : > { %3446 = vmatmul.mubr.msk.f32.gmra.mrb[12].mxu0 %vm816_vm1, %v693_v43 }
  0xbb   : > { %3448 = vmatprep.mubr.msk.f32.mxu0 %vm816_vm1, %v694_v44 }
  0xbc   : > { %v762_v40 = vpop.permute.xlu1 %761  ;;  %v757_v44 = vpop.permute.xlu0 %756 }
  0xbd   : > { %v809_v27 = vmul.f32 %v4543_v20, %v762_v40 }
  0xbe   : > { %3449 = vmatmul.mubr.msk.f32.gmra.mrb[14].mxu0 %vm816_vm1, %v695_v45 }
 0x175   : > { %v3429_v61 = vpop.f32.mrb[0].mxu0 }
 0x176   : > { %v941_v63 = vadd.f32 %v3429_v61, %v801_v31  ;;  %v935_v3 = vpop.f32.mrb[1].mxu0  ;;  %v772_v61 = vpop.permute.xlu1 %771 }
 0x177   : > { %v936_v34 = vadd.f32 %v935_v3, %v800_v16  ;;  %v767_v3 = vpop.permute.xlu0 %766  ;;  %v811_v40 = vmul.f32 %v4543_v20, %v772_v61 }
 0x178   : > { %v1022_v36 = vadd.f32 %v4550_v25, %v941_v63  ;;  %v806_v63 = vmul.f32 %v4543_v20, %v747_v19 }
 0x179   : > { %v3432_v38 = vpop.f32.mrb[2].mxu0  ;;  %v1021_v39 = vadd.f32 %v4550_v25, %v936_v34 }
 0x17a   : > { %v1038_v41 = vmax.f32 %v1022_v36, 0.0  ;;  %v951_v42 = vadd.f32 %v3432_v38, %v803_v35  ;;  %v945_v43 = vpop.f32.mrb[3].mxu0 }
 0x17b   : > { %v946_v45 = vadd.f32 %v945_v43, %v802_v37  ;;  %v1037_v46 = vmax.f32 %v1021_v39, 0.0  ;;  %v808_v43 = vmul.f32 %v4543_v20, %v757_v44 }
 0x17c   : > { %v1024_v48 = vadd.f32 %v4550_v25, %v951_v42 }
 0x17d   : > { %v1023_v56 = vadd.f32 %v4550_v25, %v946_v45  ;;  %v3435_v57 = vpop.f32.mrb[4].mxu0  ;;  %v3890_v15 = vpack.i.bf16 %v1038_v41, %v1037_v46  ;;  %3459 = vmatprep.mubr.msk.f32.mxu1 %vm1064_vm2, %v1037_v46 }
 0x17e   : > { %v1040_v0 = vmax.f32 %v1024_v48, 0.0  ;;  %v961_v1 = vadd.f32 %v3435_v57, %v805_v47  ;;  %v955_v8 = vpop.f32.mrb[5].mxu0  ;;  %3460 = vmatmul.mubr.msk.f32.vlgmr.msra.gmra.mrb[0].mxu1 %vm1064_vm2, %v1038_v41  ;;  %v782_v48 = vpop.permute.xlu1 %781 }
 0x17f   : > { %v1039_v31 = vmax.f32 %v1023_v56, 0.0  ;;  %v956_v16 = vadd.f32 %v955_v8, %v804_v49  ;;  %3891 = vrot.lane.b32.xlu1 %v3890_v15, %s4106_s29  ;;  %v777_v15 = vpop.permute.xlu0 %776  ;;  %v810_v8 = vmul.f32 %v4543_v20, %v767_v3  ;;  %v813_v61 = vmul.f32 %v4543_v20, %v782_v48  ;;  %v1276_v48 = vld [vmem:[%s5557_s13 + $0x10] sm:$0xff] }
 0x180   : > { %v1026_v24 = vadd.f32 %v4550_v25, %v961_v1 }
 0x181   : > { %v1025_v34 = vadd.f32 %v4550_v25, %v956_v16  ;;  %v3438_v35 = vpop.f32.mrb[6].mxu0  ;;  %3462 = vmatprep.mubr.msk.f32.mxu1 %vm1064_vm2, %v1039_v31  ;;  %v3895_v36 = vpack.i.bf16 %v1040_v0, %v1039_v31 }
 0x182   : > { %v1042_v37 = vmax.f32 %v1026_v24, 0.0  ;;  %v971_v38 = vadd.f32 %v3438_v35, %v807_v23  ;;  %v965_v39 = vpop.f32.mrb[7].mxu0  ;;  %3463 = vmatmul.mubr.msk.f32.gmra.mrb[2].mxu1 %vm1064_vm2, %v1040_v0 }
 0x183   : > { %v1041_v41 = vmax.f32 %v1025_v34, 0.0  ;;  %v966_v42 = vadd.f32 %v965_v39, %v806_v63  ;;  %3896 = vrot.lane.b32.xlu0 %v3895_v36, %s4106_s29  ;;  %v787_v39 = vpop.permute.xlu0 %786 }
 0x184   : > { %v1028_v19 = vadd.f32 %v4550_v25, %v971_v38  ;;  %v812_v38 = vmul.f32 %v4543_v20, %v777_v15  ;;  %v1277_v15 = vld [vmem:[%s5557_s13 + $0x18] sm:$0xff] }
 0x185   : > { %v1027_v45 = vadd.f32 %v4550_v25, %v966_v42  ;;  %v3441_v46 = vpop.f32.mrb[8].mxu0  ;;  %3465 = vmatprep.mubr.msk.f32.mxu1 %vm1064_vm2, %v1041_v41  ;;  %v3900_v47 = vpack.i.bf16 %v1042_v37, %v1041_v41 }
 0x186   : > { %v1044_v49 = vmax.f32 %v1028_v19, 0.0  ;;  %v981_v56 = vadd.f32 %v3441_v46, %v809_v27  ;;  %v975_v57 = vpop.f32.mrb[9].mxu0  ;;  %3466 = vmatmul.mubr.msk.f32.gmra.mrb[4].mxu1 %vm1064_vm2, %v1042_v37  ;;  %v792_v37 = vpop.permute.xlu1 %791  ;;  %v1274_v46 = vld [vmem:[%s5557_s13] sm:$0xff] }
 0x187   : > { %v1043_v0 = vmax.f32 %v1027_v45, 0.0  ;;  %v976_v1 = vadd.f32 %v975_v57, %v808_v43  ;;  %3901 = vrot.lane.b32.xlu1 %v3900_v47, %s4106_s29  ;;  %v1275_v47 = vld [vmem:[%s5557_s13 + $0x8] sm:$0xff] }
 0x188   : > { %v1030_v44 = vadd.f32 %v4550_v25, %v981_v56  ;;  %v3609_v57 = vpack.c.bf16 %v1275_v47, %v1274_v46 }
 0x189   : > { %v1029_v31 = vadd.f32 %v4550_v25, %v976_v1  ;;  %v3444_v16 = vpop.f32.mrb[10].mxu0  ;;  %3468 = vmatprep.mubr.msk.f32.mxu1 %vm1064_vm2, %v1043_v0  ;;  %v3905_v23 = vpack.i.bf16 %v1044_v49, %v1043_v0  ;;  %v815_v0 = vmul.f32 %v4543_v20, %v792_v37  ;;  %v814_v1 = vmul.f32 %v4543_v20, %v787_v39  ;;  %v1667_v39 = vld [vmem:[%s5546_s2 + $0x8] sm:$0xff] }
 0x18a   : > { %v1046_v24 = vmax.f32 %v1030_v44, 0.0  ;;  %v991_v63 = vadd.f32 %v3444_v16, %v811_v40  ;;  %v985_v34 = vpop.f32.mrb[11].mxu0  ;;  %3469 = vmatmul.mubr.msk.f32.gmra.mrb[6].mxu1 %vm1064_vm2, %v1044_v49  ;;  %3625 = vmatprep.subr.bf16.mxu1 %v3609_v57  ;;  %v3613_v16 = vpack.c.bf16 %v1277_v15, %v1276_v48 }
 0x18b   : > { %v1045_v35 = vmax.f32 %v1029_v31, 0.0  ;;  %v986_v36 = vadd.f32 %v985_v34, %v810_v8  ;;  %3906 = vrot.lane.b32.xlu0 %v3905_v23, %s4106_s29  ;;  %3610 = vmatprep.subr.bf16.mxu0 %v3609_v57 }
 0x18c   : > { %v1032_v3 = vadd.f32 %v4550_v25, %v991_v63  ;;  %3627 = vmatpush3.bf16.msra.mxu1 %v3609_v57  ;;  %3612 = vmatpush3.bf16.msra.mxu0 %v3609_v57 }
 0x18d   : > { %v1031_v41 = vadd.f32 %v4550_v25, %v986_v36  ;;  %v3447_v42 = vpop.f32.mrb[12].mxu0  ;;  %3471 = vmatprep.mubr.msk.f32.mxu1 %vm1064_vm2, %v1045_v35  ;;  %v3910_v27 = vpack.i.bf16 %v1046_v24, %v1045_v35  ;;  %3626 = vmatprep.subr.bf16.mxu1 %v3613_v16 }
 0x18e   : > { %v1048_v19 = vmax.f32 %v1032_v3, 0.0  ;;  %v1001_v43 = vadd.f32 %v3447_v42, %v813_v61  ;;  %v995_v45 = vpop.f32.mrb[13].mxu0  ;;  %3472 = vmatmul.mubr.msk.f32.gmra.mrb[8].mxu1 %vm1064_vm2, %v1046_v24  ;;  %3614 = vmatprep.subr.bf16.mxu0 %v3613_v16  ;;  %v4627_v42 = vld [vmem:[%s5556_s12] ss:$0 sm:$0xff] }
 0x18f   : > { %v1047_v49 = vmax.f32 %v1031_v41, 0.0  ;;  %v996_v56 = vadd.f32 %v995_v45, %v812_v38  ;;  %3911 = vrot.lane.b32.xlu1 %v3910_v27, %s4106_s29 }
 0x190   : > { %v1034_v40 = vadd.f32 %v4550_v25, %v1001_v43  ;;  %3628 = vmatpush3.bf16.msra.mxu1 %v3613_v16  ;;  %3616 = vmatpush3.bf16.msra.mxu0 %v3613_v16 }
 0x191   : > { %v1033_v44 = vadd.f32 %v4550_v25, %v996_v56  ;;  %v3450_v8 = vpop.f32.mrb[14].mxu0  ;;  %3474 = vmatprep.mubr.msk.f32.mxu1 %vm1064_vm2, %v1047_v49  ;;  %v3915_v31 = vpack.i.bf16 %v1048_v19, %v1047_v49 }
 0x192   : > { %v1050_v23 = vmax.f32 %v1034_v40, 0.0  ;;  %v1011_v24 = vadd.f32 %v3450_v8, %v815_v0  ;;  %v1005_v63 = vpop.f32.mrb[15].mxu0  ;;  %3475 = vmatmul.mubr.msk.f32.gmra.mrb[10].mxu1 %vm1064_vm2, %v1048_v19  ;;  %v1668_v0 = vld [vmem:[%s5546_s2 + $0x10] sm:$0xff] }
 0x193   : > { %v1049_v34 = vmax.f32 %v1033_v44, 0.0  ;;  %v1006_v35 = vadd.f32 %v1005_v63, %v814_v1  ;;  %3916 = vrot.lane.b32.xlu0 %v3915_v31, %s4106_s29  ;;  %v1669_v1 = vld [vmem:[%s5546_s2 + $0x18] sm:$0xff] }
 0x194   : > { %v1036_v20 = vadd.f32 %v4550_v25, %v1011_v24 }
 0x195   : > { %v1035_v36 = vadd.f32 %v4550_v25, %v1006_v35  ;;  %3477 = vmatprep.mubr.msk.f32.mxu1 %vm1064_vm2, %v1049_v34  ;;  %v3920_v61 = vpack.i.bf16 %v1050_v23, %v1049_v34  ;;  %v1666_v25 = vld [vmem:[%s5546_s2] sm:$0xff]  ;;  %v4645_v34 = vpop.permute.xlu0 %3739 }
 0x196   : > { %v1052_v37 = vmax.f32 %v1036_v20, 0.0  ;;  %3478 = vmatmul.mubr.msk.f32.gmra.mrb[12].mxu1 %vm1064_vm2, %v1050_v23  ;;  %v3617_v41 = vpack.c.bf16 %v1667_v39, %v1666_v25  ;;  %v3621_v23 = vpack.c.bf16 %v1669_v1, %v1668_v0  ;;  %v1670_v39 = vld [vmem:[%s5546_s2 + $0x20] sm:$0xf] }
 0x197   : > { %v1051_v3 = vmax.f32 %v1035_v36, 0.0  ;;  %3921 = vrot.lane.b32.xlu1 %v3920_v61, %s4106_s29 }
 0x198   : > { %3618 = vmatprep.subr.bf16.mxu1 %v3617_v41 }
 0x199   : > { %3480 = vmatprep.mubr.msk.f32.mxu1 %vm1064_vm2, %v1051_v3  ;;  %v3925_v38 = vpack.i.bf16 %v1052_v37, %v1051_v3  ;;  %v4650_v3 = vpop.permute.xlu1 %3744 }
 0x19a   : > { %3481 = vmatmul.mubr.msk.f32.gmra.mrb[14].mxu1 %vm1064_vm2, %v1052_v37 }
 0x19b   : > { %3926 = vrot.lane.b32.xlu0 %v3925_v38, %s4106_s29 }
 0x251   : > { %v3461_v27 = vpop.f32.mrb[0].mxu1 }
 0x252   : > { %v1185_v19 = vadd.f32 %v3461_v27, %v4627_v42  ;;  %v1179_v43 = vpop.f32.mrb[1].mxu1 }
 0x253   : > { %v1180_v45 = vadd.f32 %v4627_v42, %v1179_v43  ;;  %v4659_v43 = vpop.permute.xlu0 %3749 }
 0x254   : > { %v1259_v46 = vmax.f32 %v1185_v19, 0.0 }
 0x255   : > { %v1258_v47 = vmax.f32 %v1180_v45, 0.0  ;;  %v3464_v48 = vpop.f32.mrb[2].mxu1 }
 0x256   : > { %v1195_v49 = vadd.f32 %v3464_v48, %v4627_v42  ;;  %v1189_v56 = vpop.f32.mrb[3].mxu1 }
 0x257   : > { %v3930_v57 = vpack.i.bf16 %v1259_v46, %v1258_v47  ;;  %v1190_v15 = vadd.f32 %v4627_v42, %v1189_v56  ;;  %3491 = vmatprep.mubr.msk.f32.mxu0 %vm1064_vm2, %v1258_v47  ;;  %v4666_v56 = vpop.permute.xlu1 %3754 }
 0x258   : > { %v1261_v40 = vmax.f32 %v1195_v49, 0.0  ;;  %3492 = vmatmul.mubr.msk.f32.vlgmr.msra.gmra.mrb[16].mxu0 %vm1064_vm2, %v1259_v46 }
 0x259   : > { %v1260_v44 = vmax.f32 %v1190_v15, 0.0  ;;  %v3467_v8 = vpop.f32.mrb[4].mxu1  ;;  %3931 = vrot.lane.b32.xlu1 %v3930_v57, %s4107_s26 }
 0x25a   : > { %v1205_v31 = vadd.f32 %v3467_v8, %v4627_v42  ;;  %v1199_v16 = vpop.f32.mrb[5].mxu1  ;;  %v3211_v8 = vld [vmem:[%s4361_s30] sm:$0xff]   ;;  %s5612_s30 = smov 101  }
 0x25b   : > { %v3935_v24 = vpack.i.bf16 %v1261_v40, %v1260_v44  ;;  %v1200_v63 = vadd.f32 %v4627_v42, %v1199_v16  ;;  %3494 = vmatprep.mubr.msk.f32.mxu1 %vm1064_vm2, %v1260_v44 }
 0x25c   : > { %v1263_v35 = vmax.f32 %v1205_v31, 0.0  ;;  %3495 = vmatmul.mubr.msk.f32.vlgmr.msra.gmra.mrb[16].mxu1 %vm1064_vm2, %v1261_v40  ;;  %v4674_v31 = vpop.permute.xlu0 %3759 }
 0x25d   : > { %v1262_v20 = vmax.f32 %v1200_v63, 0.0  ;;  %3620 = vmatpush3.bf16.msra.mxu1 %v3617_v41  ;;  %v3470_v36 = vpop.f32.mrb[6].mxu1  ;;  %3936 = vrot.lane.b32.xlu0 %v3935_v24, %s4107_s26 }
 0x25e   : > { %v1215_v61 = vadd.f32 %v3470_v36, %v4627_v42  ;;  %v1209_v37 = vpop.f32.mrb[7].mxu1  ;;  %3622 = vmatprep.subr.bf16.mxu1 %v3621_v23  ;;  %v4680_v36 = vpop.permute.xlu1 %3764 }
 0x25f   : > { %v3940_v38 = vpack.i.bf16 %v1263_v35, %v1262_v20  ;;  %v1210_v25 = vadd.f32 %v4627_v42, %v1209_v37  ;;  %3497 = vmatprep.mubr.msk.f32.mxu1 %vm1064_vm2, %v1262_v20  ;;  %v3741_v20 = vunpack.i.l.bf16 %v4645_v34 }
 0x260   : > { %v1265_v41 = vmax.f32 %v1215_v61, 0.0  ;;  %3498 = vmatmul.mubr.msk.f32.gmra.mrb[18].mxu1 %vm1064_vm2, %v1263_v35 }
 0x261   : > { %v1264_v27 = vmax.f32 %v1210_v25, 0.0  ;;  %v3473_v19 = vpop.f32.mrb[8].mxu1  ;;  %3941 = vrot.lane.b32.xlu1 %v3940_v38, %s4107_s26  ;;  %3624 = vmatpush3.bf16.msra.mxu1 %v3621_v23  ;;  %v3212_v38 = vunpack.c.l.bf16 %v3211_v8 }
 0x262   : > { %v1225_v45 = vadd.f32 %v3473_v19, %v4627_v42  ;;  %v1219_v46 = vpop.f32.mrb[9].mxu1  ;;  %3523 = vmatprep.subr.msk.mxu1 %vm1727_vm3, %v1670_v39  ;;  %v3213_v19 = vunpack.c.h.bf16 %v3211_v8 }
 0x263   : > { %v3945_v47 = vpack.i.bf16 %v1265_v41, %v1264_v27  ;;  %v1220_v48 = vadd.f32 %v4627_v42, %v1219_v46  ;;  %3500 = vmatprep.mubr.msk.f32.mxu1 %vm1064_vm2, %v1264_v27  ;;  %v3751_v46 = vunpack.i.l.bf16 %v4659_v43 }
 0x264   : > { %v1267_v49 = vmax.f32 %v1225_v45, 0.0  ;;  %3501 = vmatmul.mubr.msk.f32.gmra.mrb[20].mxu1 %vm1064_vm2, %v1265_v41  ;;  %v3742_v45 = vunpack.i.h.bf16 %v4645_v34  ;;  %v3756_v34 = vunpack.i.l.bf16 %v4666_v56 }
 0x265   : > { %v1266_v57 = vmax.f32 %v1220_v48, 0.0  ;;  %v3476_v15 = vpop.f32.mrb[10].mxu1  ;;  %3946 = vrot.lane.b32.xlu0 %v3945_v47, %s4107_s26  ;;  %3524 = vmatpush3.msk.msra.mxu1 %vm1727_vm3, %v1670_v39  ;;  %v3746_v39 = vunpack.i.l.bf16 %v4650_v3  ;;  %v3770_v47 = vpop.permute.xlu0 %3769 }
 0x266   : > { %v1235_v0 = vadd.f32 %v3476_v15, %v4627_v42  ;;  %v1229_v1 = vpop.f32.mrb[11].mxu1 }
 0x267   : > { %v3950_v40 = vpack.i.bf16 %v1267_v49, %v1266_v57  ;;  %v1230_v44 = vadd.f32 %v4627_v42, %v1229_v1  ;;  %3503 = vmatprep.mubr.msk.f32.mxu1 %vm1064_vm2, %v1266_v57 }
 0x268   : > { %v1269_v16 = vmax.f32 %v1235_v0, 0.0  ;;  %3504 = vmatmul.mubr.msk.f32.gmra.mrb[22].mxu1 %vm1064_vm2, %v1267_v49  ;;  %v1633_v0 = vsel %vm1632_vm4, %v3212_v38, %v3741_v20  ;;  %v3757_v20 = vunpack.i.h.bf16 %v4666_v56 }
 0x269   : > { %v1268_v23 = vmax.f32 %v1230_v44, 0.0  ;;  %3951 = vrot.lane.b32.xlu1 %v3950_v40, %s4107_s26  ;;  %v3479_v24 = vpop.f32.mrb[12].mxu1  ;;  %v3747_v40 = vunpack.i.h.bf16 %v4650_v3  ;;  %v3775_v44 = vpop.permute.xlu1 %3774  ;;  %v1635_v3 = vsel %vm1632_vm4, %v3216_v58, %v3751_v46 }
 0x26a   : > { %v1245_v63 = vadd.f32 %v3479_v24, %v4627_v42  ;;  %v1239_v35 = vpop.f32.mrb[13].mxu1  ;;  %v3761_v24 = vunpack.i.l.bf16 %v4674_v31  ;;  %v1652_v38 = vsel %vm1649_vm5, %v1635_v3, %v3756_v34 }
 0x26b   : > { %v3955_v61 = vpack.i.bf16 %v1269_v16, %v1268_v23  ;;  %v1240_v37 = vadd.f32 %v4627_v42, %v1239_v35  ;;  %3506 = vmatprep.mubr.msk.f32.mxu1 %vm1064_vm2, %v1268_v23  ;;  %v1650_v23 = vsel %vm1649_vm5, %v1633_v0, %v3746_v39  ;;  %v3780_v35 = vpop.permute.xlu0 %3779  ;;  %v3771_v39 = vunpack.i.l.bf16 %v3770_v47 }
 0x26c   : > { %v1271_v25 = vmax.f32 %v1245_v63, 0.0  ;;  %3507 = vmatmul.mubr.msk.f32.gmra.mrb[24].mxu1 %vm1064_vm2, %v1269_v16  ;;  %v1634_v16 = vsel %vm1632_vm4, %v3213_v19, %v3742_v45  ;;  %v1637_v56 = vsel %vm1632_vm4, %v3220_v54, %v3761_v24  ;;  %v3772_v19 = vunpack.i.h.bf16 %v3770_v47 }
 0x26d   : > { %v1270_v41 = vmax.f32 %v1240_v37, 0.0  ;;  %3956 = vrot.lane.b32.xlu0 %v3955_v61, %s4107_s26  ;;  %v3482_v27 = vpop.f32.mrb[14].mxu1  ;;  %v3766_v61 = vunpack.i.l.bf16 %v4680_v36  ;;  %v3762_v37 = vunpack.i.h.bf16 %v4674_v31  ;;  %v3781_v46 = vunpack.i.l.bf16 %v3780_v35 }
 0x26e   : > { %v1255_v48 = vadd.f32 %v3482_v27, %v4627_v42  ;;  %v1249_v49 = vpop.f32.mrb[15].mxu1  ;;  %v3776_v27 = vunpack.i.l.bf16 %v3775_v44  ;;  %v5604_v54 = vunpack.c.l.bf16 %v4367_v52  ;;  %v5607_v52 = vunpack.c.h.bf16 %v4379_v60 }
 0x26f   : > { %v3960_v57 = vpack.i.bf16 %v1271_v25, %v1270_v41  ;;  %v1250_v15 = vadd.f32 %v4627_v42, %v1249_v49  ;;  %3509 = vmatprep.mubr.msk.f32.mxu1 %vm1064_vm2, %v1270_v41  ;;  %v3752_v42 = vunpack.i.h.bf16 %v4659_v43  ;;  %v1651_v43 = vsel %vm1649_vm5, %v1634_v16, %v3747_v40  ;;  %v3790_v45 = vpop.permute.xlu0 %3789 }
 0x270   : > { %v1273_v1 = vmax.f32 %v1255_v48, 0.0  ;;  %3510 = vmatmul.mubr.msk.f32.gmra.mrb[26].mxu1 %vm1064_vm2, %v1271_v25  ;;  %v3785_v25 = vpop.permute.xlu1 %3784  ;;  %v3767_v41 = vunpack.i.h.bf16 %v4680_v36  ;;  %v1654_v53 = vsel %vm1649_vm5, %v1637_v56, %v3766_v61  ;;  %v1639_v48 = vsel %vm1632_vm4, %v5604_v54, %v3771_v39 }
 0x271   : > { %v1272_v8 = vmax.f32 %v1250_v15, 0.0  ;;  %3961 = vrot.lane.b32.xlu1 %v3960_v57, %s4107_s26  ;;  %v1636_v58 = vsel %vm1632_vm4, %v3217_v59, %v3752_v42  ;;  %v1638_v59 = vsel %vm1632_vm4, %v3221_v55, %v3762_v37  ;;  %v3777_v36 = vunpack.i.h.bf16 %v3775_v44 }
 0x272   : > { %v1653_v31 = vsel %vm1649_vm5, %v1636_v58, %v3757_v20  ;;  %v1655_v47 = vsel %vm1649_vm5, %v1638_v59, %v3767_v41  ;;  %v3786_v57 = vunpack.i.l.bf16 %v3785_v25  ;;  %v3782_v15 = vunpack.i.h.bf16 %v3780_v35 }
 0x273   : > { %v3965_v63 = vpack.i.bf16 %v1273_v1, %v1272_v8  ;;  %3512 = vmatprep.mubr.msk.f32.mxu1 %vm1064_vm2, %v1272_v8  ;;  %v1656_v0 = vsel %vm1649_vm5, %v1639_v48, %v3776_v27  ;;  %v1640_v55 = vsel %vm1632_vm4, %v5605_v51, %v3772_v19  ;;  %v5606_v40 = vunpack.c.l.bf16 %v4379_v60  ;;  %v3800_v8 = vpop.permute.xlu0 %3799 }
 0x274   : > { %3513 = vmatmul.mubr.msk.f32.gmra.mrb[28].mxu1 %vm1064_vm2, %v1273_v1  ;;  %v3795_v49 = vpop.permute.xlu1 %3794  ;;  %v3791_v1 = vunpack.i.l.bf16 %v3790_v45  ;;  %v3787_v44 = vunpack.i.h.bf16 %v3785_v25  ;;  %v1657_v16 = vsel %vm1649_vm5, %v1640_v55, %v3777_v36  ;;  %v3801_v35 = vunpack.i.l.bf16 %v3800_v8 }
 0x275   : > { %3966 = vrot.lane.b32.xlu0 %v3965_v63, %s4107_s26  ;;  %3525 = vmatprep.mubr.msk.f32.mxu1 %vm1678_vm6, %v1650_v23  ;;  %v1641_v34 = vsel %vm1632_vm4, %v5606_v40, %v3781_v46  ;;  %v3796_v42 = vunpack.i.l.bf16 %v3795_v49  ;;  %v3792_v23 = vunpack.i.h.bf16 %v3790_v45  ;;  %v1642_v63 = vsel %vm1632_vm4, %v5607_v52, %v3782_v15 }
 0x276   : > { %v1658_v24 = vsel %vm1649_vm5, %v1641_v34, %v3786_v57  ;;  %v5608_v20 = vunpack.c.l.bf16 %v4398_v2  ;;  %v3797_v61 = vunpack.i.h.bf16 %v3795_v49  ;;  %v1659_v37 = vsel %vm1649_vm5, %v1642_v63, %v3787_v44 }
 0x277   : > { %v3802_v58 = vunpack.i.h.bf16 %v3800_v8  ;;  %v3810_v25 = vpop.permute.xlu0 %3809  ;;  %v5609_v39 = vunpack.c.h.bf16 %v4398_v2  ;;  %v5611_v2 = vunpack.c.h.bf16 %v4409_v14 }
 0x278   : > { %3526 = vmatmul.mubr.msk.f32.vlgmr.msra.gmra.mrb[30].mxu1 %vm1678_vm6, %v1651_v43  ;;  %v3805_v3 = vpop.permute.xlu1 %3804  ;;  %v1643_v43 = vsel %vm1632_vm4, %v5608_v20, %v3791_v1  ;;  %v3811_v41 = vunpack.i.l.bf16 %v3810_v25  ;;  %v3812_v46 = vunpack.i.h.bf16 %v3810_v25 }
 0x279   : > { %3528 = vmatprep.mubr.msk.f32.mxu1 %vm1678_vm6, %v1652_v38  ;;  %v3806_v38 = vunpack.i.l.bf16 %v3805_v3  ;;  %v1660_v60 = vsel %vm1649_vm5, %v1643_v43, %v3796_v42  ;;  %v1644_v56 = vsel %vm1632_vm4, %v5609_v39, %v3792_v23  ;;  %v3807_v19 = vunpack.i.h.bf16 %v3805_v3 }
 0x27a   : > { %v1646_v48 = vsel %vm1632_vm4, %v5611_v2, %v3802_v58  ;;  %v1647_v36 = vsel %vm1632_vm4, %v3240_v62, %v3811_v41  ;;  %v1648_v15 = vsel %vm1632_vm4, %v3241_v9, %v3812_v46  ;;  %v1877_v62 = vld [vmem:[%s5549_s5] sm:$0x7] }
 0x27b   : > { %3549 = vmatprep.subr.msk.mxu0 %vm865_vm0, %v1877_v62  ;;  %v4789_v9 = vld [vmem:[%s5548_s4] sm:$0x7] }
 0x27c   : > { %3529 = vmatmul.mubr.msk.f32.gmra.mrb[32].mxu1 %vm1678_vm6, %v1653_v31  ;;  %v5610_v31 = vunpack.c.l.bf16 %v4409_v14  ;;  %v3815_v45 = vpop.permute.xlu1 %3814  ;;  %3550 = vmatpush3.msk.msra.mxu0 %vm865_vm0, %v1877_v62 }
 0x27d   : > { %3531 = vmatprep.mubr.msk.f32.mxu1 %vm1678_vm6, %v1654_v53  ;;  %v1661_v53 = vsel %vm1649_vm5, %v1644_v56, %v3797_v61  ;;  %v3816_v59 = vunpack.i.l.bf16 %v3815_v45  ;;  %v3817_v49 = vunpack.i.h.bf16 %v3815_v45  ;;  %3575 = vmatprep.subr.msk.mxu0 %vm865_vm0, %v4789_v9 }
 0x27e   : > { %v1645_v27 = vsel %vm1632_vm4, %v5610_v31, %v3801_v35 }
 0x27f   : > { %v1662_v54 = vsel %vm1649_vm5, %v1645_v27, %v3806_v38  ;;  %v1664_v57 = vsel %vm1649_vm5, %v1647_v36, %v3816_v59  ;;  %v1665_v14 = vsel %vm1649_vm5, %v1648_v15, %v3817_v49 }
 0x280   : > { %3532 = vmatmul.mubr.msk.f32.gmra.mrb[34].mxu1 %vm1678_vm6, %v1655_v47  ;;  %v1663_v47 = vsel %vm1649_vm5, %v1646_v48, %v3807_v19 }
 0x281   : > { %3534 = vmatprep.mubr.msk.f32.mxu1 %vm1678_vm6, %v1656_v0 }
 0x284   : > { %3535 = vmatmul.mubr.msk.f32.gmra.mrb[36].mxu1 %vm1678_vm6, %v1657_v16 }
 0x285   : > { %3537 = vmatprep.mubr.msk.f32.mxu1 %vm1678_vm6, %v1658_v24 }
 0x288   : > { %3538 = vmatmul.mubr.msk.f32.gmra.mrb[38].mxu1 %vm1678_vm6, %v1659_v37 }
 0x289   : > { %3540 = vmatprep.mubr.msk.f32.mxu1 %vm1678_vm6, %v1660_v60 }
 0x28c   : > { %3541 = vmatmul.mubr.msk.f32.gmra.mrb[40].mxu1 %vm1678_vm6, %v1661_v53 }
 0x28d   : > { %3543 = vmatprep.mubr.msk.f32.mxu1 %vm1678_vm6, %v1662_v54 }
 0x290   : > { %3544 = vmatmul.mubr.msk.f32.gmra.mrb[42].mxu1 %vm1678_vm6, %v1663_v47  ;;  %v4806_v47 = vld [vmem:[%s5547_s3] ss:$0 sm:$0xff] }
 0x291   : > { %3546 = vmatprep.mubr.msk.f32.mxu1 %vm1678_vm6, %v1664_v57 }
 0x294   : > { %3547 = vmatmul.mubr.msk.f32.gmra.mrb[44].mxu1 %vm1678_vm6, %v1665_v14 }
 0x32b   : > { %v3493_v0 = vpop.f32.mrb[16].mxu0 }
 0x32c   : > { %v1405_v51 = vadd.f32 %v3493_v0, %v3073_v50  ;;  %v1399_v55 = vpop.f32.mrb[17].mxu0 }
 0x32d   : > { %v1400_v1 = vadd.f32 %v3073_v50, %v1399_v55 }
 0x32f   : > { %v3970_v40 = vpack.i.bf16 %v1405_v51, %v1400_v1  ;;  %v3496_v34 = vpop.f32.mrb[16].mxu1 }
 0x330   : > { %v1415_v8 = vadd.f32 %v3496_v34, %v3073_v50  ;;  %v1409_v44 = vpop.f32.mrb[17].mxu1 }
 0x331   : > { %v1410_v16 = vadd.f32 %v3073_v50, %v1409_v44  ;;  %3971 = vrot.lane.b32.xlu1 %v3970_v40, %s4108_s18 }
 0x333   : > { %v3975_v42 = vpack.i.bf16 %v1415_v8, %v1410_v16  ;;  %v3499_v23 = vpop.f32.mrb[18].mxu1 }
 0x334   : > { %v1425_v24 = vadd.f32 %v3499_v23, %v3073_v50  ;;  %v1419_v52 = vpop.f32.mrb[19].mxu1 }
 0x335   : > { %v1420_v63 = vadd.f32 %v3073_v50, %v1419_v52  ;;  %3976 = vrot.lane.b32.xlu0 %v3975_v42, %s4108_s18 }
 0x337   : > { %v3980_v3 = vpack.i.bf16 %v1425_v24, %v1420_v63  ;;  %v3502_v35 = vpop.f32.mrb[20].mxu1 }
 0x338   : > { %v1435_v20 = vadd.f32 %v3502_v35, %v3073_v50  ;;  %v1429_v43 = vpop.f32.mrb[21].mxu1 }
 0x339   : > { %v1430_v61 = vadd.f32 %v3073_v50, %v1429_v43  ;;  %3981 = vrot.lane.b32.xlu1 %v3980_v3, %s4108_s18 }
 0x33b   : > { %v3985_v37 = vpack.i.bf16 %v1435_v20, %v1430_v61  ;;  %v3505_v38 = vpop.f32.mrb[22].mxu1 }
 0x33c   : > { %v1445_v58 = vadd.f32 %v3505_v38, %v3073_v50  ;;  %v1439_v25 = vpop.f32.mrb[23].mxu1 }
 0x33d   : > { %v1440_v60 = vadd.f32 %v3073_v50, %v1439_v25  ;;  %3986 = vrot.lane.b32.xlu0 %v3985_v37, %s4108_s18 }
 0x33f   : > { %v3990_v39 = vpack.i.bf16 %v1445_v58, %v1440_v60  ;;  %v3508_v56 = vpop.f32.mrb[24].mxu1 }
 0x340   : > { %v1455_v41 = vadd.f32 %v3508_v56, %v3073_v50  ;;  %v1449_v31 = vpop.f32.mrb[25].mxu1 }
 0x341   : > { %v1450_v27 = vadd.f32 %v3073_v50, %v1449_v31  ;;  %3991 = vrot.lane.b32.xlu1 %v3990_v39, %s4108_s18 }
 0x343   : > { %v3995_v19 = vpack.i.bf16 %v1455_v41, %v1450_v27  ;;  %v3511_v45 = vpop.f32.mrb[26].mxu1 }
 0x344   : > { %v1465_v53 = vadd.f32 %v3511_v45, %v3073_v50  ;;  %v1459_v59 = vpop.f32.mrb[27].mxu1 }
 0x345   : > { %v1460_v46 = vadd.f32 %v3073_v50, %v1459_v59  ;;  %3996 = vrot.lane.b32.xlu0 %v3995_v19, %s4108_s18 }
 0x347   : > { %v4000_v54 = vpack.i.bf16 %v1465_v53, %v1460_v46  ;;  %v3514_v2 = vpop.f32.mrb[28].mxu1 }
 0x348   : > { %v1475_v48 = vadd.f32 %v3514_v2, %v3073_v50  ;;  %v1469_v36 = vpop.f32.mrb[29].mxu1 }
 0x349   : > { %v1470_v49 = vadd.f32 %v3073_v50, %v1469_v36  ;;  %4001 = vrot.lane.b32.xlu1 %v4000_v54, %s4108_s18 }
 0x34b   : > { %v4005_v57 = vpack.i.bf16 %v1475_v48, %v1470_v49  ;;  %v3527_v15 = vpop.f32.mrb[30].mxu1 }
 0x34c   : > { %v1803_v14 = vadd.f32 %v3527_v15, %v4806_v47  ;;  %v1797_v62 = vpop.f32.mrb[31].mxu1 }
 0x34d   : > { %v1798_v0 = vadd.f32 %v4806_v47, %v1797_v62  ;;  %4006 = vrot.lane.b32.xlu0 %v4005_v57, %s4108_s18 }
 0x34f   : > { %v4010_v51 = vpack.i.bf16 %v1803_v14, %v1798_v0  ;;  %v3530_v55 = vpop.f32.mrb[32].mxu1  ;;  %3551 = vmatprep.mubr.msk.f32.mxu0 %vm816_vm1, %v1798_v0 }
 0x350   : > { %v1813_v50 = vadd.f32 %v3530_v55, %v4806_v47  ;;  %v1807_v1 = vpop.f32.mrb[33].mxu1  ;;  %3552 = vmatmul.mubr.msk.f32.vlgmr.msra.gmra.mrb[18].mxu0 %vm816_vm1, %v1803_v14 }
 0x351   : > { %v1808_v40 = vadd.f32 %v4806_v47, %v1807_v1  ;;  %3576 = vmatpush3.msk.msra.mxu0 %vm865_vm0, %v4789_v9  ;;  %4011 = vrot.lane.b32.xlu1 %v4010_v51, %s4109_s17 }
 0x353   : > { %v4015_v34 = vpack.i.bf16 %v1813_v50, %v1808_v40  ;;  %v3533_v8 = vpop.f32.mrb[34].mxu1  ;;  %3554 = vmatprep.mubr.msk.f32.mxu0 %vm816_vm1, %v1808_v40 }
 0x354   : > { %v1823_v44 = vadd.f32 %v3533_v8, %v4806_v47  ;;  %v1817_v16 = vpop.f32.mrb[35].mxu1  ;;  %3555 = vmatmul.mubr.msk.f32.gmra.mrb[20].mxu0 %vm816_vm1, %v1813_v50 }
 0x355   : > { %v1818_v42 = vadd.f32 %v4806_v47, %v1817_v16  ;;  %4016 = vrot.lane.b32.xlu0 %v4015_v34, %s4109_s17 }
 0x357   : > { %v4020_v23 = vpack.i.bf16 %v1823_v44, %v1818_v42  ;;  %v3536_v24 = vpop.f32.mrb[36].mxu1  ;;  %3557 = vmatprep.mubr.msk.f32.mxu0 %vm816_vm1, %v1818_v42 }
 0x358   : > { %v1833_v9 = vadd.f32 %v3536_v24, %v4806_v47  ;;  %v1827_v52 = vpop.f32.mrb[37].mxu1  ;;  %3558 = vmatmul.mubr.msk.f32.gmra.mrb[22].mxu0 %vm816_vm1, %v1823_v44 }
 0x359   : > { %v1828_v63 = vadd.f32 %v4806_v47, %v1827_v52  ;;  %4021 = vrot.lane.b32.xlu1 %v4020_v23, %s4109_s17 }
 0x35b   : > { %v4025_v3 = vpack.i.bf16 %v1833_v9, %v1828_v63  ;;  %v3539_v35 = vpop.f32.mrb[38].mxu1  ;;  %3560 = vmatprep.mubr.msk.f32.mxu0 %vm816_vm1, %v1828_v63 }
 0x35c   : > { %v1843_v20 = vadd.f32 %v3539_v35, %v4806_v47  ;;  %v1837_v43 = vpop.f32.mrb[39].mxu1  ;;  %3561 = vmatmul.mubr.msk.f32.gmra.mrb[24].mxu0 %vm816_vm1, %v1833_v9 }
 0x35d   : > { %v1838_v61 = vadd.f32 %v4806_v47, %v1837_v43  ;;  %4026 = vrot.lane.b32.xlu0 %v4025_v3, %s4109_s17 }
 0x35f   : > { %v4030_v37 = vpack.i.bf16 %v1843_v20, %v1838_v61  ;;  %v3542_v38 = vpop.f32.mrb[40].mxu1  ;;  %3563 = vmatprep.mubr.msk.f32.mxu0 %vm816_vm1, %v1838_v61  ;;  %v3142_v61 = vld [vmem:[%s5550_s6] ss:$0 sm:$0xff] }
 0x360   : > { %v1853_v58 = vadd.f32 %v3542_v38, %v4806_v47  ;;  %v1847_v25 = vpop.f32.mrb[41].mxu1  ;;  %3564 = vmatmul.mubr.msk.f32.gmra.mrb[26].mxu0 %vm816_vm1, %v1843_v20 }
 0x361   : > { %v1848_v60 = vadd.f32 %v4806_v47, %v1847_v25  ;;  %4031 = vrot.lane.b32.xlu1 %v4030_v37, %s4109_s17 }
 0x363   : > { %v4035_v39 = vpack.i.bf16 %v1853_v58, %v1848_v60  ;;  %v3545_v56 = vpop.f32.mrb[42].mxu1  ;;  %3566 = vmatprep.mubr.msk.f32.mxu0 %vm816_vm1, %v1848_v60 }
 0x364   : > { %v1863_v41 = vadd.f32 %v3545_v56, %v4806_v47  ;;  %v1857_v31 = vpop.f32.mrb[43].mxu1  ;;  %3567 = vmatmul.mubr.msk.f32.gmra.mrb[28].mxu0 %vm816_vm1, %v1853_v58 }
 0x365   : > { %v1858_v27 = vadd.f32 %v4806_v47, %v1857_v31  ;;  %4036 = vrot.lane.b32.xlu0 %v4035_v39, %s4109_s17 }
 0x367   : > { %v4040_v19 = vpack.i.bf16 %v1863_v41, %v1858_v27  ;;  %v3548_v45 = vpop.f32.mrb[44].mxu1  ;;  %3569 = vmatprep.mubr.msk.f32.mxu0 %vm816_vm1, %v1858_v27 }
 0x368   : > { %v1873_v53 = vadd.f32 %v3548_v45, %v4806_v47  ;;  %v1867_v59 = vpop.f32.mrb[45].mxu1  ;;  %3570 = vmatmul.mubr.msk.f32.gmra.mrb[30].mxu0 %vm816_vm1, %v1863_v41 }
 0x369   : > { %v1868_v46 = vadd.f32 %v4806_v47, %v1867_v59  ;;  %4041 = vrot.lane.b32.xlu1 %v4040_v19, %s4109_s17 }
 0x36b   : > { %v4045_v54 = vpack.i.bf16 %v1873_v53, %v1868_v46  ;;  %3572 = vmatprep.mubr.msk.f32.mxu0 %vm816_vm1, %v1868_v46 }
 0x36c   : > { %3573 = vmatmul.mubr.msk.f32.gmra.mrb[32].mxu0 %vm816_vm1, %v1873_v53 }
 0x36d   : > { %4046 = vrot.lane.b32.xlu0 %v4045_v54, %s4109_s17  ;;  %3577 = vmatprep.mubr.msk.f32.mxu0 %vm816_vm1, %v4235_v6 }
 0x36e   : > { %4051 = vrot.lane.b32.xlu1 %v4303_v33, %s5612_s30 }
 0x370   : > { %3578 = vmatmul.mubr.msk.f32.vlgmr.msra.gmra.mrb[18].mxu0 %vm816_vm1, %v4237_v7 }
 0x371   : > { %3580 = vmatprep.mubr.msk.f32.mxu0 %vm816_vm1, %v4243_v12  ;;  %4056 = vrot.lane.b32.xlu0 %v4299_v32, %s5612_s30 }
 0x374   : > { %3581 = vmatmul.mubr.msk.f32.gmra.mrb[20].mxu0 %vm816_vm1, %v4245_v13 }
 0x375   : > { %3583 = vmatprep.mubr.msk.f32.mxu0 %vm816_vm1, %v4231_v4  ;;  %v2261_v4 = vpop.permute.xlu1 %2260 }
 0x376   : > { %v4950_v38 = vmul.f32 %v3142_v61, %v2261_v4 }
 0x378   : > { %3584 = vmatmul.mubr.msk.f32.gmra.mrb[22].mxu0 %vm816_vm1, %v4233_v5  ;;  %v2257_v5 = vpop.permute.xlu0 %2256 }
 0x379   : > { %3586 = vmatprep.mubr.msk.f32.mxu0 %vm816_vm1, %v4239_v10  ;;  %v2265_v6 = vpop.permute.xlu1 %2264  ;;  %v4954_v25 = vmul.f32 %v3142_v61, %v2257_v5 }
 0x37a   : > { %v4952_v58 = vmul.f32 %v3142_v61, %v2265_v6 }
 0x37c   : > { %3587 = vmatmul.mubr.msk.f32.gmra.mrb[24].mxu0 %vm816_vm1, %v4241_v11  ;;  %v2269_v7 = vpop.permute.xlu0 %2268 }
 0x37d   : > { %3589 = vmatprep.mubr.msk.f32.mxu0 %vm816_vm1, %v4269_v21  ;;  %v2273_v10 = vpop.permute.xlu1 %2272  ;;  %v4960_v56 = vmul.f32 %v3142_v61, %v2269_v7 }
 0x37e   : > { %v4958_v39 = vmul.f32 %v3142_v61, %v2273_v10 }
 0x380   : > { %3590 = vmatmul.mubr.msk.f32.gmra.mrb[26].mxu0 %vm816_vm1, %v4271_v22  ;;  %v2277_v11 = vpop.permute.xlu0 %2276 }
 0x381   : > { %3592 = vmatprep.mubr.msk.f32.mxu0 %vm816_vm1, %v4255_v17  ;;  %v2281_v12 = vpop.permute.xlu1 %2280  ;;  %v4964_v31 = vmul.f32 %v3142_v61, %v2277_v11 }
 0x382   : > { %v4962_v41 = vmul.f32 %v3142_v61, %v2281_v12 }
 0x384   : > { %3593 = vmatmul.mubr.msk.f32.gmra.mrb[28].mxu0 %vm816_vm1, %v4257_v18  ;;  %v2285_v13 = vpop.permute.xlu0 %2284 }
 0x385   : > { %3595 = vmatprep.mubr.msk.f32.mxu0 %vm816_vm1, %v4287_v29  ;;  %v2289_v17 = vpop.permute.xlu1 %2288  ;;  %v4970_v45 = vmul.f32 %v3142_v61, %v2285_v13 }
 0x386   : > { %v4968_v19 = vmul.f32 %v3142_v61, %v2289_v17 }
 0x388   : > { %3596 = vmatmul.mubr.msk.f32.gmra.mrb[30].mxu0 %vm816_vm1, %v4289_v30  ;;  %v2293_v18 = vpop.permute.xlu0 %2292 }
 0x389   : > { %3598 = vmatprep.mubr.msk.f32.mxu0 %vm816_vm1, %v4277_v26  ;;  %v2297_v21 = vpop.permute.xlu1 %2296  ;;  %v4974_v59 = vmul.f32 %v3142_v61, %v2293_v18 }
 0x38a   : > { %v4972_v53 = vmul.f32 %v3142_v61, %v2297_v21 }
 0x38c   : > { %3599 = vmatmul.mubr.msk.f32.gmra.mrb[32].mxu0 %vm816_vm1, %v4285_v28  ;;  %v2301_v22 = vpop.permute.xlu0 %2300 }
 0x38d   : > { %v2305_v29 = vpop.permute.xlu1 %2304  ;;  %v4978_v54 = vmul.f32 %v3142_v61, %v2301_v22 }
 0x38e   : > { %v4976_v46 = vmul.f32 %v3142_v61, %v2305_v29 }
 0x390   : > { %v2309_v30 = vpop.permute.xlu0 %2308  ;;  %5622 = vst [vmem:[#allocation11_spill] sm:$0xff] %v4976_v46 }
 0x391   : > { %v2313_v32 = vpop.permute.xlu1 %2312  ;;  %v4982_v5 = vmul.f32 %v3142_v61, %v2309_v30 }
 0x392   : > { %v4980_v4 = vmul.f32 %v3142_v61, %v2313_v32 }
 0x393   : > { %5624 = vst [vmem:[#allocation13_spill] sm:$0xff] %v4982_v5 }
 0x394   : > { %v2317_v33 = vpop.permute.xlu0 %2316  ;;  %5623 = vst [vmem:[#allocation12_spill] sm:$0xff] %v4980_v4 }
 0x395   : > { %v4887_v26 = vpop.permute.xlu1 %3821  ;;  %v4986_v10 = vmul.f32 %v3142_v61, %v2317_v33 }
 0x397   : > { %5625 = vst [vmem:[#allocation14_spill] sm:$0xff] %v4986_v10 }
 0x398   : > { %v4889_v2 = vpop.permute.xlu0 %3826 }
 0x399   : > { %v4891_v28 = vpop.permute.xlu1 %3831 }
 0x39c   : > { %v4893_v48 = vpop.permute.xlu0 %3836 }
 0x39d   : > { %v4895_v36 = vpop.permute.xlu1 %3841 }
 0x3a0   : > { %v4897_v49 = vpop.permute.xlu0 %3846 }
 0x3a1   : > { %5613 = vst [vmem:[#allocation2_spill] sm:$0xff] %v4897_v49  ;;  %v4899_v47 = vpop.permute.xlu1 %3851 }
 0x3a2   : > { %5614 = vst [vmem:[#allocation3_spill] sm:$0xff] %v4899_v47 }
 0x3a4   : > { %v4901_v57 = vpop.permute.xlu0 %3856 }
 0x3a5   : > { %5615 = vst [vmem:[#allocation4_spill] sm:$0xff] %v4901_v57  ;;  %v3862_v15 = vpop.permute.xlu1 %3861 }
 0x3a6   : > { %v5004_v17 = vunpack.i.h.bf16 %v3862_v15  ;;  %v5006_v18 = vunpack.i.l.bf16 %v3862_v15 }
 0x3a8   : > { %v4903_v14 = vpop.permute.xlu0 %3866 }
 0x3a9   : > { %v3872_v62 = vpop.permute.xlu1 %3871  ;;  %v5017_v33 = vunpack.i.h.bf16 %v4903_v14  ;;  %v5020_v61 = vunpack.i.l.bf16 %v4903_v14 }
 0x3aa   : > { %v5010_v7 = vunpack.i.h.bf16 %v3872_v62  ;;  %v5014_v32 = vunpack.i.l.bf16 %v3872_v62 }
 0x3ac   : > { %v4905_v0 = vpop.permute.xlu0 %3876 }
 0x3ad   : > { %v4907_v51 = vpop.permute.xlu1 %3881  ;;  %v5031_v29 = vunpack.i.h.bf16 %v4905_v0  ;;  %v5034_v62 = vunpack.i.l.bf16 %v4905_v0 }
 0x3ae   : > { %v5023_v11 = vunpack.i.h.bf16 %v4907_v51  ;;  %v5028_v21 = vunpack.i.l.bf16 %v4907_v51 }
 0x3b0   : > { %v4909_v55 = vpop.permute.xlu0 %3886  ;;  %5629 = vst [vmem:[#allocation18_spill] sm:$0xff] %v5028_v21 }
 0x3b1   : > { %v4911_v50 = vpop.permute.xlu1 %3891  ;;  %v5037_v13 = vunpack.i.h.bf16 %v4909_v55  ;;  %v5042_v57 = vunpack.i.l.bf16 %v4909_v55 }
 0x3b2   : > { %v5636_v21 = vunpack.i.l.bf16 %v4911_v50 }
 0x3b3   : > { %5630 = vst [vmem:[#allocation19_spill] sm:$0xff] %v5037_v13  ;;  %5631 = vst [vmem:[#allocation20_spill] sm:$0xff] %v5042_v57 }
 0x3b4   : > { %v4913_v1 = vpop.permute.xlu0 %3896 }
 0x3b5   : > { %v4915_v40 = vpop.permute.xlu1 %3901 }
 0x3b8   : > { %v4917_v34 = vpop.permute.xlu0 %3906 }
 0x3b9   : > { %v4919_v8 = vpop.permute.xlu1 %3911 }
 0x3bc   : > { %v4921_v44 = vpop.permute.xlu0 %3916 }
 0x3bd   : > { %5616 = vst [vmem:[#allocation5_spill] sm:$0xff] %v4921_v44  ;;  %v4923_v16 = vpop.permute.xlu1 %3921 }
 0x3be   : > { %5617 = vst [vmem:[#allocation6_spill] sm:$0xff] %v4923_v16 }
 0x3c0   : > { %v4925_v42 = vpop.permute.xlu0 %3926 }
 0x3c1   : > { %5618 = vst [vmem:[#allocation7_spill] sm:$0xff] %v4925_v42  ;;  %v4927_v23 = vpop.permute.xlu1 %3931  ;;  %v5112_v42 = vld [vmem:[%s5551_s7] ss:$0 sm:$0xff] }
 0x3c4   : > { %v4929_v24 = vpop.permute.xlu0 %3936 }
 0x3c5   : > { %v4931_v9 = vpop.permute.xlu1 %3941 }
 0x3c8   : > { %v4933_v52 = vpop.permute.xlu0 %3946 }
 0x3c9   : > { %v4935_v63 = vpop.permute.xlu1 %3951 }
 0x3cc   : > { %v4937_v3 = vpop.permute.xlu0 %3956 }
 0x3cd   : > { %5619 = vst [vmem:[#allocation8_spill] sm:$0xff] %v4937_v3  ;;  %v4939_v35 = vpop.permute.xlu1 %3961 }
 0x3ce   : > { %5620 = vst [vmem:[#allocation9_spill] sm:$0xff] %v4939_v35 }
 0x3d0   : > { %v4941_v20 = vpop.permute.xlu0 %3966 }
 0x3d1   : > { %5621 = vst [vmem:[#allocation10_spill] sm:$0xff] %v4941_v20  ;;  %v4943_v43 = vpop.permute.xlu1 %3971 }
 0x3d4   : > { %v4948_v37 = vpop.permute.xlu0 %3976 }
 0x3d5   : > { %v4956_v60 = vpop.permute.xlu1 %3981 }
 0x3d8   : > { %v4966_v27 = vpop.permute.xlu0 %3986 }
 0x3d9   : > { %v4989_v12 = vpop.permute.xlu1 %3991 }
 0x3dc   : > { %v4995_v22 = vpop.permute.xlu0 %3996 }
 0x3dd   : > { %5626 = vst [vmem:[#allocation15_spill] sm:$0xff] %v4995_v22  ;;  %v5012_v30 = vpop.permute.xlu1 %4001 }
 0x3de   : > { %5627 = vst [vmem:[#allocation16_spill] sm:$0xff] %v5012_v30 }
 0x3e0   : > { %v5025_v15 = vpop.permute.xlu0 %4006 }
 0x3e1   : > { %5628 = vst [vmem:[#allocation17_spill] sm:$0xff] %v5025_v15  ;;  %v5049_v4 = vpop.permute.xlu1 %4011 }
 0x3e2   : > { %v4014_v49 = vunpack.i.h.bf16 %v5049_v4  ;;  %v4013_v6 = vunpack.i.l.bf16 %v5049_v4 }
 0x3e4   : > { %v5055_v57 = vpop.permute.xlu0 %4016 }
 0x3e5   : > { %v5069_v44 = vpop.permute.xlu1 %4021 }
 0x3e8   : > { %v5075_v13 = vpop.permute.xlu0 %4026 }
 0x3e9   : > { %v5089_v16 = vpop.permute.xlu1 %4031 }
 0x3ec   : > { %v5095_v0 = vpop.permute.xlu0 %4036 }
 0x3ed   : > { %5632 = vst [vmem:[#allocation21_spill] sm:$0xff] %v5095_v0  ;;  %v5107_v35 = vpop.permute.xlu1 %4041 }
 0x3f0   : > { %v5115_v10 = vpop.permute.xlu0 %4046 }
 0x3f1   : > { %v4052_v3 = vpop.permute.xlu1 %4051 }
 0x3f4   : > { %v5130_v46 = vpop.permute.xlu0 %4056 }
 0x443   : > { %v3579_v14 = vpop.f32.mrb[18].mxu0 }
 0x444   : > { %v2342_v4 = vadd.f32 %v3579_v14, %v4950_v38  ;;  %v2175_v55 = vpop.f32.mrb[19].mxu0  ;;  %v5151_v38 = vunpack.i.h.bf16 %v5130_v46 }
 0x445   : > { %v2341_v47 = vadd.f32 %v4954_v25, %v2175_v55  ;;  %v5139_v55 = vunpack.i.h.bf16 %v4052_v3 }
 0x446   : > { %v2365_v30 = vadd.f32 %v5112_v42, %v2342_v4  ;;  %5637 = vst [vmem:[#allocation23_spill] sm:$0xff] %v5151_v38  ;;  %v5640_v38 = vunpack.i.h.bf16 %v4887_v26 }
 0x447   : > { %v2364_v20 = vadd.f32 %v5112_v42, %v2341_v47  ;;  %v3582_v22 = vpop.f32.mrb[20].mxu0  ;;  %v5633_v47 = vunpack.i.h.bf16 %v4911_v50  ;;  %5634 = vst [vmem:[#allocation22_spill] sm:$0xff] %v5139_v55  ;;  %v5639_v50 = vunpack.i.h.bf16 %v4943_v43 }
 0x448   : > { %v2381_v51 = vmax.f32 %v2365_v30, 0.0  ;;  %v2344_v15 = vadd.f32 %v3582_v22, %v4960_v56  ;;  %v2185_v4 = vpop.f32.mrb[21].mxu0  ;;  %v5141_v30 = vunpack.i.l.bf16 %v4052_v3  ;;  %v5635_v56 = vunpack.i.h.bf16 %v4927_v23 }
 0x449   : > { %v2380_v14 = vmax.f32 %v2364_v20, 0.0  ;;  %v2343_v0 = vadd.f32 %v4952_v58, %v2185_v4 }
 0x44a   : > { %v2701_v5 = vsel %vm1064_vm2, %v2381_v51, %v5633_v47  ;;  %v2367_v25 = vadd.f32 %v5112_v42, %v2344_v15  ;;  %v5638_v51 = vunpack.i.l.bf16 %v4927_v23  ;;  %v5641_v23 = vunpack.i.l.bf16 %v4943_v43 }
 0x44b   : > { %v2718_v22 = vsel %vm2716_vm7, %v2701_v5, %v5635_v56  ;;  %v2700_v20 = vsel %vm1064_vm2, %v2380_v14, %v5636_v21  ;;  %v2366_v58 = vadd.f32 %v5112_v42, %v2343_v0  ;;  %v3585_v4 = vpop.f32.mrb[22].mxu0  ;;  %v5645_v43 = vunpack.i.l.bf16 %v4913_v1 }
 0x44c   : > { %v2735_v15 = vsel %vm2733_vm8, %v2718_v22, %v4014_v49  ;;  %v2717_v3 = vsel %vm2716_vm7, %v2700_v20, %v5638_v51  ;;  %v2383_v47 = vmax.f32 %v2367_v25, 0.0  ;;  %v2346_v55 = vadd.f32 %v3585_v4, %v4964_v31  ;;  %v2195_v5 = vpop.f32.mrb[23].mxu0 }
 0x44d   : > { %v2752_v21 = vsel %vm2750_vm9, %v2735_v15, %v5639_v50  ;;  %v2734_v0 = vsel %vm2733_vm8, %v2717_v3, %v4013_v6  ;;  %v2382_v14 = vmax.f32 %v2366_v58, 0.0  ;;  %v2345_v56 = vadd.f32 %v4958_v39, %v2195_v5 }
 0x44e   : > { %v2769_v49 = vsel %vm2767_vm10, %v2752_v21, %v5640_v38  ;;  %v2751_v25 = vsel %vm2750_vm9, %v2734_v0, %v5641_v23  ;;  %v5642_v31 = vunpack.i.h.bf16 %v4913_v1  ;;  %v2369_v20 = vadd.f32 %v5112_v42, %v2346_v55 }
 0x44f   : > { %v2786_v6 = vsel %vm2784_vm11, %v2769_v49, %v5004_v17  ;;  %v5643_v58 = vunpack.i.l.bf16 %v4887_v26  ;;  %v5644_v4 = vunpack.i.h.bf16 %v4929_v24  ;;  %v2702_v15 = vsel %vm1064_vm2, %v2382_v14, %v5645_v43  ;;  %v3588_v51 = vpop.f32.mrb[24].mxu0 }
 0x450   : > { %v2703_v22 = vsel %vm1064_vm2, %v2383_v47, %v5642_v31  ;;  %v2803_v3 = vsel %vm2801_vm12, %v2786_v6, %v5004_v17  ;;  %v5646_v47 = vunpack.i.h.bf16 %v5055_v57  ;;  %v5647_v5 = vunpack.i.l.bf16 %v4929_v24  ;;  %v2205_v21 = vpop.f32.mrb[25].mxu0 }
 0x451   : > { %v2768_v39 = vsel %vm2767_vm10, %v2751_v25, %v5643_v58  ;;  %v2720_v38 = vsel %vm2716_vm7, %v2703_v22, %v5644_v4  ;;  %v2820_v1 = vsel %vm2818_vm13, %v2803_v3, %v5004_v17  ;;  %v5648_v14 = vunpack.i.h.bf16 %v4948_v37 }
 0x452   : > { %v2785_v55 = vsel %vm2784_vm11, %v2768_v39, %v5006_v18  ;;  %v2737_v26 = vsel %vm2733_vm8, %v2720_v38, %v5646_v47  ;;  %v2719_v50 = vsel %vm2716_vm7, %v2702_v15, %v5647_v5  ;;  %v5649_v23 = vunpack.i.l.bf16 %v5055_v57 }
 0x453   : > { %v2802_v0 = vsel %vm2801_vm12, %v2785_v55, %v5006_v18  ;;  %v2754_v49 = vsel %vm2750_vm9, %v2737_v26, %v5648_v14  ;;  %v2837_v24 = vsel %vm2835_vm14, %v2820_v1, 0.0  ;;  %v5650_v22 = vunpack.i.h.bf16 %v4889_v2  ;;  %v3591_v15 = vpop.f32.mrb[26].mxu0 }
 0x454   : > { %v2736_v25 = vsel %vm2733_vm8, %v2719_v50, %v5649_v23  ;;  %v2819_v31 = vsel %vm2818_vm13, %v2802_v0, %v5006_v18  ;;  %v5651_v6 = vunpack.i.l.bf16 %v4948_v37  ;;  %v5652_v4 = vunpack.i.l.bf16 %v4889_v2  ;;  %v2215_v55 = vpop.f32.mrb[27].mxu0 }
 0x455   : > { %v2771_v17 = vsel %vm2767_vm10, %v2754_v49, %v5650_v22  ;;  %v2836_v39 = vsel %vm2835_vm14, %v2819_v31, 0.0  ;;  %v2385_v43 = vmax.f32 %v2369_v20, 0.0  ;;  %v2368_v2 = vadd.f32 %v5112_v42, %v2345_v56 }
 0x456   : > { %v2753_v58 = vsel %vm2750_vm9, %v2736_v25, %v5651_v6  ;;  %v2788_v57 = vsel %vm2784_vm11, %v2771_v17, %v5017_v33  ;;  %v3253_v37 = vpack.c.bf16 %v2837_v24, %v2836_v39  ;;  %v5654_v26 = vunpack.i.h.bf16 %v4915_v40 }
 0x457   : > { %v2770_v38 = vsel %vm2767_vm10, %v2753_v58, %v5652_v4  ;;  %v2805_v18 = vsel %vm2801_vm12, %v2788_v57, %v5017_v33  ;;  %v2348_v50 = vadd.f32 %v3588_v51, %v4970_v45  ;;  %v5655_v56 = vunpack.i.h.bf16 %v4931_v9  ;;  %v3594_v51 = vpop.f32.mrb[28].mxu0 }
 0x458   : > { %v2787_v3 = vsel %vm2784_vm11, %v2770_v38, %v5020_v61  ;;  %v2822_v20 = vsel %vm2818_vm13, %v2805_v18, %v5017_v33  ;;  %v2705_v5 = vsel %vm1064_vm2, %v2385_v43, %v5654_v26  ;;  %v2384_v49 = vmax.f32 %v2368_v2, 0.0  ;;  %3254 = vst [vmem:[%s5224_s16] sm:$0xff] %v3253_v37   ;;  %v2225_v39 = vpop.f32.mrb[29].mxu0 }
 0x459   : > { %v2804_v47 = vsel %vm2801_vm12, %v2787_v3, %v5020_v61  ;;  %v2839_v1 = vsel %vm2835_vm14, %v2822_v20, 0.0  ;;  %v2722_v14 = vsel %vm2716_vm7, %v2705_v5, %v5655_v56  ;;  %v5656_v23 = vunpack.i.h.bf16 %v5069_v44 }
 0x45a   : > { %v2821_v0 = vsel %vm2818_vm13, %v2804_v47, %v5020_v61  ;;  %v2371_v24 = vadd.f32 %v5112_v42, %v2348_v50  ;;  %v2347_v45 = vadd.f32 %v4962_v41, %v2205_v21  ;;  %v5657_v61 = vunpack.i.h.bf16 %v4956_v60 }
 0x45b   : > { %v2838_v33 = vsel %vm2835_vm14, %v2821_v0, 0.0  ;;  %v2739_v25 = vsel %vm2733_vm8, %v2722_v14, %v5656_v23  ;;  %v5658_v17 = vunpack.i.l.bf16 %v4915_v40  ;;  %v2350_v58 = vadd.f32 %v3591_v15, %v4974_v59 }
 0x45c   : > { %v3258_v31 = vpack.c.bf16 %v2839_v1, %v2838_v33  ;;  %v2756_v22 = vsel %vm2750_vm9, %v2739_v25, %v5657_v61  ;;  %v5659_v57 = vunpack.i.h.bf16 %v4891_v28  ;;  %v5660_v38 = vunpack.i.l.bf16 %v4931_v9 }
 0x45d   : > { %v2704_v6 = vsel %vm1064_vm2, %v2384_v49, %v5658_v17  ;;  %v2387_v21 = vmax.f32 %v2371_v24, 0.0  ;;  %v2370_v43 = vadd.f32 %v5112_v42, %v2347_v45  ;;  %v5661_v40 = vunpack.i.l.bf16 %v5069_v44  ;;  %v3597_v44 = vpop.f32.mrb[30].mxu0 }
 0x45e   : > { %v2773_v4 = vsel %vm2767_vm10, %v2756_v22, %v5659_v57  ;;  %v2721_v41 = vsel %vm2716_vm7, %v2704_v6, %v5660_v38  ;;  %v2373_v59 = vadd.f32 %v5112_v42, %v2350_v58  ;;  %v2349_v15 = vadd.f32 %v4968_v19, %v2215_v55  ;;  %3306 = vst [vmem:[%s5224_s16 + $0x8] sm:$0xff] %v3258_v31   ;;  %v2235_v0 = vpop.f32.mrb[31].mxu0 }
 0x45f   : > { %v2790_v37 = vsel %vm2784_vm11, %v2773_v4, %v5010_v7  ;;  %v2738_v18 = vsel %vm2733_vm8, %v2721_v41, %v5661_v40  ;;  %v5662_v3 = vunpack.i.l.bf16 %v4956_v60  ;;  %v5663_v20 = vunpack.i.h.bf16 %v4917_v34  ;;  %v3600_v38 = vpop.f32.mrb[32].mxu0 }
 0x460   : > { %v2807_v9 = vsel %vm2801_vm12, %v2790_v37, %v5010_v7  ;;  %v2386_v26 = vmax.f32 %v2370_v43, 0.0  ;;  %v5664_v50 = vunpack.i.l.bf16 %v4891_v28  ;;  %v5665_v55 = vunpack.i.h.bf16 %v4933_v52  ;;  %v2245_v40 = vpop.f32.mrb[33].mxu0 }
 0x461   : > { %v2755_v2 = vsel %vm2750_vm9, %v2738_v18, %v5662_v3  ;;  %v2707_v47 = vsel %vm1064_vm2, %v2387_v21, %v5663_v20  ;;  %v2824_v5 = vsel %vm2818_vm13, %v2807_v9, %v5010_v7  ;;  %v2389_v60 = vmax.f32 %v2373_v59, 0.0 }
 0x462   : > { %v2772_v19 = vsel %vm2767_vm10, %v2755_v2, %v5664_v50  ;;  %v2724_v1 = vsel %vm2716_vm7, %v2707_v47, %v5665_v55  ;;  %v2841_v56 = vsel %vm2835_vm14, %v2824_v5, 0.0  ;;  %v5666_v49 = vunpack.i.h.bf16 %v5075_v13 }
 0x463   : > { %v2789_v14 = vsel %vm2784_vm11, %v2772_v19, %v5014_v32  ;;  %v5667_v7 = vunpack.i.l.bf16 %v4917_v34  ;;  %v5668_v25 = vunpack.i.h.bf16 %v4966_v27  ;;  %v5669_v45 = vunpack.i.l.bf16 %v4933_v52 }
 0x464   : > { %v2741_v33 = vsel %vm2733_vm8, %v2724_v1, %v5666_v49  ;;  %v2806_v23 = vsel %vm2801_vm12, %v2789_v14, %v5014_v32  ;;  %v5670_v61 = vunpack.i.h.bf16 %v4919_v8  ;;  %v5671_v17 = vunpack.i.h.bf16 %v4893_v48 }
 0x465   : > { %v2706_v28 = vsel %vm1064_vm2, %v2386_v26, %v5667_v7  ;;  %v2758_v24 = vsel %vm2750_vm9, %v2741_v33, %v5668_v25  ;;  %v2823_v34 = vsel %vm2818_vm13, %v2806_v23, %v5014_v32  ;;  %v5672_v58 = vunpack.i.l.bf16 %v5075_v13  ;;  %v5679_v7 = vld [vmem:[#allocation13_spill] sm:$0xff] }
 0x466   : > { %v2723_v31 = vsel %vm2716_vm7, %v2706_v28, %v5669_v45  ;;  %v2709_v22 = vsel %vm1064_vm2, %v2389_v60, %v5670_v61  ;;  %v2775_v6 = vsel %vm2767_vm10, %v2758_v24, %v5671_v17  ;;  %v5673_v4 = vunpack.i.h.bf16 %v4935_v63  ;;  %v5682_v45 = vld [vmem:[#allocation11_spill] sm:$0xff]  ;;  %v5685_v17 = vld [vmem:[#allocation12_spill] sm:$0xff] }
 0x467   : > { %v2740_v57 = vsel %vm2733_vm8, %v2723_v31, %v5672_v58  ;;  %v2840_v41 = vsel %vm2835_vm14, %v2823_v34, 0.0  ;;  %v2792_v21 = vsel %vm2784_vm11, %v2775_v6, %v5031_v29  ;;  %v5674_v32 = vunpack.i.l.bf16 %v4966_v27  ;;  %v5684_v34 = vld [vmem:[#allocation14_spill] sm:$0xff] }
 0x468   : > { %v2726_v52 = vsel %vm2716_vm7, %v2709_v22, %v5673_v4  ;;  %v5675_v37 = vunpack.i.h.bf16 %v5089_v16  ;;  %v3263_v18 = vpack.c.bf16 %v2841_v56, %v2840_v41  ;;  %v2809_v59 = vsel %vm2801_vm12, %v2792_v21, %v5031_v29 }
 0x469   : > { %v2757_v43 = vsel %vm2750_vm9, %v2740_v57, %v5674_v32  ;;  %v5676_v9 = vunpack.i.l.bf16 %v4893_v48  ;;  %v5677_v2 = vunpack.i.h.bf16 %v4989_v12  ;;  %v2826_v20 = vsel %vm2818_vm13, %v2809_v59, %v5031_v29  ;;  %v5687_v57 = vld [vmem:[#allocation5_spill] sm:$0xff]  ;;  %v5690_v32 = vld [vmem:[#allocation8_spill] sm:$0xff] }
 0x46a   : > { %v2743_v13 = vsel %vm2733_vm8, %v2726_v52, %v5675_v37  ;;  %v5678_v26 = vunpack.i.h.bf16 %v4895_v36  ;;  %v2372_v50 = vadd.f32 %v5112_v42, %v2349_v15  ;;  %v2843_v48 = vsel %vm2835_vm14, %v2826_v20, 0.0  ;;  %3307 = vst [vmem:[%s5224_s16 + $0x10] sm:$0xff] %v3263_v18   ;;  %v5694_v59 = vld [vmem:[#allocation21_spill] sm:$0xff] }
 0x46b   : > { %v2774_v3 = vsel %vm2767_vm10, %v2757_v43, %v5676_v9  ;;  %v2760_v27 = vsel %vm2750_vm9, %v2743_v13, %v5677_v2  ;;  %v2352_v1 = vadd.f32 %v3594_v51, %v4978_v54  ;;  %v2351_v15 = vadd.f32 %v4972_v53, %v2225_v39 }
 0x46c   : > { %v2791_v47 = vsel %vm2784_vm11, %v2774_v3, %v5034_v62  ;;  %v2777_v5 = vsel %vm2767_vm10, %v2760_v27, %v5678_v26  ;;  %v2388_v56 = vmax.f32 %v2372_v50, 0.0  ;;  %v2354_v54 = vadd.f32 %v3597_v44, %v5679_v7  ;;  %v5697_v27 = vld [vmem:[#allocation6_spill] sm:$0xff] }
 0x46d   : > { %v2808_v19 = vsel %vm2801_vm12, %v2791_v47, %v5034_v62  ;;  %v2794_v55 = vsel %vm2784_vm11, %v2777_v5, %v5023_v11  ;;  %v2375_v33 = vadd.f32 %v5112_v42, %v2352_v1  ;;  %v2374_v25 = vadd.f32 %v5112_v42, %v2351_v15  ;;  %v5699_v5 = vld [vmem:[#allocation15_spill] sm:$0xff]  ;;  %v5702_v1 = vld [vmem:[#allocation9_spill] sm:$0xff]  ;;  %v5704_v15 = vld [vmem:[#allocation2_spill] sm:$0xff] }
 0x46e   : > { %v2825_v29 = vsel %vm2818_vm13, %v2808_v19, %v5034_v62  ;;  %v2811_v60 = vsel %vm2801_vm12, %v2794_v55, %v5023_v11  ;;  %v5680_v62 = vunpack.i.l.bf16 %v4919_v8  ;;  %v5681_v53 = vunpack.i.l.bf16 %v4935_v63 }
 0x46f   : > { %v2842_v14 = vsel %vm2835_vm14, %v2825_v29, 0.0  ;;  %v2828_v49 = vsel %vm2818_vm13, %v2811_v60, %v5023_v11  ;;  %v2391_v24 = vmax.f32 %v2375_v33, 0.0  ;;  %v2377_v11 = vadd.f32 %v5112_v42, %v2354_v54 }
 0x470   : > { %v3268_v51 = vpack.c.bf16 %v2843_v48, %v2842_v14  ;;  %v2845_v28 = vsel %vm2835_vm14, %v2828_v49, 0.0  ;;  %v2708_v23 = vsel %vm1064_vm2, %v2388_v56, %v5680_v62  ;;  %v2353_v31 = vadd.f32 %v5682_v45, %v2235_v0  ;;  %v5707_v62 = vld [vmem:[#allocation19_spill] sm:$0xff]  ;;  %v5709_v45 = vld [vmem:[#allocation20_spill] sm:$0xff] }
 0x471   : > { %v2725_v39 = vsel %vm2716_vm7, %v2708_v23, %v5681_v53  ;;  %v5683_v44 = vunpack.i.l.bf16 %v5089_v16  ;;  %v2390_v22 = vmax.f32 %v2374_v25, 0.0  ;;  %v2356_v8 = vadd.f32 %v3600_v38, %v5684_v34 }
 0x472   : > { %v2355_v6 = vadd.f32 %v5685_v17, %v2245_v40  ;;  %3308 = vst [vmem:[%s5224_s16 + $0x18] sm:$0xff] %v3268_v51   ;;  %v5686_v58 = vunpack.i.l.bf16 %v4989_v12  ;;  %v5688_v4 = vunpack.i.h.bf16 %v5687_v57  ;;  %v2393_v41 = vmax.f32 %v2377_v11, 0.0  ;;  %v5693_v40 = vld [vmem:[#allocation18_spill] sm:$0xff]  ;;  %v5712_v17 = vld [vmem:[#allocation7_spill] sm:$0xff] }
 0x473   : > { %v2742_v61 = vsel %vm2733_vm8, %v2725_v39, %v5683_v44  ;;  %v2376_v0 = vadd.f32 %v5112_v42, %v2353_v31  ;;  %v5689_v16 = vunpack.i.l.bf16 %v4895_v36  ;;  %v5691_v38 = vunpack.i.h.bf16 %v5690_v32 }
 0x474   : > { %v2759_v63 = vsel %vm2750_vm9, %v2742_v61, %v5686_v58  ;;  %v2711_v52 = vsel %vm1064_vm2, %v2391_v24, %v5688_v4  ;;  %v5692_v37 = vunpack.i.l.bf16 %v5687_v57  ;;  %v2379_v13 = vadd.f32 %v5112_v42, %v2356_v8 }
 0x475   : > { %v2776_v21 = vsel %vm2767_vm10, %v2759_v63, %v5689_v16  ;;  %v2728_v43 = vsel %vm2716_vm7, %v2711_v52, %v5691_v38  ;;  %v5695_v9 = vunpack.i.h.bf16 %v5694_v59  ;;  %v5696_v36 = vunpack.i.l.bf16 %v5690_v32  ;;  %v5714_v52 = vld [vmem:[#allocation10_spill] sm:$0xff] }
 0x476   : > { %v2710_v12 = vsel %vm1064_vm2, %v2390_v22, %v5692_v37  ;;  %v2793_v18 = vsel %vm2784_vm11, %v2776_v21, %v5693_v40  ;;  %v5698_v20 = vunpack.i.h.bf16 %v5697_v27  ;;  %v5700_v50 = vunpack.i.h.bf16 %v5699_v5 }
 0x477   : > { %v2745_v3 = vsel %vm2733_vm8, %v2728_v43, %v5695_v9  ;;  %v2727_v2 = vsel %vm2716_vm7, %v2710_v12, %v5696_v36  ;;  %v2810_v26 = vsel %vm2801_vm12, %v2793_v18, %v5693_v40  ;;  %v5701_v19 = vunpack.i.l.bf16 %v5694_v59  ;;  %v5719_v59 = vld [vmem:[#allocation16_spill] sm:$0xff]  ;;  %v5722_v36 = vld [vmem:[#allocation3_spill] sm:$0xff] }
 0x478   : > { %v2713_v47 = vsel %vm1064_vm2, %v2393_v41, %v5698_v20  ;;  %v2762_v48 = vsel %vm2750_vm9, %v2745_v3, %v5700_v50  ;;  %v5703_v29 = vunpack.i.h.bf16 %v5702_v1  ;;  %v2827_v56 = vsel %vm2818_vm13, %v2810_v26, %v5693_v40  ;;  %v5725_v26 = vld [vmem:[#allocation17_spill] sm:$0xff] }
 0x479   : > { %v2744_v55 = vsel %vm2733_vm8, %v2727_v2, %v5701_v19  ;;  %v5705_v14 = vunpack.i.h.bf16 %v5704_v15  ;;  %v5706_v33 = vunpack.i.l.bf16 %v5699_v5  ;;  %v2392_v54 = vmax.f32 %v2376_v0, 0.0 }
 0x47a   : > { %v2730_v60 = vsel %vm2716_vm7, %v2713_v47, %v5703_v29  ;;  %v2844_v51 = vsel %vm2835_vm14, %v2827_v56, 0.0  ;;  %v5708_v25 = vunpack.i.l.bf16 %v5704_v15  ;;  %v2395_v39 = vmax.f32 %v2379_v13, 0.0 }
 0x47b   : > { %v2779_v49 = vsel %vm2767_vm10, %v2762_v48, %v5705_v14  ;;  %v2761_v7 = vsel %vm2750_vm9, %v2744_v55, %v5706_v33  ;;  %v3273_v24 = vpack.c.bf16 %v2845_v28, %v2844_v51  ;;  %v5710_v44 = vunpack.i.l.bf16 %v5697_v27 }
 0x47c   : > { %v2796_v23 = vsel %vm2784_vm11, %v2779_v49, %v5707_v62  ;;  %v2778_v53 = vsel %vm2767_vm10, %v2761_v7, %v5708_v25  ;;  %v5711_v8 = vunpack.i.l.bf16 %v5702_v1  ;;  %v5713_v58 = vunpack.i.h.bf16 %v5712_v17  ;;  %v5728_v1 = vld [vmem:[#allocation22_spill] sm:$0xff]  ;;  %v5732_v7 = vld [vmem:[#allocation23_spill] sm:$0xff] }
 0x47d   : > { %v2813_v11 = vsel %vm2801_vm12, %v2796_v23, %v5707_v62  ;;  %v2795_v31 = vsel %vm2784_vm11, %v2778_v53, %v5709_v45  ;;  %v2712_v61 = vsel %vm1064_vm2, %v2392_v54, %v5710_v44  ;;  %v5715_v41 = vunpack.i.h.bf16 %v5714_v52  ;;  %3309 = vst [vmem:[%s5224_s16 + $0x20] sm:$0xff] %v3273_v24  }
 0x47e   : > { %v2830_v22 = vsel %vm2818_vm13, %v2813_v11, %v5707_v62  ;;  %v2812_v34 = vsel %vm2801_vm12, %v2795_v31, %v5709_v45  ;;  %v2729_v28 = vsel %vm2716_vm7, %v2712_v61, %v5711_v8  ;;  %v2715_v63 = vsel %vm1064_vm2, %v2395_v39, %v5713_v58 }
 0x47f   : > { %v2847_v57 = vsel %vm2835_vm14, %v2830_v22, 0.0  ;;  %v2829_v4 = vsel %vm2818_vm13, %v2812_v34, %v5709_v45  ;;  %v2732_v0 = vsel %vm2716_vm7, %v2715_v63, %v5715_v41  ;;  %v2378_v16 = vadd.f32 %v5112_v42, %v2355_v6 }
 0x480   : > { %v2846_v21 = vsel %vm2835_vm14, %v2829_v4, 0.0  ;;  %v5716_v32 = vunpack.i.l.bf16 %v5107_v35  ;;  %v5717_v43 = vunpack.i.h.bf16 %v5107_v35  ;;  %v5718_v12 = vunpack.i.h.bf16 %v5115_v10 }
 0x481   : > { %v3278_v40 = vpack.c.bf16 %v2847_v57, %v2846_v21  ;;  %v2394_v18 = vmax.f32 %v2378_v16, 0.0  ;;  %v5720_v42 = vunpack.i.l.bf16 %v5719_v59  ;;  %v5721_v9 = vunpack.i.h.bf16 %v5719_v59 }
 0x482   : > { %v2746_v38 = vsel %vm2733_vm8, %v2729_v28, %v5716_v32  ;;  %v2747_v37 = vsel %vm2733_vm8, %v2730_v60, %v5717_v43  ;;  %v2749_v13 = vsel %vm2733_vm8, %v2732_v0, %v5718_v12  ;;  %v5723_v2 = vunpack.i.l.bf16 %v5722_v36  ;;  %v5729_v60 = vld [vmem:[#allocation4_spill] sm:$0xff] }
 0x483   : > { %v2763_v6 = vsel %vm2750_vm9, %v2746_v38, %v5720_v42  ;;  %v2764_v3 = vsel %vm2750_vm9, %v2747_v37, %v5721_v9  ;;  %v5724_v27 = vunpack.i.h.bf16 %v5722_v36  ;;  %v4058_v47 = vunpack.i.l.bf16 %v5130_v46  ;;  %3310 = vst [vmem:[%s5224_s16 + $0x28] sm:$0xff] %v3278_v40  }
 0x484   : > { %v2780_v35 = vsel %vm2767_vm10, %v2763_v6, %v5723_v2  ;;  %v5726_v5 = vunpack.i.h.bf16 %v5725_v26  ;;  %v5727_v48 = vunpack.i.l.bf16 %v5712_v17  ;;  %v5730_v56 = vunpack.i.h.bf16 %v5729_v60 }
 0x485   : > { %v2781_v20 = vsel %vm2767_vm10, %v2764_v3, %v5724_v27  ;;  %v2797_v55 = vsel %vm2784_vm11, %v2780_v35, %v5141_v30  ;;  %v5731_v46 = vunpack.i.l.bf16 %v5714_v52  ;;  %v5733_v23 = vunpack.i.l.bf16 %v5115_v10 }
 0x486   : > { %v2766_v50 = vsel %vm2750_vm9, %v2749_v13, %v5726_v5  ;;  %v2714_v19 = vsel %vm1064_vm2, %v2394_v18, %v5727_v48  ;;  %v2798_v29 = vsel %vm2784_vm11, %v2781_v20, %v5728_v1  ;;  %v2814_v49 = vsel %vm2801_vm12, %v2797_v55, %v5141_v30 }
 0x487   : > { %v2783_v15 = vsel %vm2767_vm10, %v2766_v50, %v5730_v56  ;;  %v2731_v14 = vsel %vm2716_vm7, %v2714_v19, %v5731_v46  ;;  %v2815_v33 = vsel %vm2801_vm12, %v2798_v29, %v5728_v1  ;;  %v2831_v51 = vsel %vm2818_vm13, %v2814_v49, %v5141_v30 }
 0x488   : > { %v2800_v54 = vsel %vm2784_vm11, %v2783_v15, %v5732_v7  ;;  %v2832_v62 = vsel %vm2818_vm13, %v2815_v33, %v5728_v1  ;;  %v2748_v25 = vsel %vm2733_vm8, %v2731_v14, %v5733_v23  ;;  %v2848_v39 = vsel %vm2835_vm14, %v2831_v51, 0.0 }
 0x489   : > { %v2817_v53 = vsel %vm2801_vm12, %v2800_v54, %v5732_v7  ;;  %v2849_v24 = vsel %vm2835_vm14, %v2832_v62, 0.0  ;;  %v5734_v11 = vunpack.i.l.bf16 %v5725_v26  ;;  %v5735_v10 = vunpack.i.l.bf16 %v5729_v60 }
 0x48a   : > { %v2834_v30 = vsel %vm2818_vm13, %v2817_v53, %v5732_v7  ;;  %v3283_v31 = vpack.c.bf16 %v2849_v24, %v2848_v39 }
 0x48b   : > { %v2765_v45 = vsel %vm2750_vm9, %v2748_v25, %v5734_v11  ;;  %v2851_v34 = vsel %vm2835_vm14, %v2834_v30, 0.0 }
 0x48c   : > { %v2782_v44 = vsel %vm2767_vm10, %v2765_v45, %v5735_v10  ;;  %3311 = vst [vmem:[%s5224_s16 + $0x30] sm:$0xff] %v3283_v31  }
 0x48d   : > { %v2799_v61 = vsel %vm2784_vm11, %v2782_v44, %v4058_v47 }
 0x48e   : > { %v2816_v22 = vsel %vm2801_vm12, %v2799_v61, %v4058_v47 }
 0x48f   : > { %v2833_v8 = vsel %vm2818_vm13, %v2816_v22, %v4058_v47 }
 0x490   : > { %v2850_v28 = vsel %vm2835_vm14, %v2833_v8, 0.0 }
 0x491   : > { %v3288_v17 = vpack.c.bf16 %v2851_v34, %v2850_v28 }
 0x493   : > { %3312 = vst [vmem:[%s5224_s16 + $0x38] sm:$0xff] %v3288_v17  }
 0x494 PF: > { %s25_s22 = sadd.s32 1, %s4098_s22   ;;  %s5736_s18 = smov %s4090_s20 }
 0x495   : > { %p22_p7 = scmp.ge.s32.totalorder %s25_s22, 6   ;;  %s5737_s19 = smov %s4094_s21 }
 0x496   : > { %s5738_s20 = smov %s5741_s23  ;;  %s5739_s21 = smov %s5745_s24 }
 0x497   :  { %24 = sbr.rel (!%p22_p7) target bundleno = 3 (0x3), region = 113 }

// kernel: ctrnetpp_forward.5
= control target key start
LH: loop header
LB: loop body
LE: loop exit
PB: predicated region body
PF: predicated region fallthrough
CT: control target
= control target key end

     0   :  { %s3613_s17 = smov 0   ;;  %s3615_s18 = smov 0   ;;  %s4716_s0 = inlined_call_operand.vmem [shape: bf16[512,128], index: 0, kind: input, shape index: {}]   ;;  %s4717_s1 = inlined_call_operand.vmem [shape: bf16[256,32], index: 1, kind: input, shape index: {}]   ;;  %s4718_s2 = inlined_call_operand.vmem [shape: f32[96,32], index: 2, kind: input, shape index: {}]   ;;  %s4719_s3 = inlined_call_operand.vmem [shape: f32[1,32], index: 3, kind: input, shape index: {}]   ;;  %s4720_s4 = inlined_call_operand.vmem [shape: f32[32,3], index: 4, kind: input, shape index: {}]   ;;  %s4721_s5 = inlined_call_operand.vmem [shape: f32[1,3], index: 5, kind: input, shape index: {}]   ;;  %s4722_s6 = inlined_call_operand.vmem [shape: f32[32,3], index: 6, kind: input, shape index: {}]   ;;  %s4723_s7 = inlined_call_operand.vmem [shape: f32[3,3], index: 7, kind: input, shape index: {}]   ;;  %s4724_s8 = inlined_call_operand.vmem [shape: f32[1,3], index: 8, kind: input, shape index: {}]   ;;  %s4725_s9 = inlined_call_operand.vmem [shape: f32[18,96], index: 9, kind: input, shape index: {}]   ;;  %s4726_s10 = inlined_call_operand.vmem [shape: f32[1,96], index: 10, kind: input, shape index: {}]   ;;  %s4727_s11 = inlined_call_operand.vmem [shape: bf16[512,128], index: 11, kind: output, shape index: {}]  }
   0x1   :  { %s3617_s19 = smov 0   ;;  %s3619_s20 = smov 0  }
   0x2   :  { %s3621_s21 = smov 0  }
   0x3 LB: > { %s30_s22 = sadd.s32 1, %s3533_s19  ;;  %s33_s23 = sadd.s32 1, %s3537_s20  ;;  %s3541_s21 = sphi %s3621_s21, %s21_s21   ;;  %s3537_s20 = sphi %s3619_s20, %s4803_s20   ;;  %s3533_s19 = sphi %s3617_s19, %s4802_s19   ;;  %s3529_s18 = sphi %s3615_s18, %s4801_s18   ;;  %s3525_s17 = sphi %s3613_s17, %s4800_s17  }
   0x4   : > { %p31_p0 = scmp.ge.s32.totalorder %s30_s22, 2  ;;  %p2600_p1 = scmp.ge.s32.totalorder %s3541_s21, 1 }
   0x5   : > { %p381_p2 = scmp.lt.s32.totalorder %s3541_s21, 5 }
   0x6   : > { %s4805_s22 = smov (%p31_p0, %s30_s22), 0  ;;  %s4807_s23 = smov (!%p31_p0, %s33_s23), %s3537_s20 }
   0x7   : > { %p382_p3 = pnand %p2600_p1, %p381_p2  ;;  %p35_p4 = scmp.ge.s32.totalorder %s4807_s23, 2 }
   0x9   : > { %s4809_s23 = smov (%p35_p4, %s4807_s23), 0  ;;  %385 = sbr.rel (%p382_p3) target bundleno = 1360 (0x550), region = 64 }
  0x10   : > { %v510_v0 = vld [vmem:[%s4718_s2] sm:$0xff]  ;;  %v511_v1 = vld [vmem:[%s4718_s2 + $0x8] sm:$0xff]  ;;  %v512_v2 = vld [vmem:[%s4718_s2 + $0x10] sm:$0xff]  ;;  %s2601_s30 = sshll.u32 %s3529_s18, 1  ;;  %vm522_vm0 = vcmask 785408   ;;  %vm1030_vm1 = vcmask 1042432  }
  0x11   : > { %v3107_v3 = vpack.c.bf16 %v511_v1, %v510_v0  ;;  %v513_v4 = vld [vmem:[%s4718_s2 + $0x18] sm:$0xff]  ;;  %s3655_s14 = sadd.s32 %s3525_s17, %s2601_s30  ;;  %v514_v6 = vld [vmem:[%s4718_s2 + $0x20] sm:$0xff]  ;;  %v515_v7 = vld [vmem:[%s4718_s2 + $0x28] sm:$0xff]  ;;  %vm782_vm2 = vcmask 261120   ;;  %s3544_s17 = smov 28   ;;  %vm981_vm3 = vcmask 23552  }
  0x12   : > { %v3111_v5 = vpack.c.bf16 %v513_v4, %v512_v2  ;;  %s2602_s26 = sshll.u32 %s3655_s14, 4  ;;  %v771_v8 = vld [vmem:[%s4720_s4] sm:$0xff]  ;;  %v772_v9 = vld [vmem:[%s4720_s4 + $0x8] sm:$0xff]  ;;  %v773_v10 = vld [vmem:[%s4720_s4 + $0x10] sm:$0xff]  ;;  %v3115_v11 = vpack.c.bf16 %v515_v7, %v514_v6  ;;  %s3547_s30 = smov 34   ;;  %vm2082_vm4 = vcmask 1041408  }
  0x13   : > { %3108 = vmatprep.subr.bf16.mxu0 %v3107_v3  ;;  %p435_p5 = scmp.lt.s32.totalorder %s2602_s26, 63  ;;  %v3131_v12 = vpack.c.bf16 %v772_v9, %v771_v8  ;;  %v774_v13 = vld [vmem:[%s4720_s4 + $0x18] sm:$0xff]  ;;  %v516_v14 = vld [vmem:[%s4718_s2 + $0x30] sm:$0xff]  ;;  %v518_v19 = vld [vmem:[%s4718_s2 + $0x40] sm:$0xff]  ;;  %s3548_s12 = smov 3   ;;  %vm1955_vm5 = vcmask 48128  }
  0x14   : > { %3110 = vmatpush3.bf16.msra.mxu0 %v3107_v3  ;;  %v517_v15 = vld [vmem:[%s4718_s2 + $0x38] sm:$0xff]  ;;  %v3135_v16 = vpack.c.bf16 %v774_v13, %v773_v10  ;;  %v519_v20 = vld [vmem:[%s4718_s2 + $0x48] sm:$0xff]  ;;  %v520_v23 = vld [vmem:[%s4718_s2 + $0x50] sm:$0xff]  ;;  %s3550_s25 = smov 26   ;;  %s3551_s27 = smov 32   ;;  %vm1972_vm6 = vcmask 72704  }
  0x15   : > { %3112 = vmatprep.subr.bf16.mxu0 %v3111_v5  ;;  %s4811_s26 = smov (!%p435_p5, %s2602_s26), 63  ;;  %3151 = vmatprep.subr.bf16.mxu1 %v3131_v12  ;;  %v3119_v17 = vpack.c.bf16 %v517_v15, %v516_v14  ;;  %v3123_v22 = vpack.c.bf16 %v519_v20, %v518_v19  ;;  %v521_v24 = vld [vmem:[%s4718_s2 + $0x58] sm:$0xff]  ;;  %v980_v48 = vld [vmem:[%s4723_s7] sm:$0x7]  ;;  %vm1989_vm7 = vcmask 97280   ;;  %vm2006_vm8 = vcmask 121856  }
  0x16   : > { %s2603_s18 = sshll.u32 %s4811_s26, 2  ;;  %3153 = vmatpush3.bf16.msra.mxu1 %v3131_v12  ;;  %v3127_v25 = vpack.c.bf16 %v521_v24, %v520_v23  ;;  %v3790_v53 = vld [vmem:[%s4719_s3] ss:$0 sm:$0xff]  ;;  %vm2033_vm9 = vcmask 146432   ;;  %vm2407_vm10 = vcmask 859136  }
  0x17   : > { %s3690_s28 = scalar_lea.vmem %s4716_s0, %s2603_s18  ;;  %3152 = vmatprep.subr.bf16.mxu1 %v3135_v16  ;;  %s4597_s15 = scalar_lea.vmem %s4727_s11, %s2603_s18 }
  0x18   : > { %3114 = vmatpush3.bf16.msra.mxu0 %v3111_v5  ;;  %v2731_v18 = vld [vmem:[%s3690_s28] sm:$0xff]   ;;  %v2818_v26 = vld [vmem:[%s3690_s28 + $0x8] sm:$0xff]   ;;  %v2819_v29 = vld [vmem:[%s3690_s28 + $0x10] sm:$0xff]  }
  0x19   : > { %3116 = vmatprep.subr.bf16.mxu0 %v3115_v11  ;;  %v3699_v21 = vunpack.c.l.bf16 %v2731_v18  ;;  %v3710_v27 = vunpack.c.h.bf16 %v2731_v18  ;;  %v3712_v28 = vunpack.c.l.bf16 %v2818_v26  ;;  %v3717_v30 = vunpack.c.h.bf16 %v2818_v26  ;;  %v2820_v32 = vld [vmem:[%s3690_s28 + $0x18] sm:$0xff]   ;;  %v2821_v35 = vld [vmem:[%s3690_s28 + $0x20] sm:$0xff]   ;;  %v2822_v38 = vld [vmem:[%s3690_s28 + $0x28] sm:$0xff]  }
  0x1a   : > { %3154 = vmatpush3.bf16.msra.mxu1 %v3135_v16  ;;  %v3721_v31 = vunpack.c.l.bf16 %v2819_v29  ;;  %v3726_v33 = vunpack.c.h.bf16 %v2819_v29  ;;  %v3730_v34 = vunpack.c.l.bf16 %v2820_v32  ;;  %v3735_v36 = vunpack.c.h.bf16 %v2820_v32  ;;  %v2823_v41 = vld [vmem:[%s3690_s28 + $0x30] sm:$0xff]   ;;  %v2824_v44 = vld [vmem:[%s3690_s28 + $0x38] sm:$0xff]   ;;  %s2605_s28 = sshll.u32 %s3655_s14, 3 }
  0x1b   : > { %2963 = vmatprep.mubr.msk.f32.mxu0 %vm522_vm0, %v3699_v21  ;;  %v3739_v37 = vunpack.c.l.bf16 %v2821_v35  ;;  %v3744_v39 = vunpack.c.h.bf16 %v2821_v35  ;;  %v3748_v40 = vunpack.c.l.bf16 %v2822_v38  ;;  %v3753_v42 = vunpack.c.h.bf16 %v2822_v38  ;;  %3019 = vmatprep.subr.msk.mxu1 %vm1030_vm1, %v980_v48  ;;  %p445_p6 = scmp.lt.s32.totalorder %s2605_s28, 31 }
  0x1c   : > { %3118 = vmatpush3.bf16.msra.mxu0 %v3115_v11  ;;  %v3757_v43 = vunpack.c.l.bf16 %v2823_v41  ;;  %v3762_v45 = vunpack.c.h.bf16 %v2823_v41  ;;  %v3766_v46 = vunpack.c.l.bf16 %v2824_v44  ;;  %v3770_v47 = vunpack.c.h.bf16 %v2824_v44 }
  0x1d   : > { %3120 = vmatprep.subr.bf16.mxu0 %v3119_v17  ;;  %s4813_s28 = smov (!%p445_p6, %s2605_s28), 31 }
  0x1e   : > { %s2606_s29 = sshll.u32 %s4813_s28, 2  ;;  %s3545_s28 = smov 38  }
  0x1f   : > { %s3784_s13 = scalar_lea.vmem %s4717_s1, %s2606_s29  ;;  %s3546_s29 = smov 44  }
  0x20   : > { %3122 = vmatpush3.bf16.msra.mxu0 %v3119_v17  ;;  %v2763_v49 = vld [vmem:[%s3784_s13] sm:$0xff]   ;;  %v2825_v57 = vld [vmem:[%s3784_s13 + $0x8] sm:$0xff]   ;;  %v2826_v11 = vld [vmem:[%s3784_s13 + $0x10] sm:$0xff]  }
  0x21   : > { %3124 = vmatprep.subr.bf16.mxu0 %v3123_v22  ;;  %v2765_v50 = vunpack.c.h.bf16 %v2763_v49  ;;  %v2764_v51 = vunpack.c.l.bf16 %v2763_v49  ;;  %v2769_v63 = vunpack.c.h.bf16 %v2825_v57  ;;  %v2768_v2 = vunpack.c.l.bf16 %v2825_v57  ;;  %v2827_v41 = vld [vmem:[%s3784_s13 + $0x18] sm:$0xff]   ;;  %s3549_s13 = smov 102  }
  0x22   : > { %v2773_v18 = vunpack.c.h.bf16 %v2826_v11  ;;  %v2776_v57 = vunpack.c.l.bf16 %v2827_v41 }
  0x24   : > { %3126 = vmatpush3.bf16.msra.mxu0 %v3123_v22  ;;  %v2772_v22 = vunpack.c.l.bf16 %v2826_v11 }
  0x25   : > { %3128 = vmatprep.subr.bf16.mxu0 %v3127_v25 }
  0x28   : > { %3130 = vmatpush3.bf16.msra.mxu0 %v3127_v25 }
  0x29   : > { %3132 = vmatprep.subr.bf16.mxu0 %v3131_v12 }
  0x2b   : > { %2964 = vmatmul.mubr.msk.f32.vlgmr.msra.gmra.mrb[0].mxu0 %vm522_vm0, %v3710_v27 }
  0x2c   : > { %2966 = vmatprep.mubr.msk.f32.mxu0 %vm522_vm0, %v3712_v28  ;;  %3134 = vmatpush3.bf16.msra.mxu0 %v3131_v12 }
  0x2d   : > { %3136 = vmatprep.subr.bf16.mxu0 %v3135_v16 }
  0x2f   : > { %2967 = vmatmul.mubr.msk.f32.gmra.mrb[2].mxu0 %vm522_vm0, %v3717_v30 }
  0x30   : > { %2969 = vmatprep.mubr.msk.f32.mxu0 %vm522_vm0, %v3721_v31  ;;  %3138 = vmatpush3.bf16.msra.mxu0 %v3135_v16 }
  0x33   : > { %2970 = vmatmul.mubr.msk.f32.gmra.mrb[4].mxu0 %vm522_vm0, %v3726_v33 }
  0x34   : > { %2972 = vmatprep.mubr.msk.f32.mxu0 %vm522_vm0, %v3730_v34 }
  0x37   : > { %2973 = vmatmul.mubr.msk.f32.gmra.mrb[6].mxu0 %vm522_vm0, %v3735_v36 }
  0x38   : > { %2975 = vmatprep.mubr.msk.f32.mxu0 %vm522_vm0, %v3739_v37 }
  0x3b   : > { %2976 = vmatmul.mubr.msk.f32.gmra.mrb[8].mxu0 %vm522_vm0, %v3744_v39 }
  0x3c   : > { %2978 = vmatprep.mubr.msk.f32.mxu0 %vm522_vm0, %v3748_v40 }
  0x3f   : > { %2979 = vmatmul.mubr.msk.f32.gmra.mrb[10].mxu0 %vm522_vm0, %v3753_v42 }
  0x40   : > { %2981 = vmatprep.mubr.msk.f32.mxu0 %vm522_vm0, %v3757_v43 }
  0x43   : > { %2982 = vmatmul.mubr.msk.f32.gmra.mrb[12].mxu0 %vm522_vm0, %v3762_v45 }
  0x44   : > { %2984 = vmatprep.mubr.msk.f32.mxu0 %vm522_vm0, %v3766_v46 }
  0x47   : > { %2985 = vmatmul.mubr.msk.f32.gmra.mrb[14].mxu0 %vm522_vm0, %v3770_v47 }
  0xfe   : > { %v2965_v52 = vpop.f32.mrb[0].mxu0 }
  0xff   : > { %v717_v54 = vadd.f32 %v2965_v52, %v2765_v50  ;;  %v637_v55 = vpop.f32.mrb[1].mxu0 }
 0x100   : > { %v716_v56 = vadd.f32 %v2764_v51, %v637_v55 }
 0x101   : > { %v3794_v58 = vadd.f32 %v3790_v53, %v717_v54 }
 0x102   : > { %v3797_v59 = vadd.f32 %v3790_v53, %v716_v56  ;;  %v2968_v60 = vpop.f32.mrb[2].mxu0 }
 0x103   : > { %v719_v61 = vadd.f32 %v2968_v60, %v2765_v50  ;;  %v647_v62 = vpop.f32.mrb[3].mxu0  ;;  %v756_v3 = vmax.f32 %v3794_v58, 0.0 }
 0x104   : > { %v755_v0 = vmax.f32 %v3797_v59, 0.0  ;;  %v718_v1 = vadd.f32 %v2764_v51, %v647_v62 }
 0x105   : > { %v3802_v4 = vadd.f32 %v3790_v53, %v719_v61 }
 0x106   : > { %v3805_v5 = vadd.f32 %v3790_v53, %v718_v1  ;;  %v2971_v6 = vpop.f32.mrb[4].mxu0  ;;  %2995 = vmatprep.mubr.msk.f32.mxu0 %vm782_vm2, %v755_v0 }
 0x107   : > { %v721_v7 = vadd.f32 %v2971_v6, %v2769_v63  ;;  %v657_v8 = vpop.f32.mrb[5].mxu0  ;;  %2996 = vmatmul.mubr.msk.f32.vlgmr.msra.gmra.mrb[16].mxu0 %vm782_vm2, %v756_v3  ;;  %v758_v12 = vmax.f32 %v3802_v4, 0.0 }
 0x108   : > { %v757_v9 = vmax.f32 %v3805_v5, 0.0  ;;  %v720_v10 = vadd.f32 %v2768_v2, %v657_v8 }
 0x109   : > { %v3817_v13 = vadd.f32 %v3790_v53, %v721_v7 }
 0x10a   : > { %v2974_v14 = vpop.f32.mrb[6].mxu0  ;;  %2998 = vmatprep.mubr.msk.f32.mxu0 %vm782_vm2, %v757_v9  ;;  %v3823_v15 = vadd.f32 %v3790_v53, %v720_v10 }
 0x10b   : > { %v723_v16 = vadd.f32 %v2974_v14, %v2769_v63  ;;  %v667_v17 = vpop.f32.mrb[7].mxu0  ;;  %2999 = vmatmul.mubr.msk.f32.gmra.mrb[18].mxu0 %vm782_vm2, %v758_v12  ;;  %v760_v23 = vmax.f32 %v3817_v13, 0.0 }
 0x10c   : > { %v722_v19 = vadd.f32 %v2768_v2, %v667_v17  ;;  %v759_v20 = vmax.f32 %v3823_v15, 0.0 }
 0x10d   : > { %v3831_v24 = vadd.f32 %v3790_v53, %v723_v16 }
 0x10e   : > { %v3834_v25 = vadd.f32 %v3790_v53, %v722_v19  ;;  %v2977_v26 = vpop.f32.mrb[8].mxu0  ;;  %3001 = vmatprep.mubr.msk.f32.mxu1 %vm782_vm2, %v759_v20 }
 0x10f   : > { %v725_v29 = vadd.f32 %v2977_v26, %v2773_v18  ;;  %v677_v32 = vpop.f32.mrb[9].mxu0  ;;  %3002 = vmatmul.mubr.msk.f32.vlgmr.msra.gmra.mrb[0].mxu1 %vm782_vm2, %v760_v23  ;;  %v4736_v44 = vmax.f32 %v3831_v24, 0.0  ;;  %v4771_v58 = vmax.f32 %v3831_v24, 0.0 }
 0x110   : > { %v761_v35 = vmax.f32 %v3834_v25, 0.0  ;;  %v724_v38 = vadd.f32 %v2772_v22, %v677_v32  ;;  %3020 = vmatpush3.msk.msra.mxu1 %vm1030_vm1, %v980_v48  ;;  %v2777_v48 = vunpack.c.h.bf16 %v2827_v41  ;;  %v977_v41 = vld [vmem:[%s4722_s6 + $0x8] sm:$0xff]  ;;  %v4128_v25 = vld [vmem:[%s4724_s8] ss:$0 sm:$0xff] }
 0x111   : > { %v3847_v49 = vadd.f32 %v3790_v53, %v725_v29 }
 0x112   : > { %v3850_v50 = vadd.f32 %v3790_v53, %v724_v38  ;;  %v2980_v51 = vpop.f32.mrb[10].mxu0  ;;  %3004 = vmatprep.mubr.msk.f32.mxu1 %vm782_vm2, %v761_v35 }
 0x113   : > { %v727_v52 = vadd.f32 %v2980_v51, %v2773_v18  ;;  %v687_v54 = vpop.f32.mrb[11].mxu0  ;;  %3005 = vmatmul.mubr.msk.f32.gmra.mrb[2].mxu1 %vm782_vm2, %v4736_v44  ;;  %v4734_v60 = vmax.f32 %v3847_v49, 0.0 }
 0x114   : > { %v4735_v55 = vmax.f32 %v3850_v50, 0.0  ;;  %v726_v56 = vadd.f32 %v2772_v22, %v687_v54  ;;  %v3543_v54 = vmov 105   ;;  %v4772_v59 = vmax.f32 %v3850_v50, 0.0 }
 0x115   : > { %v3861_v61 = vadd.f32 %v3790_v53, %v727_v52  ;;  %v1427_v52 = vsub.f32 1.0, %v3699_v21  ;;  %3221 = vset.pattern.permute.xlu0 %v3543_v54  ;;  %3222 = vset.pattern.permute.xlu1 %v3543_v54  ;;  %v1442_v54 = vsub.f32 1.0, %v3770_v47 }
 0x116   : > { %v3864_v62 = vadd.f32 %v3790_v53, %v726_v56  ;;  %v2983_v63 = vpop.f32.mrb[12].mxu0  ;;  %3007 = vmatprep.mubr.msk.f32.mxu1 %vm782_vm2, %v4735_v55  ;;  %v1428_v56 = vsub.f32 1.0, %v3710_v27 }
 0x117   : > { %v729_v1 = vadd.f32 %v2983_v63, %v2777_v48  ;;  %v697_v2 = vpop.f32.mrb[13].mxu0  ;;  %3008 = vmatmul.mubr.msk.f32.gmra.mrb[4].mxu1 %vm782_vm2, %v4734_v60  ;;  %v4732_v8 = vmax.f32 %v3861_v61, 0.0  ;;  %1445 = vperm.xlu0 %3221, %v1427_v52   ;;  %v1431_v63 = vsub.f32 1.0, %v3721_v31  ;;  %v1441_v52 = vsub.f32 1.0, %v3766_v46 }
 0x118   : > { %v4733_v6 = vmax.f32 %v3864_v62, 0.0  ;;  %v728_v7 = vadd.f32 %v2776_v57, %v697_v2  ;;  %v1433_v2 = vsub.f32 1.0, %v3730_v34  ;;  %v4775_v4 = vmax.f32 %v3861_v61, 0.0 }
 0x119   : > { %v3875_v10 = vadd.f32 %v3790_v53, %v729_v1  ;;  %v1432_v1 = vsub.f32 1.0, %v3726_v33 }
 0x11a   : > { %v3878_v11 = vadd.f32 %v3790_v53, %v728_v7  ;;  %v2986_v14 = vpop.f32.mrb[14].mxu0  ;;  %3010 = vmatprep.mubr.msk.f32.mxu1 %vm782_vm2, %v4733_v6  ;;  %v1434_v7 = vsub.f32 1.0, %v3735_v36 }
 0x11b   : > { %v731_v16 = vadd.f32 %v2986_v14, %v2777_v48  ;;  %v707_v17 = vpop.f32.mrb[15].mxu0  ;;  %3011 = vmatmul.mubr.msk.f32.gmra.mrb[6].mxu1 %vm782_vm2, %v4732_v8  ;;  %v4730_v22 = vmax.f32 %v3875_v10, 0.0  ;;  %v1429_v48 = vsub.f32 1.0, %v3712_v28  ;;  %1450 = vperm.xlu0 %3221, %v1428_v56   ;;  %v1435_v14 = vsub.f32 1.0, %v3739_v37 }
 0x11c   : > { %v4731_v18 = vmax.f32 %v3878_v11, 0.0  ;;  %v730_v19 = vadd.f32 %v2776_v57, %v707_v17  ;;  %v1430_v57 = vsub.f32 1.0, %v3717_v30  ;;  %v1437_v17 = vsub.f32 1.0, %v3748_v40 }
 0x11d   : > { %v3889_v26 = vadd.f32 %v3790_v53, %v731_v16  ;;  %1455 = vperm.xlu1 %3222, %v1429_v48   ;;  %v1436_v16 = vsub.f32 1.0, %v3744_v39  ;;  %v3223_v48 = vpack.i.bf16 %v3710_v27, %v3699_v21  ;;  %v3228_v56 = vpack.i.bf16 %v3717_v30, %v3712_v28 }
 0x11e   : > { %v3892_v29 = vadd.f32 %v3790_v53, %v730_v19  ;;  %3013 = vmatprep.mubr.msk.f32.mxu1 %vm782_vm2, %v4731_v18  ;;  %v976_v53 = vld [vmem:[%s4722_s6] sm:$0xff]  ;;  %v1438_v19 = vsub.f32 1.0, %v3753_v42  ;;  %v4776_v5 = vmax.f32 %v3878_v11, 0.0 }
 0x11f   : > { %3014 = vmatmul.mubr.msk.f32.gmra.mrb[8].mxu1 %vm782_vm2, %v4730_v22  ;;  %v4728_v38 = vmax.f32 %v3889_v26, 0.0  ;;  %v3914_v51 = vpack.c.bf16 %v977_v41, %v976_v53  ;;  %1465 = vperm.xlu0 %3221, %v1431_v63   ;;  %v1439_v53 = vsub.f32 1.0, %v3757_v43  ;;  %v1440_v41 = vsub.f32 1.0, %v3762_v45 }
 0x120   : > { %v4729_v32 = vmax.f32 %v3892_v29, 0.0  ;;  %v3238_v63 = vpack.i.bf16 %v3735_v36, %v3730_v34  ;;  %v4779_v13 = vmax.f32 %v3889_v26, 0.0 }
 0x121   : > { %3140 = vmatprep.subr.bf16.mxu1 %v3914_v51  ;;  %1460 = vperm.xlu1 %3222, %v1430_v57   ;;  %v3233_v57 = vpack.i.bf16 %v3726_v33, %v3721_v31 }
 0x122   : > { %3016 = vmatprep.mubr.msk.f32.mxu1 %vm782_vm2, %v4729_v32 }
 0x123   : > { %3017 = vmatmul.mubr.msk.f32.gmra.mrb[10].mxu1 %vm782_vm2, %v4728_v38  ;;  %1475 = vperm.xlu0 %3221, %v1433_v2   ;;  %v3947_v2 = vpack.i.bf16 %v3753_v42, %v3748_v40 }
 0x125   : > { %1470 = vperm.xlu1 %3222, %v1432_v1   ;;  %v3943_v1 = vpack.i.bf16 %v3744_v39, %v3739_v37 }
 0x127   : > { %1485 = vperm.xlu0 %3221, %v1435_v14   ;;  %v3957_v14 = vpack.i.bf16 %v3770_v47, %v3766_v46 }
 0x129   : > { %1480 = vperm.xlu1 %3222, %v1434_v7   ;;  %v3952_v7 = vpack.i.bf16 %v3762_v45, %v3757_v43 }
 0x12b   : > { %1495 = vperm.xlu0 %3221, %v1437_v17  }
 0x12d   : > { %1490 = vperm.xlu1 %3222, %v1436_v16   ;;  %v3970_v16 = vld [vmem:[%s4721_s5] ss:$0 sm:$0xff] }
 0x12f   : > { %1505 = vperm.xlu0 %3221, %v1439_v53   ;;  %v979_v53 = vld [vmem:[%s4722_s6 + $0x18] sm:$0xff] }
 0x131   : > { %1500 = vperm.xlu1 %3222, %v1438_v19   ;;  %v978_v19 = vld [vmem:[%s4722_s6 + $0x10] sm:$0xff] }
 0x133   : > { %1515 = vperm.xlu0 %3221, %v1441_v52  }
 0x135   : > { %1510 = vperm.xlu1 %3222, %v1440_v41  }
 0x137   : > { %3224 = vperm.xlu0 %3221, %v3223_v48  }
 0x139   : > { %1520 = vperm.xlu1 %3222, %v1442_v54  }
 0x13b   : > { %3234 = vperm.xlu0 %3221, %v3233_v57  }
 0x13d   : > { %3229 = vperm.xlu1 %3222, %v3228_v56  }
 0x13f   : > { %3244 = vperm.xlu0 %3221, %v3943_v1  }
 0x141   : > { %3239 = vperm.xlu1 %3222, %v3238_v63  }
 0x143   : > { %3254 = vperm.xlu0 %3221, %v3952_v7  }
 0x145   : > { %3249 = vperm.xlu1 %3222, %v3947_v2  }
 0x147   : > { %3264 = vrot.lane.b32.xlu0 %v3223_v48, %s3544_s17 }
 0x149   : > { %3259 = vperm.xlu1 %3222, %v3957_v14  }
 0x14b   : > { %3274 = vrot.lane.b32.xlu0 %v3223_v48, %s3546_s29 }
 0x14d   : > { %3269 = vrot.lane.b32.xlu1 %v3223_v48, %s3545_s28 }
 0x14f   : > { %3284 = vrot.lane.b32.xlu0 %v3228_v56, %s3544_s17 }
 0x151   : > { %3279 = vrot.lane.b32.xlu1 %v3223_v48, %s3547_s30  ;;  %v3143_v48 = vpack.c.bf16 %v979_v53, %v978_v19 }
 0x153   : > { %3294 = vrot.lane.b32.xlu0 %v3228_v56, %s3546_s29 }
 0x155   : > { %3289 = vrot.lane.b32.xlu1 %v3228_v56, %s3545_s28 }
 0x157   : > { %3304 = vrot.lane.b32.xlu0 %v3233_v57, %s3544_s17 }
 0x159   : > { %3299 = vrot.lane.b32.xlu1 %v3228_v56, %s3547_s30 }
 0x15b   : > { %3314 = vrot.lane.b32.xlu0 %v3233_v57, %s3546_s29 }
 0x15d   : > { %3309 = vrot.lane.b32.xlu1 %v3233_v57, %s3545_s28 }
 0x15f   : > { %3324 = vrot.lane.b32.xlu0 %v3238_v63, %s3544_s17 }
 0x161   : > { %3319 = vrot.lane.b32.xlu1 %v3233_v57, %s3547_s30 }
 0x163   : > { %3334 = vrot.lane.b32.xlu0 %v3238_v63, %s3546_s29 }
 0x165   : > { %3329 = vrot.lane.b32.xlu1 %v3238_v63, %s3545_s28 }
 0x167   : > { %3344 = vrot.lane.b32.xlu0 %v3943_v1, %s3544_s17 }
 0x169   : > { %3339 = vrot.lane.b32.xlu1 %v3238_v63, %s3547_s30 }
 0x16b   : > { %3354 = vrot.lane.b32.xlu0 %v3943_v1, %s3546_s29 }
 0x16d   : > { %3349 = vrot.lane.b32.xlu1 %v3943_v1, %s3545_s28 }
 0x171   : > { %3359 = vrot.lane.b32.xlu1 %v3943_v1, %s3547_s30 }
 0x19c   : > { %v1456_v15 = vpop.permute.xlu1 %1455 }
 0x1da   : > { %v2997_v17 = vpop.f32.mrb[16].mxu0 }
 0x1db   : > { %v897_v41 = vpop.f32.mrb[17].mxu0  ;;  %v3984_v54 = vadd.f32 %v2997_v17, %v3970_v16 }
 0x1dc   : > { %v3981_v52 = vadd.f32 %v3970_v16, %v897_v41 }
 0x1dd   : > { %4756 = vst [vmem:[#allocation3_spill] sm:$0xff] %v3984_v54 }
 0x1de   : > { %4755 = vst [vmem:[#allocation2_spill] sm:$0xff] %v3981_v52  ;;  %v3000_v38 = vpop.f32.mrb[18].mxu0  ;;  %3021 = vmatprep.mubr.msk.f32.mxu1 %vm981_vm3, %v3981_v52 }
 0x1df   : > { %v907_v32 = vpop.f32.mrb[19].mxu0  ;;  %3022 = vmatmul.mubr.msk.f32.vlgmr.msra.gmra.mrb[12].mxu1 %vm981_vm3, %v3984_v54  ;;  %v3997_v17 = vadd.f32 %v3000_v38, %v3970_v16 }
 0x1e0   : > { %v3993_v56 = vadd.f32 %v3970_v16, %v907_v32  ;;  %3142 = vmatpush3.bf16.msra.mxu1 %v3914_v51 }
 0x1e1   : > { %4758 = vst [vmem:[#allocation5_spill] sm:$0xff] %v3997_v17  ;;  %3144 = vmatprep.subr.bf16.mxu1 %v3143_v48 }
 0x1e2   : > { %4757 = vst [vmem:[#allocation4_spill] sm:$0xff] %v3993_v56  ;;  %v3003_v19 = vpop.f32.mrb[0].mxu1  ;;  %3024 = vmatprep.mubr.msk.f32.mxu1 %vm981_vm3, %v3993_v56 }
 0x1e3   : > { %v917_v53 = vpop.f32.mrb[1].mxu1  ;;  %3025 = vmatmul.mubr.msk.f32.gmra.mrb[14].mxu1 %vm981_vm3, %v3997_v17  ;;  %v4009_v38 = vadd.f32 %v3003_v19, %v3970_v16 }
 0x1e4   : > { %v4006_v32 = vadd.f32 %v3970_v16, %v917_v53  ;;  %3146 = vmatpush3.bf16.msra.mxu1 %v3143_v48 }
 0x1e5   : > { %4760 = vst [vmem:[#allocation7_spill] sm:$0xff] %v4009_v38 }
 0x1e6   : > { %4759 = vst [vmem:[#allocation6_spill] sm:$0xff] %v4006_v32  ;;  %v3006_v51 = vpop.f32.mrb[2].mxu1  ;;  %3027 = vmatprep.mubr.msk.f32.mxu1 %vm981_vm3, %v4006_v32 }
 0x1e7   : > { %v927_v57 = vpop.f32.mrb[3].mxu1  ;;  %3028 = vmatmul.mubr.msk.f32.gmra.mrb[16].mxu1 %vm981_vm3, %v4009_v38  ;;  %v4021_v48 = vadd.f32 %v3006_v51, %v3970_v16 }
 0x1e8   : > { %v4018_v41 = vadd.f32 %v3970_v16, %v927_v57 }
 0x1e9   : > { %4762 = vst [vmem:[#allocation9_spill] sm:$0xff] %v4021_v48 }
 0x1ea   : > { %4761 = vst [vmem:[#allocation8_spill] sm:$0xff] %v4018_v41  ;;  %v3009_v19 = vpop.f32.mrb[4].mxu1  ;;  %3030 = vmatprep.mubr.msk.f32.mxu1 %vm981_vm3, %v4018_v41 }
 0x1eb   : > { %v937_v53 = vpop.f32.mrb[5].mxu1  ;;  %3031 = vmatmul.mubr.msk.f32.gmra.mrb[18].mxu1 %vm981_vm3, %v4021_v48  ;;  %v4033_v57 = vadd.f32 %v3009_v19, %v3970_v16 }
 0x1ec   : > { %v4030_v22 = vadd.f32 %v3970_v16, %v937_v53 }
 0x1ed   : > { %4764 = vst [vmem:[#allocation11_spill] sm:$0xff] %v4033_v57 }
 0x1ee   : > { %4763 = vst [vmem:[#allocation10_spill] sm:$0xff] %v4030_v22  ;;  %v3012_v51 = vpop.f32.mrb[6].mxu1  ;;  %3033 = vmatprep.mubr.msk.f32.mxu1 %vm981_vm3, %v4030_v22 }
 0x1ef   : > { %v947_v63 = vpop.f32.mrb[7].mxu1  ;;  %3034 = vmatmul.mubr.msk.f32.gmra.mrb[20].mxu1 %vm981_vm3, %v4033_v57  ;;  %v4047_v19 = vadd.f32 %v3012_v51, %v3970_v16 }
 0x1f0   : > { %v4044_v53 = vadd.f32 %v3970_v16, %v947_v63 }
 0x1f1   : > { %4766 = vst [vmem:[#allocation13_spill] sm:$0xff] %v4047_v19 }
 0x1f2   : > { %4765 = vst [vmem:[#allocation12_spill] sm:$0xff] %v4044_v53  ;;  %v3015_v18 = vpop.f32.mrb[8].mxu1  ;;  %3036 = vmatprep.mubr.msk.f32.mxu1 %vm981_vm3, %v4044_v53 }
 0x1f3   : > { %v957_v8 = vpop.f32.mrb[9].mxu1  ;;  %3037 = vmatmul.mubr.msk.f32.gmra.mrb[22].mxu1 %vm981_vm3, %v4047_v19  ;;  %v4059_v63 = vadd.f32 %v3015_v18, %v3970_v16 }
 0x1f4   : > { %v4056_v6 = vadd.f32 %v3970_v16, %v957_v8 }
 0x1f5   : > { %4768 = vst [vmem:[#allocation15_spill] sm:$0xff] %v4059_v63 }
 0x1f6   : > { %4767 = vst [vmem:[#allocation14_spill] sm:$0xff] %v4056_v6  ;;  %v3018_v60 = vpop.f32.mrb[10].mxu1  ;;  %3039 = vmatprep.mubr.msk.f32.mxu1 %vm981_vm3, %v4056_v6  ;;  %v2025_v6 = vld [vmem:[%s4725_s9 + $0x10] sm:$0x3] }
 0x1f7   : > { %v967_v51 = vpop.f32.mrb[11].mxu1  ;;  %3040 = vmatmul.mubr.msk.f32.gmra.mrb[24].mxu1 %vm981_vm3, %v4059_v63  ;;  %v4069_v44 = vadd.f32 %v3018_v60, %v3970_v16 }
 0x1f8   : > { %v4066_v55 = vadd.f32 %v3970_v16, %v967_v51 }
 0x1f9   : > { %4770 = vst [vmem:[#allocation17_spill] sm:$0xff] %v4069_v44 }
 0x1fa   : > { %4769 = vst [vmem:[#allocation16_spill] sm:$0xff] %v4066_v55  ;;  %3042 = vmatprep.mubr.msk.f32.mxu1 %vm981_vm3, %v4066_v55 }
 0x1fb   : > { %3043 = vmatmul.mubr.msk.f32.gmra.mrb[26].mxu1 %vm981_vm3, %v4069_v44 }
 0x1fc   : > { %3053 = vmatprep.mubr.msk.f32.mxu1 %vm782_vm2, %v755_v0  ;;  %v4773_v0 = vmax.f32 %v3847_v49, 0.0 }
 0x1ff   : > { %3054 = vmatmul.mubr.msk.f32.vlgmr.msra.gmra.mrb[12].mxu1 %vm782_vm2, %v756_v3  ;;  %v4774_v3 = vmax.f32 %v3864_v62, 0.0 }
 0x200   : > { %3056 = vmatprep.mubr.msk.f32.mxu1 %vm782_vm2, %v757_v9  ;;  %v4777_v9 = vmax.f32 %v3875_v10, 0.0 }
 0x203   : > { %3057 = vmatmul.mubr.msk.f32.gmra.mrb[14].mxu1 %vm782_vm2, %v758_v12  ;;  %v4778_v12 = vmax.f32 %v3892_v29, 0.0 }
 0x204   : > { %3059 = vmatprep.mubr.msk.f32.mxu1 %vm782_vm2, %v759_v20  ;;  %v1446_v20 = vpop.permute.xlu0 %1445 }
 0x207   : > { %3060 = vmatmul.mubr.msk.f32.gmra.mrb[16].mxu1 %vm782_vm2, %v760_v23  ;;  %v1461_v23 = vpop.permute.xlu1 %1460 }
 0x208   : > { %3062 = vmatprep.mubr.msk.f32.mxu1 %vm782_vm2, %v761_v35  ;;  %v1451_v24 = vpop.permute.xlu0 %1450 }
 0x20b   : > { %3063 = vmatmul.mubr.msk.f32.gmra.mrb[18].mxu1 %vm782_vm2, %v4771_v58  ;;  %v1471_v35 = vpop.permute.xlu1 %1470 }
 0x20c   : > { %3065 = vmatprep.mubr.msk.f32.mxu1 %vm782_vm2, %v4772_v59  ;;  %v1466_v50 = vpop.permute.xlu0 %1465 }
 0x20f   : > { %3066 = vmatmul.mubr.msk.f32.gmra.mrb[20].mxu1 %vm782_vm2, %v4773_v0  ;;  %v1481_v10 = vpop.permute.xlu1 %1480 }
 0x210   : > { %3068 = vmatprep.mubr.msk.f32.mxu1 %vm782_vm2, %v4774_v3  ;;  %v1476_v29 = vpop.permute.xlu0 %1475 }
 0x213   : > { %3069 = vmatmul.mubr.msk.f32.gmra.mrb[22].mxu1 %vm782_vm2, %v4775_v4  ;;  %v1491_v58 = vpop.permute.xlu1 %1490 }
 0x214   : > { %3071 = vmatprep.mubr.msk.f32.mxu1 %vm782_vm2, %v4776_v5  ;;  %v1486_v3 = vpop.permute.xlu0 %1485 }
 0x217   : > { %3072 = vmatmul.mubr.msk.f32.gmra.mrb[24].mxu1 %vm782_vm2, %v4777_v9 }
 0x218   : > { %3074 = vmatprep.mubr.msk.f32.mxu1 %vm782_vm2, %v4778_v12 }
 0x21b   : > { %3075 = vmatmul.mubr.msk.f32.gmra.mrb[26].mxu1 %vm782_vm2, %v4779_v13 }
 0x2d2   : > { %v3055_v49 = vpop.f32.mrb[12].mxu1 }
 0x2d3   : > { %v1332_v60 = vadd.f32 %v3055_v49, %v4128_v25  ;;  %v1245_v61 = vpop.f32.mrb[13].mxu1  ;;  %v1496_v49 = vpop.permute.xlu0 %1495 }
 0x2d4   : > { %v1331_v11 = vadd.f32 %v4128_v25, %v1245_v61 }
 0x2d5   : > { %v1524_v62 = vmul.f32 %v1451_v24, %v1332_v60  ;;  %1701 = vrot.lane.b32.xlu1 %v1332_v60, %s3548_s12 }
 0x2d6   : > { %v3058_v8 = vpop.f32.mrb[14].mxu1  ;;  %v1523_v16 = vmul.f32 %v1446_v20, %v1331_v11  ;;  %v1501_v20 = vpop.permute.xlu1 %1500 }
 0x2d7   : > { %1557 = vrot.lane.b32.xlu0 %v1524_v62, %s3549_s13  ;;  %v1255_v18 = vpop.f32.mrb[15].mxu1  ;;  %v1334_v4 = vadd.f32 %v3058_v8, %v4128_v25 }
 0x2d8   : > { %v1333_v26 = vadd.f32 %v4128_v25, %v1255_v18 }
 0x2d9   : > { %1699 = vrot.lane.b32.xlu1 %v1331_v11, %s3548_s12  ;;  %v1526_v24 = vmul.f32 %v1461_v23, %v1334_v4 }
 0x2da   : > { %v3061_v1 = vpop.f32.mrb[16].mxu1  ;;  %v1525_v59 = vmul.f32 %v1456_v15, %v1333_v26  ;;  %v1511_v8 = vpop.permute.xlu1 %1510 }
 0x2db   : > { %1703 = vrot.lane.b32.xlu0 %v1333_v26, %s3548_s12  ;;  %v1265_v51 = vpop.f32.mrb[17].mxu1  ;;  %v1336_v9 = vadd.f32 %v3061_v1, %v4128_v25  ;;  %v1506_v26 = vpop.permute.xlu0 %1505 }
 0x2dc   : > { %v1335_v12 = vadd.f32 %v4128_v25, %v1265_v51 }
 0x2dd   : > { %1555 = vrot.lane.b32.xlu1 %v1523_v16, %s3549_s13  ;;  %v1528_v60 = vmul.f32 %v1471_v35, %v1336_v9 }
 0x2de   : > { %v3064_v0 = vpop.f32.mrb[18].mxu1  ;;  %v1527_v1 = vmul.f32 %v1466_v50, %v1335_v12  ;;  %v1521_v51 = vpop.permute.xlu1 %1520 }
 0x2df   : > { %1559 = vrot.lane.b32.xlu0 %v1525_v59, %s3549_s13  ;;  %v1275_v5 = vpop.f32.mrb[19].mxu1  ;;  %v1338_v59 = vadd.f32 %v3064_v0, %v4128_v25 }
 0x2e0   : > { %v1337_v11 = vadd.f32 %v4128_v25, %v1275_v5 }
 0x2e1   : > { %1705 = vrot.lane.b32.xlu1 %v1334_v4, %s3548_s12  ;;  %v1530_v50 = vmul.f32 %v1481_v10, %v1338_v59 }
 0x2e2   : > { %v3067_v13 = vpop.f32.mrb[20].mxu1  ;;  %v1529_v16 = vmul.f32 %v1476_v29, %v1337_v11  ;;  %v4156_v29 = vpop.permute.xlu1 %3229 }
 0x2e3   : > { %1707 = vrot.lane.b32.xlu0 %v1335_v12, %s3548_s12  ;;  %v1285_v15 = vpop.f32.mrb[21].mxu1  ;;  %v1340_v5 = vadd.f32 %v3067_v13, %v4128_v25 }
 0x2e5   : > { %1561 = vrot.lane.b32.xlu1 %v1526_v24, %s3549_s13  ;;  %v1516_v24 = vpop.permute.xlu0 %1515  ;;  %v1532_v12 = vmul.f32 %v1491_v58, %v1340_v5 }
 0x2e6   : > { %v3070_v61 = vpop.f32.mrb[22].mxu1  ;;  %v4164_v13 = vpop.permute.xlu1 %3239 }
 0x2e7   : > { %1565 = vrot.lane.b32.xlu0 %v1528_v60, %s3549_s13  ;;  %v1295_v62 = vpop.f32.mrb[23].mxu1  ;;  %v1342_v10 = vadd.f32 %v3070_v61, %v4128_v25  ;;  %v3241_v32 = vunpack.i.l.bf16 %v4164_v13 }
 0x2e8   : > { %v1341_v0 = vadd.f32 %v4128_v25, %v1295_v62 }
 0x2e9   : > { %1709 = vrot.lane.b32.xlu1 %v1336_v9, %s3548_s12  ;;  %v1339_v9 = vadd.f32 %v4128_v25, %v1285_v15  ;;  %v4159_v60 = vpop.permute.xlu0 %3224 }
 0x2ea   : > { %v3073_v18 = vpop.f32.mrb[24].mxu1  ;;  %v1533_v58 = vmul.f32 %v1496_v49, %v1341_v0  ;;  %v4174_v62 = vpop.permute.xlu1 %3249  ;;  %v3227_v44 = vunpack.i.h.bf16 %v4159_v60  ;;  %v3226_v53 = vunpack.i.l.bf16 %v4159_v60 }
 0x2eb   : > { %1711 = vrot.lane.b32.xlu0 %v1337_v11, %s3548_s12  ;;  %v1305_v23 = vpop.f32.mrb[25].mxu1  ;;  %v1531_v15 = vmul.f32 %v1486_v3, %v1339_v9  ;;  %v3252_v56 = vunpack.i.h.bf16 %v4174_v62  ;;  %v3251_v52 = vunpack.i.l.bf16 %v4174_v62 }
 0x2ec   : > { %v1412_v63 = vmul.f32 %v3227_v44, %v3710_v27  ;;  %v1411_v44 = vmul.f32 %v3226_v53, %v3699_v21 }
 0x2ed   : > { %1563 = vrot.lane.b32.xlu1 %v1527_v1, %s3549_s13  ;;  %v4168_v11 = vpop.permute.xlu0 %3234  ;;  %v1343_v1 = vadd.f32 %v4128_v25, %v1305_v23 }
 0x2ee   : > { %v3076_v35 = vpop.f32.mrb[26].mxu1  ;;  %v3237_v21 = vunpack.i.h.bf16 %v4168_v11 }
 0x2ef   : > { %1567 = vrot.lane.b32.xlu0 %v1529_v16, %s3549_s13  ;;  %v1315_v4 = vpop.f32.mrb[27].mxu1  ;;  %v1534_v16 = vmul.f32 %v1501_v20, %v1342_v10  ;;  %v4183_v20 = vpop.permute.xlu1 %3259 }
 0x2f0   : > { %v1345_v49 = vadd.f32 %v4128_v25, %v1315_v4 }
 0x2f1   : > { %1713 = vrot.lane.b32.xlu1 %v1338_v59, %s3548_s12  ;;  %v1344_v59 = vadd.f32 %v3073_v18, %v4128_v25  ;;  %v4177_v3 = vpop.permute.xlu0 %3244 }
 0x2f2   : > { %v1537_v23 = vmul.f32 %v1516_v24, %v1345_v49  ;;  %v3247_v17 = vunpack.i.h.bf16 %v4177_v3 }
 0x2f3   : > { %1715 = vrot.lane.b32.xlu0 %v1339_v9, %s3548_s12  ;;  %v1536_v61 = vmul.f32 %v1511_v8, %v1344_v59  ;;  %v1346_v9 = vadd.f32 %v3076_v35, %v4128_v25  ;;  %v4191_v8 = vpop.permute.xlu1 %3269 }
 0x2f5   : > { %1569 = vrot.lane.b32.xlu1 %v1530_v50, %s3549_s13  ;;  %v1538_v18 = vmul.f32 %v1521_v51, %v1346_v9 }
 0x2f7   : > { %1573 = vrot.lane.b32.xlu0 %v1532_v12, %s3549_s13  ;;  %v4200_v35 = vpop.permute.xlu1 %3279 }
 0x2f9   : > { %1717 = vrot.lane.b32.xlu1 %v1340_v5, %s3548_s12  ;;  %v1535_v5 = vmul.f32 %v1506_v26, %v1343_v1  ;;  %v4187_v26 = vpop.permute.xlu0 %3254 }
 0x2fb   : > { %1719 = vrot.lane.b32.xlu0 %v1341_v0, %s3548_s12  ;;  %v4209_v4 = vpop.permute.xlu1 %3289 }
 0x2fd   : > { %1571 = vrot.lane.b32.xlu1 %v1531_v15, %s3549_s13  ;;  %v4194_v25 = vpop.permute.xlu0 %3264 }
 0x2ff   : > { %1575 = vrot.lane.b32.xlu0 %v1533_v58, %s3549_s13  ;;  %v4218_v50 = vpop.permute.xlu1 %3299 }
 0x301   : > { %1577 = vrot.lane.b32.xlu1 %v1534_v16, %s3549_s13  ;;  %v4203_v51 = vpop.permute.xlu0 %3274 }
 0x303   : > { %1579 = vrot.lane.b32.xlu0 %v1535_v5, %s3549_s13  ;;  %v4225_v12 = vpop.permute.xlu1 %3309 }
 0x305   : > { %1581 = vrot.lane.b32.xlu1 %v1536_v61, %s3549_s13  ;;  %v4212_v24 = vpop.permute.xlu0 %3284 }
 0x307   : > { %3364 = vrot.lane.b32.xlu0 %v3947_v2, %s3544_s17  ;;  %v4232_v15 = vpop.permute.xlu1 %3319 }
 0x309   : > { %1585 = vrot.lane.b32.xlu1 %v1538_v18, %s3549_s13 }
 0x30b   : > { %1583 = vrot.lane.b32.xlu0 %v1537_v23, %s3549_s13  ;;  %v4238_v58 = vpop.permute.xlu1 %3329 }
 0x30d   : > { %1721 = vrot.lane.b32.xlu1 %v1342_v10, %s3548_s12 }
 0x30f   : > { %3374 = vrot.lane.b32.xlu0 %v3947_v2, %s3546_s29 }
 0x311   : > { %3369 = vrot.lane.b32.xlu1 %v3947_v2, %s3545_s28 }
 0x313   : > { %1723 = vrot.lane.b32.xlu0 %v1343_v1, %s3548_s12 }
 0x315   : > { %3379 = vrot.lane.b32.xlu1 %v3947_v2, %s3547_s30  ;;  %v4221_v2 = vpop.permute.xlu0 %3294 }
 0x317   : > { %3384 = vrot.lane.b32.xlu0 %v3952_v7, %s3544_s17 }
 0x319   : > { %1725 = vrot.lane.b32.xlu1 %v1344_v59, %s3548_s12  ;;  %v4230_v0 = vpop.permute.xlu0 %3304 }
 0x31b   : > { %3394 = vrot.lane.b32.xlu0 %v3952_v7, %s3546_s29 }
 0x31d   : > { %3389 = vrot.lane.b32.xlu1 %v3952_v7, %s3545_s28  ;;  %v4236_v10 = vpop.permute.xlu0 %3314 }
 0x31f   : > { %1727 = vrot.lane.b32.xlu0 %v1345_v49, %s3548_s12  ;;  %v2024_v49 = vld [vmem:[%s4725_s9 + $0x8] sm:$0xff] }
 0x321   : > { %3399 = vrot.lane.b32.xlu1 %v3952_v7, %s3547_s30  ;;  %v4240_v1 = vpop.permute.xlu0 %3324  ;;  %v4242_v7 = vpop.permute.xlu1 %3339 }
 0x323   : > { %3404 = vrot.lane.b32.xlu0 %v3957_v14, %s3544_s17 }
 0x325   : > { %1729 = vrot.lane.b32.xlu1 %v1346_v9, %s3548_s12  ;;  %v4244_v16 = vpop.permute.xlu0 %3334  ;;  %v4246_v59 = vpop.permute.xlu1 %3349  ;;  %v2023_v9 = vld [vmem:[%s4725_s9] sm:$0xff]  ;;  %s3552_s12 = smov 9  }
 0x326   : > { %v3147_v23 = vpack.c.bf16 %v2024_v49, %v2023_v9  ;;  %v3231_v49 = vunpack.i.l.bf16 %v4156_v29 }
 0x328   : > { %3148 = vmatprep.subr.bf16.mxu0 %v3147_v23  ;;  %v1413_v60 = vmul.f32 %v3231_v49, %v3712_v28 }
 0x329   : > { %3409 = vrot.lane.b32.xlu1 %v3957_v14, %s3545_s28  ;;  %v4248_v5 = vpop.permute.xlu0 %3344  ;;  %v4250_v61 = vpop.permute.xlu1 %3359  ;;  %3150 = vmatpush3.bf16.msra.mxu0 %v3147_v23 }
 0x32a   : > { %3081 = vmatprep.subr.msk.mxu0 %vm2082_vm4, %v2025_v6 }
 0x32d   : > { %v4258_v18 = vpop.permute.xlu0 %3354  ;;  %3082 = vmatpush3.msk.msra.mxu0 %vm2082_vm4, %v2025_v6  ;;  %v3232_v6 = vunpack.i.h.bf16 %v4156_v29 }
 0x32f   : > { %v1414_v53 = vmul.f32 %v3232_v6, %v3717_v30 }
 0x347   : > { %v4261_v55 = vpop.permute.xlu1 %1701 }
 0x349   : > { %v1558_v19 = vpop.permute.xlu0 %1557 }
 0x34a   : > { %v4268_v57 = vadd.f32 %v1558_v19, %v1412_v63 }
 0x34b   : > { %v4270_v9 = vpop.permute.xlu1 %1699 }
 0x34c   : > { %1637 = vrot.lane.b32.xlu0 %v4268_v57, %s3550_s25 }
 0x34d   : > { %v4275_v27 = vpop.permute.xlu0 %1703 }
 0x34f   : > { %v1556_v23 = vpop.permute.xlu1 %1555 }
 0x350   : > { %v4278_v22 = vadd.f32 %v1556_v23, %v1411_v44  ;;  %v3236_v44 = vunpack.i.l.bf16 %v4168_v11  ;;  %v1416_v23 = vmul.f32 %v3237_v21, %v3726_v33  ;;  %v3242_v21 = vunpack.i.h.bf16 %v4164_v13 }
 0x351   : > { %v1560_v19 = vpop.permute.xlu0 %1559  ;;  %v3246_v13 = vunpack.i.l.bf16 %v4177_v3 }
 0x352   : > { %v4282_v63 = vadd.f32 %v1560_v19, %v1413_v60  ;;  %1635 = vrot.lane.b32.xlu0 %v4278_v22, %s3550_s25  ;;  %v1415_v30 = vmul.f32 %v3236_v44, %v3721_v31  ;;  %v1418_v31 = vmul.f32 %v3242_v21, %v3735_v36 }
 0x353   : > { %v4286_v48 = vpop.permute.xlu1 %1705  ;;  %v1419_v36 = vmul.f32 %v3246_v13, %v3739_v37 }
 0x354   : > { %1639 = vrot.lane.b32.xlu1 %v4282_v63, %s3550_s25 }
 0x355   : > { %v4290_v41 = vpop.permute.xlu0 %1707 }
 0x357   : > { %v1562_v28 = vpop.permute.xlu1 %1561 }
 0x358   : > { %v4294_v49 = vadd.f32 %v1562_v28, %v1414_v53  ;;  %v1417_v53 = vmul.f32 %v3241_v32, %v3730_v34  ;;  %v1420_v34 = vmul.f32 %v3247_v17, %v3744_v39  ;;  %v3257_v39 = vunpack.i.h.bf16 %v4187_v26 }
 0x359   : > { %v1566_v29 = vpop.permute.xlu0 %1565  ;;  %v3256_v17 = vunpack.i.l.bf16 %v4187_v26 }
 0x35a   : > { %1641 = vrot.lane.b32.xlu0 %v4294_v49, %s3550_s25  ;;  %v4302_v19 = vadd.f32 %v1566_v29, %v1416_v23  ;;  %v1424_v26 = vmul.f32 %v3257_v39, %v3762_v45  ;;  %v3423_v45 = vpack.i.bf16 %v4268_v57, %v4278_v22 }
 0x35b   : > { %v4300_v60 = vpop.permute.xlu1 %1709  ;;  %v1423_v37 = vmul.f32 %v3256_v17, %v3757_v43 }
 0x35d   : > { %v4304_v38 = vpop.permute.xlu0 %1711 }
 0x35e   : > { %1645 = vrot.lane.b32.xlu0 %v4302_v19, %s3550_s25 }
 0x35f   : > { %v1564_v6 = vpop.permute.xlu1 %1563 }
 0x360   : > { %v4310_v11 = vadd.f32 %v1564_v6, %v1415_v30 }
 0x361   : > { %v1568_v33 = vpop.permute.xlu0 %1567 }
 0x362   : > { %1643 = vrot.lane.b32.xlu1 %v4310_v11, %s3550_s25  ;;  %v1609_v29 = vadd.f32 %v1568_v33, %v1417_v53 }
 0x363   : > { %v4316_v28 = vpop.permute.xlu1 %1713 }
 0x365   : > { %v4318_v23 = vpop.permute.xlu0 %1715 }
 0x366   : > { %4780 = vst [vmem:[#allocation18_spill] sm:$0xff] %v4318_v23  ;;  %1647 = vrot.lane.b32.xlu1 %v1609_v29, %s3550_s25  ;;  %v3262_v23 = vunpack.i.h.bf16 %v4183_v20 }
 0x367   : > { %v1570_v44 = vpop.permute.xlu1 %1569 }
 0x368   : > { %v1610_v30 = vadd.f32 %v1570_v44, %v1418_v31  ;;  %v1421_v44 = vmul.f32 %v3251_v52, %v3748_v40  ;;  %v3261_v40 = vunpack.i.l.bf16 %v4183_v20 }
 0x369   : > { %v1574_v6 = vpop.permute.xlu0 %1573 }
 0x36a   : > { %1649 = vrot.lane.b32.xlu0 %v1610_v30, %s3550_s25  ;;  %v1612_v33 = vadd.f32 %v1574_v6, %v1420_v34  ;;  %v1422_v6 = vmul.f32 %v3252_v56, %v3753_v42  ;;  %v1426_v56 = vmul.f32 %v3262_v23, %v3770_v47  ;;  %v3428_v47 = vpack.i.bf16 %v4294_v49, %v4282_v63 }
 0x36b   : > { %v4326_v32 = vpop.permute.xlu1 %1717  ;;  %v3438_v20 = vpack.i.bf16 %v1610_v30, %v1609_v29 }
 0x36d   : > { %v4328_v53 = vpop.permute.xlu0 %1719 }
 0x36e   : > { %4781 = vst [vmem:[#allocation19_spill] sm:$0xff] %v4328_v53  ;;  %1653 = vrot.lane.b32.xlu0 %v1612_v33, %s3550_s25 }
 0x36f   : > { %v1572_v21 = vpop.permute.xlu1 %1571 }
 0x370   : > { %v1611_v31 = vadd.f32 %v1572_v21, %v1419_v36 }
 0x371   : > { %v1576_v3 = vpop.permute.xlu0 %1575 }
 0x372   : > { %1651 = vrot.lane.b32.xlu1 %v1611_v31, %s3550_s25  ;;  %v1613_v54 = vadd.f32 %v1576_v3, %v1421_v44  ;;  %v1425_v3 = vmul.f32 %v3261_v40, %v3766_v46  ;;  %v3433_v46 = vpack.i.bf16 %v4302_v19, %v4310_v11  ;;  %v3443_v23 = vpack.i.bf16 %v1612_v33, %v1611_v31 }
 0x373   : > { %v1578_v34 = vpop.permute.xlu1 %1577  ;;  %v3277_v40 = vunpack.i.h.bf16 %v4203_v51 }
 0x374   : > { %v1614_v62 = vadd.f32 %v1578_v34, %v1422_v6 }
 0x375   : > { %v1580_v53 = vpop.permute.xlu0 %1579 }
 0x376   : > { %1655 = vrot.lane.b32.xlu1 %v1613_v54, %s3550_s25  ;;  %1657 = vrot.lane.b32.xlu0 %v1614_v62, %s3550_s25  ;;  %v1615_v52 = vadd.f32 %v1580_v53, %v1423_v37  ;;  %v3448_v53 = vpack.i.bf16 %v1614_v62, %v1613_v54  ;;  %v3267_v62 = vunpack.i.h.bf16 %v4194_v25 }
 0x377   : > { %v1582_v13 = vpop.permute.xlu1 %1581 }
 0x378   : > { %v1616_v36 = vadd.f32 %v1582_v13, %v1424_v26  ;;  %v3272_v26 = vunpack.i.h.bf16 %v4191_v8 }
 0x379   : > { %v4345_v42 = vpop.permute.xlu0 %3364 }
 0x37a   : > { %1659 = vrot.lane.b32.xlu1 %v1615_v52, %s3550_s25  ;;  %1661 = vrot.lane.b32.xlu0 %v1616_v36, %s3550_s25  ;;  %v3453_v39 = vpack.i.bf16 %v1616_v36, %v1615_v52 }
 0x37b   : > { %v1586_v43 = vpop.permute.xlu1 %1585 }
 0x37c   : > { %v1618_v21 = vadd.f32 %v1586_v43, %v1426_v56  ;;  %v3282_v56 = vunpack.i.h.bf16 %v4200_v35 }
 0x37d   : > { %v1584_v17 = vpop.permute.xlu0 %1583 }
 0x37e   : > { %v1617_v44 = vadd.f32 %v1584_v17, %v1425_v3  ;;  %1665 = vrot.lane.b32.xlu0 %v1618_v21, %s3550_s25  ;;  %v3266_v17 = vunpack.i.l.bf16 %v4194_v25 }
 0x380   : > { %1663 = vrot.lane.b32.xlu1 %v1617_v44, %s3550_s25  ;;  %v3458_v22 = vpack.i.bf16 %v1618_v21, %v1617_v44 }
 0x381   : > { %v4365_v57 = vpop.permute.xlu0 %3374 }
 0x382   : > { %3414 = vrot.lane.b32.xlu0 %v3957_v14, %s3546_s29 }
 0x384   : > { %3419 = vrot.lane.b32.xlu1 %v3957_v14, %s3547_s30  ;;  %v4363_v14 = vpop.permute.xlu1 %1721 }
 0x385   : > { %v4369_v49 = vpop.permute.xlu0 %1723 }
 0x386   : > { %3424 = vrot.lane.b32.xlu0 %v3423_v45, %s3551_s27  ;;  %v3271_v45 = vunpack.i.l.bf16 %v4191_v8  ;;  %v3296_v8 = vunpack.i.l.bf16 %v4221_v2 }
 0x388   : > { %3429 = vrot.lane.b32.xlu1 %v3428_v47, %s3551_s27  ;;  %v4367_v63 = vpop.permute.xlu1 %3369 }
 0x389   : > { %v4373_v11 = vpop.permute.xlu0 %3384 }
 0x38a   : > { %3434 = vrot.lane.b32.xlu0 %v3433_v46, %s3551_s27  ;;  %v3281_v46 = vunpack.i.l.bf16 %v4200_v35 }
 0x38c   : > { %3439 = vrot.lane.b32.xlu1 %v3438_v20, %s3551_s27  ;;  %v4371_v19 = vpop.permute.xlu1 %3379  ;;  %v3276_v20 = vunpack.i.l.bf16 %v4203_v51  ;;  %v3301_v51 = vunpack.i.l.bf16 %v4218_v50 }
 0x38d   : > { %v4377_v54 = vpop.permute.xlu0 %3394 }
 0x38e   : > { %3444 = vrot.lane.b32.xlu0 %v3443_v23, %s3551_s27  ;;  %v3286_v23 = vunpack.i.l.bf16 %v4212_v24 }
 0x390   : > { %3449 = vrot.lane.b32.xlu1 %v3448_v53, %s3551_s27  ;;  %v4375_v29 = vpop.permute.xlu1 %1725 }
 0x391   : > { %v4381_v33 = vpop.permute.xlu0 %1727 }
 0x392   : > { %3454 = vrot.lane.b32.xlu0 %v3453_v39, %s3551_s27 }
 0x394   : > { %3459 = vrot.lane.b32.xlu1 %v3458_v22, %s3551_s27  ;;  %v4379_v30 = vpop.permute.xlu1 %3389  ;;  %v3291_v22 = vunpack.i.l.bf16 %v4209_v4 }
 0x395   : > { %v4385_v6 = vpop.permute.xlu0 %3404 }
 0x398   : > { %v4383_v31 = vpop.permute.xlu1 %3399 }
 0x39c   : > { %v4387_v34 = vpop.permute.xlu1 %1729 }
 0x3a0   : > { %v4395_v36 = vpop.permute.xlu1 %3409 }
 0x3be   : > { %v1638_v37 = vpop.permute.xlu0 %1637 }
 0x3bf   : > { %v1940_v13 = vsel %vm981_vm3, %v1638_v37, %v4261_v55 }
 0x3c0   : > { %v1957_v52 = vsel %vm1955_vm5, %v1940_v13, %v3267_v62 }
 0x3c1   : > { %v1974_v43 = vsel %vm1972_vm6, %v1957_v52, %v3272_v26 }
 0x3c2   : > { %v1991_v21 = vsel %vm1989_vm7, %v1974_v43, %v3277_v40 }
 0x3c3   : > { %v2008_v3 = vsel %vm2006_vm8, %v1991_v21, %v3282_v56  ;;  %v3287_v56 = vunpack.i.h.bf16 %v4212_v24  ;;  %v3292_v21 = vunpack.i.h.bf16 %v4209_v4 }
 0x3c4   : > { %v1636_v44 = vpop.permute.xlu0 %1635 }
 0x3c5   : > { %v1939_v47 = vsel %vm981_vm3, %v1636_v44, %v4270_v9  ;;  %v3297_v44 = vunpack.i.h.bf16 %v4221_v2  ;;  %v3317_v2 = vunpack.i.h.bf16 %v4236_v10 }
 0x3c6   : > { %v1956_v53 = vsel %vm1955_vm5, %v1939_v47, %v3266_v17  ;;  %v1640_v39 = vpop.permute.xlu1 %1639  ;;  %v3302_v47 = vunpack.i.h.bf16 %v4218_v50  ;;  %v3322_v50 = vunpack.i.h.bf16 %v4232_v15 }
 0x3c7   : > { %v1973_v62 = vsel %vm1972_vm6, %v1956_v53, %v3271_v45  ;;  %v1941_v25 = vsel %vm981_vm3, %v1640_v39, %v4275_v27 }
 0x3c8   : > { %v1958_v37 = vsel %vm1955_vm5, %v1941_v25, %v3286_v23  ;;  %v1990_v35 = vsel %vm1989_vm7, %v1973_v62, %v3276_v20  ;;  %v3312_v23 = vunpack.i.h.bf16 %v4225_v12  ;;  %v3306_v62 = vunpack.i.l.bf16 %v4230_v0 }
 0x3c9   : > { %v1975_v26 = vsel %vm1972_vm6, %v1958_v37, %v3291_v22  ;;  %v2007_v13 = vsel %vm2006_vm8, %v1990_v35, %v3281_v46  ;;  %v3307_v46 = vunpack.i.h.bf16 %v4230_v0  ;;  %v3311_v37 = vunpack.i.l.bf16 %v4225_v12 }
 0x3ca   : > { %3083 = vmatprep.mubr.msk.f32.mxu0 %vm2033_vm9, %v2007_v13  ;;  %v1992_v40 = vsel %vm1989_vm7, %v1975_v26, %v3296_v8  ;;  %v3316_v26 = vunpack.i.l.bf16 %v4236_v10  ;;  %v3326_v0 = vunpack.i.l.bf16 %v4240_v1  ;;  %v3331_v12 = vunpack.i.l.bf16 %v4238_v58 }
 0x3cb   : > { %3084 = vmatmul.mubr.msk.f32.vlgmr.msra.gmra.mrb[20].mxu0 %vm2033_vm9, %v2008_v3  ;;  %v2009_v52 = vsel %vm2006_vm8, %v1992_v40, %v3301_v51  ;;  %v3321_v40 = vunpack.i.l.bf16 %v4232_v15  ;;  %v3336_v10 = vunpack.i.l.bf16 %v4244_v16  ;;  %v3341_v15 = vunpack.i.l.bf16 %v4242_v7 }
 0x3cc   : > { %3086 = vmatprep.mubr.msk.f32.mxu0 %vm2033_vm9, %v2009_v52  ;;  %v1642_v43 = vpop.permute.xlu0 %1641 }
 0x3cd   : > { %v1942_v17 = vsel %vm981_vm3, %v1642_v43, %v4286_v48 }
 0x3ce   : > { %v1959_v45 = vsel %vm1955_vm5, %v1942_v17, %v3287_v56 }
 0x3cf   : > { %v1976_v3 = vsel %vm1972_vm6, %v1959_v45, %v3292_v21 }
 0x3d0   : > { %v1646_v20 = vpop.permute.xlu0 %1645  ;;  %v1993_v24 = vsel %vm1989_vm7, %v1976_v3, %v3297_v44 }
 0x3d1   : > { %v1944_v4 = vsel %vm981_vm3, %v1646_v20, %v4300_v60  ;;  %v2010_v53 = vsel %vm2006_vm8, %v1993_v24, %v3302_v47  ;;  %v3327_v47 = vunpack.i.h.bf16 %v4240_v1  ;;  %v3332_v20 = vunpack.i.h.bf16 %v4238_v58 }
 0x3d2   : > { %v1961_v39 = vsel %vm1955_vm5, %v1944_v4, %v3307_v46  ;;  %3087 = vmatmul.mubr.msk.f32.gmra.mrb[22].mxu0 %vm2033_vm9, %v2010_v53  ;;  %v3337_v4 = vunpack.i.h.bf16 %v4244_v16 }
 0x3d3   : > { %v1978_v22 = vsel %vm1972_vm6, %v1961_v39, %v3312_v23  ;;  %v3347_v39 = vunpack.i.h.bf16 %v4248_v5 }
 0x3d4   : > { %v1644_v25 = vpop.permute.xlu1 %1643  ;;  %v1995_v8 = vsel %vm1989_vm7, %v1978_v22, %v3317_v2  ;;  %v3342_v2 = vunpack.i.h.bf16 %v4242_v7  ;;  %v3352_v22 = vunpack.i.h.bf16 %v4246_v59 }
 0x3d5   : > { %v1943_v35 = vsel %vm981_vm3, %v1644_v25, %v4290_v41  ;;  %v2012_v51 = vsel %vm2006_vm8, %v1995_v8, %v3322_v50  ;;  %v3346_v8 = vunpack.i.l.bf16 %v4248_v5  ;;  %v3366_v5 = vunpack.i.l.bf16 %v4345_v42 }
 0x3d6   : > { %v1960_v13 = vsel %vm1955_vm5, %v1943_v35, %v3306_v62  ;;  %v3351_v35 = vunpack.i.l.bf16 %v4246_v59 }
 0x3d7   : > { %v1977_v52 = vsel %vm1972_vm6, %v1960_v13, %v3311_v37  ;;  %v4782_v13 = vld [vmem:[#allocation18_spill] sm:$0xff] }
 0x3d8   : > { %v1648_v56 = vpop.permute.xlu1 %1647  ;;  %v1994_v43 = vsel %vm1989_vm7, %v1977_v52, %v3316_v26  ;;  %v3357_v26 = vunpack.i.h.bf16 %v4258_v18  ;;  %v3361_v52 = vunpack.i.l.bf16 %v4250_v61 }
 0x3d9   : > { %v1945_v21 = vsel %vm981_vm3, %v1648_v56, %v4304_v38  ;;  %v2011_v17 = vsel %vm2006_vm8, %v1994_v43, %v3321_v40  ;;  %v3367_v56 = vunpack.i.h.bf16 %v4345_v42 }
 0x3da   : > { %v1962_v44 = vsel %vm1955_vm5, %v1945_v21, %v3326_v0  ;;  %3089 = vmatprep.mubr.msk.f32.mxu0 %vm2033_vm9, %v2011_v17  ;;  %v3356_v0 = vunpack.i.l.bf16 %v4258_v18  ;;  %v3376_v17 = vunpack.i.l.bf16 %v4365_v57 }
 0x3db   : > { %v1979_v45 = vsel %vm1972_vm6, %v1962_v44, %v3331_v12  ;;  %3090 = vmatmul.mubr.msk.f32.gmra.mrb[24].mxu0 %vm2033_vm9, %v2012_v51  ;;  %v3362_v51 = vunpack.i.h.bf16 %v4250_v61  ;;  %v3377_v12 = vunpack.i.h.bf16 %v4365_v57  ;;  %v3371_v61 = vunpack.i.l.bf16 %v4367_v63 }
 0x3dc   : > { %v1650_v3 = vpop.permute.xlu0 %1649  ;;  %v1996_v46 = vsel %vm1989_vm7, %v1979_v45, %v3336_v10  ;;  %v3372_v10 = vunpack.i.h.bf16 %v4367_v63  ;;  %v3382_v45 = vunpack.i.h.bf16 %v4371_v19  ;;  %v3381_v57 = vunpack.i.l.bf16 %v4371_v19 }
 0x3dd   : > { %v1946_v24 = vsel %vm981_vm3, %v1650_v3, %v4316_v28  ;;  %v2013_v23 = vsel %vm2006_vm8, %v1996_v46, %v3341_v15  ;;  %v3392_v19 = vunpack.i.h.bf16 %v4379_v30 }
 0x3de   : > { %v1963_v53 = vsel %vm1955_vm5, %v1946_v24, %v3327_v47  ;;  %3092 = vmatprep.mubr.msk.f32.mxu0 %vm2033_vm9, %v2013_v23  ;;  %v4783_v47 = vld [vmem:[#allocation19_spill] sm:$0xff]  ;;  %v3387_v23 = vunpack.i.h.bf16 %v4373_v11 }
 0x3df   : > { %v1980_v1 = vsel %vm1972_vm6, %v1963_v53, %v3332_v20 }
 0x3e0   : > { %v1654_v50 = vpop.permute.xlu0 %1653  ;;  %v1997_v58 = vsel %vm1989_vm7, %v1980_v1, %v3337_v4  ;;  %v3386_v4 = vunpack.i.l.bf16 %v4373_v11  ;;  %v3391_v1 = vunpack.i.l.bf16 %v4379_v30  ;;  %v3396_v30 = vunpack.i.l.bf16 %v4377_v54 }
 0x3e1   : > { %v1948_v62 = vsel %vm981_vm3, %v1654_v50, %v4326_v32  ;;  %v2014_v16 = vsel %vm2006_vm8, %v1997_v58, %v3342_v2 }
 0x3e2   : > { %v1965_v25 = vsel %vm1955_vm5, %v1948_v62, %v3347_v39  ;;  %3093 = vmatmul.mubr.msk.f32.gmra.mrb[26].mxu0 %vm2033_vm9, %v2014_v16 }
 0x3e3   : > { %v1982_v7 = vsel %vm1972_vm6, %v1965_v25, %v3352_v22 }
 0x3e4   : > { %v1652_v37 = vpop.permute.xlu1 %1651  ;;  %v1999_v21 = vsel %vm1989_vm7, %v1982_v7, %v3357_v26  ;;  %v3397_v7 = vunpack.i.h.bf16 %v4377_v54 }
 0x3e5   : > { %v1947_v40 = vsel %vm981_vm3, %v1652_v37, %v4782_v13  ;;  %v2016_v24 = vsel %vm2006_vm8, %v1999_v21, %v3362_v51  ;;  %v3401_v51 = vunpack.i.l.bf16 %v4383_v31  ;;  %v3411_v21 = vunpack.i.l.bf16 %v4395_v36 }
 0x3e6   : > { %v1964_v43 = vsel %vm1955_vm5, %v1947_v40, %v3346_v8 }
 0x3e7   : > { %v1981_v59 = vsel %vm1972_vm6, %v1964_v43, %v3351_v35  ;;  %v3402_v35 = vunpack.i.h.bf16 %v4383_v31 }
 0x3e8   : > { %v1656_v44 = vpop.permute.xlu1 %1655  ;;  %v1658_v18 = vpop.permute.xlu0 %1657  ;;  %v1998_v15 = vsel %vm1989_vm7, %v1981_v59, %v3356_v0 }
 0x3e9   : > { %v1949_v42 = vsel %vm981_vm3, %v1656_v44, %v4783_v47  ;;  %v1950_v3 = vsel %vm981_vm3, %v1658_v18, %v4363_v14  ;;  %v2015_v46 = vsel %vm2006_vm8, %v1998_v15, %v3361_v52 }
 0x3ea   : > { %v1966_v20 = vsel %vm1955_vm5, %v1949_v42, %v3366_v5  ;;  %v1967_v63 = vsel %vm1955_vm5, %v1950_v3, %v3367_v56  ;;  %3095 = vmatprep.mubr.msk.f32.mxu0 %vm2033_vm9, %v2015_v46  ;;  %v3407_v56 = vunpack.i.h.bf16 %v4385_v6 }
 0x3eb   : > { %v1983_v53 = vsel %vm1972_vm6, %v1966_v20, %v3371_v61  ;;  %v1984_v2 = vsel %vm1972_vm6, %v1967_v63, %v3372_v10  ;;  %3096 = vmatmul.mubr.msk.f32.gmra.mrb[28].mxu0 %vm2033_vm9, %v2016_v24  ;;  %v3412_v61 = vunpack.i.h.bf16 %v4395_v36 }
 0x3ec   : > { %v1660_v39 = vpop.permute.xlu1 %1659  ;;  %v1662_v50 = vpop.permute.xlu0 %1661  ;;  %v2000_v58 = vsel %vm1989_vm7, %v1983_v53, %v3376_v17  ;;  %v2001_v22 = vsel %vm1989_vm7, %v1984_v2, %v3377_v12  ;;  %v3406_v12 = vunpack.i.l.bf16 %v4385_v6 }
 0x3ed   : > { %v1951_v62 = vsel %vm981_vm3, %v1660_v39, %v4369_v49  ;;  %v1952_v11 = vsel %vm981_vm3, %v1662_v50, %v4375_v29  ;;  %v2017_v16 = vsel %vm2006_vm8, %v2000_v58, %v3381_v57  ;;  %v2018_v25 = vsel %vm2006_vm8, %v2001_v22, %v3382_v45 }
 0x3ee   : > { %v1968_v8 = vsel %vm1955_vm5, %v1951_v62, %v3386_v4  ;;  %v1969_v37 = vsel %vm1955_vm5, %v1952_v11, %v3387_v23  ;;  %3098 = vmatprep.mubr.msk.f32.mxu0 %vm2033_vm9, %v2017_v16  ;;  %v2678_v23 = vld [vmem:[%s4726_s10] ss:$0 sm:$0xff] }
 0x3ef   : > { %v1985_v26 = vsel %vm1972_vm6, %v1968_v8, %v3391_v1  ;;  %v1986_v40 = vsel %vm1972_vm6, %v1969_v37, %v3392_v19  ;;  %3099 = vmatmul.mubr.msk.f32.gmra.mrb[30].mxu0 %vm2033_vm9, %v2018_v25 }
 0x3f0   : > { %v1666_v52 = vpop.permute.xlu0 %1665  ;;  %v2002_v0 = vsel %vm1989_vm7, %v1985_v26, %v3396_v30  ;;  %v2003_v54 = vsel %vm1989_vm7, %v1986_v40, %v3397_v7 }
 0x3f1   : > { %v1954_v43 = vsel %vm981_vm3, %v1666_v52, %v4387_v34  ;;  %v2019_v5 = vsel %vm2006_vm8, %v2002_v0, %v3401_v51  ;;  %v2020_v31 = vsel %vm2006_vm8, %v2003_v54, %v3402_v35 }
 0x3f2   : > { %v1664_v59 = vpop.permute.xlu1 %1663  ;;  %3101 = vmatprep.mubr.msk.f32.mxu0 %vm2033_vm9, %v2019_v5  ;;  %v1971_v17 = vsel %vm1955_vm5, %v1954_v43, %v3407_v56 }
 0x3f3   : > { %v1953_v10 = vsel %vm981_vm3, %v1664_v59, %v4381_v33  ;;  %3102 = vmatmul.mubr.msk.f32.gmra.mrb[32].mxu0 %vm2033_vm9, %v2020_v31  ;;  %v1988_v42 = vsel %vm1972_vm6, %v1971_v17, %v3412_v61 }
 0x3f4   : > { %v1970_v44 = vsel %vm1955_vm5, %v1953_v10, %v3406_v12  ;;  %v3415_v18 = vpop.permute.xlu0 %3414 }
 0x3f5   : > { %v1987_v15 = vsel %vm1972_vm6, %v1970_v44, %v3411_v21  ;;  %v3417_v6 = vunpack.i.h.bf16 %v3415_v18  ;;  %v3416_v45 = vunpack.i.l.bf16 %v3415_v18 }
 0x3f6   : > { %v3420_v3 = vpop.permute.xlu1 %3419 }
 0x3f7   : > { %v3422_v46 = vunpack.i.h.bf16 %v3420_v3  ;;  %v3421_v57 = vunpack.i.l.bf16 %v3420_v3  ;;  %v2004_v20 = vsel %vm1989_vm7, %v1987_v15, %v3416_v45  ;;  %v2005_v63 = vsel %vm1989_vm7, %v1988_v42, %v3417_v6 }
 0x3f9   : > { %v2021_v24 = vsel %vm2006_vm8, %v2004_v20, %v3421_v57  ;;  %v2022_v36 = vsel %vm2006_vm8, %v2005_v63, %v3422_v46 }
 0x3fa   : > { %3104 = vmatprep.mubr.msk.f32.mxu0 %vm2033_vm9, %v2021_v24 }
 0x3fb   : > { %3105 = vmatmul.mubr.msk.f32.gmra.mrb[34].mxu0 %vm2033_vm9, %v2022_v36 }
 0x49e   : > { %v3085_v4 = vpop.f32.mrb[20].mxu0 }
 0x49f   : > { %v2158_v53 = vadd.f32 %v3085_v4, %v2678_v23  ;;  %v2152_v2 = vpop.f32.mrb[21].mxu0 }
 0x4a0   : > { %v2153_v19 = vadd.f32 %v2678_v23, %v2152_v2 }
 0x4a1   : > { %v2232_v1 = vmax.f32 %v2158_v53, 0.0 }
 0x4a2   : > { %v2231_v39 = vmax.f32 %v2153_v19, 0.0 }
 0x4a4   : > { %v3463_v50 = vpack.i.bf16 %v2232_v1, %v2231_v39 }
 0x4a5   : > { %v3088_v58 = vpop.f32.mrb[22].mxu0 }
 0x4a6   : > { %v2168_v22 = vadd.f32 %v3088_v58, %v2678_v23  ;;  %3464 = vrot.lane.b32.xlu0 %v3463_v50, %s3552_s12  ;;  %v2162_v62 = vpop.f32.mrb[23].mxu0 }
 0x4a7   : > { %v2163_v11 = vadd.f32 %v2678_v23, %v2162_v62  ;;  %v3425_v62 = vpop.permute.xlu0 %3424 }
 0x4a8   : > { %v2234_v16 = vmax.f32 %v2168_v22, 0.0 }
 0x4a9   : > { %v2233_v25 = vmax.f32 %v2163_v11, 0.0 }
 0x4ab   : > { %v3468_v7 = vpack.i.bf16 %v2234_v16, %v2233_v25  ;;  %v3435_v11 = vpop.permute.xlu0 %3434  ;;  %v3430_v16 = vpop.permute.xlu1 %3429 }
 0x4ad   : > { %3469 = vrot.lane.b32.xlu1 %v3468_v7, %s3552_s12 }
 0x4ae   : > { %v3091_v30 = vpop.f32.mrb[24].mxu0 }
 0x4af   : > { %v2178_v8 = vadd.f32 %v3091_v30, %v2678_v23  ;;  %v2172_v37 = vpop.f32.mrb[25].mxu0  ;;  %v4574_v25 = vpop.permute.xlu0 %3444 }
 0x4b0   : > { %v2173_v35 = vadd.f32 %v2678_v23, %v2172_v37  ;;  %v3440_v7 = vpop.permute.xlu1 %3439  ;;  %v3427_v37 = vunpack.i.h.bf16 %v3425_v62 }
 0x4b1   : > { %v2236_v51 = vmax.f32 %v2178_v8, 0.0 }
 0x4b2   : > { %v2235_v26 = vmax.f32 %v2173_v35, 0.0  ;;  %v3426_v35 = vunpack.i.l.bf16 %v3425_v62 }
 0x4b3   : > { %v4576_v30 = vpop.permute.xlu0 %3454 }
 0x4b4   : > { %v3473_v40 = vpack.i.bf16 %v2236_v51, %v2235_v26  ;;  %v4578_v8 = vpop.permute.xlu1 %3449 }
 0x4b5   : > { %v3094_v52 = vpop.f32.mrb[26].mxu0 }
 0x4b6   : > { %v2188_v0 = vadd.f32 %v3094_v52, %v2678_v23  ;;  %3474 = vrot.lane.b32.xlu0 %v3473_v40, %s3552_s12  ;;  %v2182_v54 = vpop.f32.mrb[27].mxu0  ;;  %v4785_v40 = vld [vmem:[#allocation2_spill] sm:$0xff] }
 0x4b7   : > { %v2183_v56 = vadd.f32 %v2678_v23, %v2182_v54  ;;  %v2359_v52 = vsel %vm981_vm3, %v4785_v40, %v4270_v9 }
 0x4b8   : > { %v2238_v43 = vmax.f32 %v2188_v0, 0.0 }
 0x4b9   : > { %v2237_v5 = vmax.f32 %v2183_v56, 0.0 }
 0x4bb   : > { %v3478_v31 = vpack.i.bf16 %v2238_v43, %v2237_v5  ;;  %v2375_v43 = vsel %vm1955_vm5, %v2359_v52, %v3426_v35  ;;  %v4588_v5 = vpop.permute.xlu1 %3459 }
 0x4bd   : > { %3479 = vrot.lane.b32.xlu1 %v3478_v31, %s3552_s12 }
 0x4be   : > { %v3097_v12 = vpop.f32.mrb[28].mxu0 }
 0x4bf   : > { %v2198_v59 = vadd.f32 %v3097_v12, %v2678_v23  ;;  %v2192_v21 = vpop.f32.mrb[29].mxu0 }
 0x4c0   : > { %v2193_v17 = vadd.f32 %v2678_v23, %v2192_v21  ;;  %v3431_v21 = vunpack.i.l.bf16 %v3430_v16 }
 0x4c1   : > { %v2240_v10 = vmax.f32 %v2198_v59, 0.0  ;;  %v3432_v59 = vunpack.i.h.bf16 %v3430_v16 }
 0x4c2   : > { %v2239_v61 = vmax.f32 %v2193_v17, 0.0  ;;  %v3100_v44 = vpop.f32.mrb[30].mxu0 }
 0x4c3   : > { %v2208_v18 = vadd.f32 %v3100_v44, %v2678_v23  ;;  %v2202_v15 = vpop.f32.mrb[31].mxu0 }
 0x4c4   : > { %v3483_v6 = vpack.i.bf16 %v2240_v10, %v2239_v61  ;;  %v2203_v45 = vadd.f32 %v2678_v23, %v2202_v15  ;;  %v4786_v61 = vld [vmem:[#allocation4_spill] sm:$0xff] }
 0x4c5   : > { %v2242_v42 = vmax.f32 %v2208_v18, 0.0  ;;  %v2361_v44 = vsel %vm981_vm3, %v4786_v61, %v4275_v27  ;;  %v4787_v18 = vld [vmem:[#allocation5_spill] sm:$0xff]  ;;  %v3437_v27 = vunpack.i.h.bf16 %v3435_v11 }
 0x4c6   : > { %v2241_v3 = vmax.f32 %v2203_v45, 0.0  ;;  %3484 = vrot.lane.b32.xlu0 %v3483_v6, %s3552_s12  ;;  %v3103_v46 = vpop.f32.mrb[32].mxu0  ;;  %v2362_v15 = vsel %vm981_vm3, %v4787_v18, %v4286_v48 }
 0x4c7   : > { %v2218_v57 = vadd.f32 %v3103_v46, %v2678_v23  ;;  %v2212_v20 = vpop.f32.mrb[33].mxu0 }
 0x4c8   : > { %v3488_v63 = vpack.i.bf16 %v2242_v42, %v2241_v3  ;;  %v2213_v24 = vadd.f32 %v2678_v23, %v2212_v20  ;;  %v2378_v42 = vsel %vm1955_vm5, %v2362_v15, %v3432_v59  ;;  %v2377_v3 = vsel %vm1955_vm5, %v2361_v44, %v3431_v21  ;;  %v4792_v59 = vld [vmem:[#allocation10_spill] sm:$0xff] }
 0x4c9   : > { %v2244_v36 = vmax.f32 %v2218_v57, 0.0  ;;  %v2367_v21 = vsel %vm981_vm3, %v4792_v59, %v4782_v13  ;;  %v4794_v13 = vld [vmem:[#allocation12_spill] sm:$0xff] }
 0x4ca   : > { %v2243_v4 = vmax.f32 %v2213_v24, 0.0  ;;  %3489 = vrot.lane.b32.xlu1 %v3488_v63, %s3552_s12 }
 0x4cc   : > { %v3493_v53 = vpack.i.bf16 %v2244_v36, %v2243_v4  ;;  %v3436_v36 = vunpack.i.l.bf16 %v3435_v11  ;;  %v4788_v4 = vld [vmem:[#allocation6_spill] sm:$0xff] }
 0x4ce   : > { %v3106_v2 = vpop.f32.mrb[34].mxu0  ;;  %3494 = vrot.lane.b32.xlu0 %v3493_v53, %s3552_s12  ;;  %v2363_v53 = vsel %vm981_vm3, %v4788_v4, %v4290_v41  ;;  %v3441_v41 = vunpack.i.l.bf16 %v3440_v7  ;;  %v3457_v4 = vunpack.i.h.bf16 %v4576_v30 }
 0x4cf   : > { %v2228_v19 = vadd.f32 %v3106_v2, %v2678_v23  ;;  %v2222_v1 = vpop.f32.mrb[35].mxu0  ;;  %v4789_v2 = vld [vmem:[#allocation7_spill] sm:$0xff] }
 0x4d0   : > { %v2223_v39 = vadd.f32 %v2678_v23, %v2222_v1  ;;  %v4784_v23 = vld [vmem:[#allocation3_spill] sm:$0xff] }
 0x4d1   : > { %v2246_v50 = vmax.f32 %v2228_v19, 0.0  ;;  %v2360_v51 = vsel %vm981_vm3, %v4784_v23, %v4261_v55  ;;  %v2364_v19 = vsel %vm981_vm3, %v4789_v2, %v4300_v60  ;;  %v4790_v23 = vld [vmem:[#allocation8_spill] sm:$0xff] }
 0x4d2   : > { %v2245_v58 = vmax.f32 %v2223_v39, 0.0  ;;  %v2376_v56 = vsel %vm1955_vm5, %v2360_v51, %v3427_v37  ;;  %v3442_v37 = vunpack.i.h.bf16 %v3440_v7  ;;  %v2365_v51 = vsel %vm981_vm3, %v4790_v23, %v4304_v38 }
 0x4d3   : > { %v3447_v38 = vunpack.i.h.bf16 %v4574_v25 }
 0x4d4   : > { %v3498_v22 = vpack.i.bf16 %v2246_v50, %v2245_v58  ;;  %v2380_v50 = vsel %vm1955_vm5, %v2364_v19, %v3437_v27  ;;  %v2379_v58 = vsel %vm1955_vm5, %v2363_v53, %v3436_v36  ;;  %v4796_v19 = vld [vmem:[#allocation14_spill] sm:$0xff] }
 0x4d6   : > { %3499 = vrot.lane.b32.xlu1 %v3498_v22, %s3552_s12 }
 0x518   : > { %v3465_v26 = vpop.permute.xlu0 %3464 }
 0x519   : > { %v3467_v0 = vunpack.i.h.bf16 %v3465_v26  ;;  %v3466_v54 = vunpack.i.l.bf16 %v3465_v26  ;;  %v4791_v26 = vld [vmem:[#allocation9_spill] sm:$0xff] }
 0x51a   : > { %v2366_v40 = vsel %vm981_vm3, %v4791_v26, %v4316_v28 }
 0x51b   : > { %v2391_v31 = vsel %vm1972_vm6, %v2375_v43, %v3466_v54  ;;  %v2392_v12 = vsel %vm1972_vm6, %v2376_v56, %v3467_v0  ;;  %v2382_v54 = vsel %vm1955_vm5, %v2366_v40, %v3442_v37  ;;  %v2381_v56 = vsel %vm1955_vm5, %v2365_v51, %v3441_v41  ;;  %v4798_v40 = vld [vmem:[#allocation16_spill] sm:$0xff] }
 0x51c   : > { %v2408_v55 = vsel %vm2407_vm10, %v2391_v31, 0.0  ;;  %v2409_v9 = vsel %vm2407_vm10, %v2392_v12, 0.0  ;;  %v3461_v51 = vunpack.i.l.bf16 %v4588_v5 }
 0x51d   : > { %v2781_v17 = vpack.c.bf16 %v2409_v9, %v2408_v55  ;;  %v3446_v9 = vunpack.i.l.bf16 %v4574_v25  ;;  %v3451_v25 = vunpack.i.l.bf16 %v4578_v8 }
 0x51f   : > { %2782 = vst [vmem:[%s4597_s15] sm:$0xff] %v2781_v17   ;;  %v3470_v10 = vpop.permute.xlu1 %3469  ;;  %v4793_v17 = vld [vmem:[#allocation11_spill] sm:$0xff]  ;;  %v2383_v15 = vsel %vm1955_vm5, %v2367_v21, %v3446_v9 }
 0x520   : > { %v3472_v6 = vunpack.i.h.bf16 %v3470_v10  ;;  %v3471_v45 = vunpack.i.l.bf16 %v3470_v10  ;;  %v2368_v10 = vsel %vm981_vm3, %v4793_v17, %v4326_v32 }
 0x521   : > { %v2384_v18 = vsel %vm1955_vm5, %v2368_v10, %v3447_v38 }
 0x522   : > { %v2394_v46 = vsel %vm1972_vm6, %v2378_v42, %v3472_v6  ;;  %v2393_v57 = vsel %vm1972_vm6, %v2377_v3, %v3471_v45  ;;  %v3452_v6 = vunpack.i.h.bf16 %v4578_v8  ;;  %v2369_v3 = vsel %vm981_vm3, %v4794_v13, %v4783_v47 }
 0x523   : > { %v2411_v20 = vsel %vm2407_vm10, %v2394_v46, 0.0  ;;  %v2410_v63 = vsel %vm2407_vm10, %v2393_v57, 0.0  ;;  %v3456_v47 = vunpack.i.l.bf16 %v4576_v30 }
 0x524   : > { %v2786_v24 = vpack.c.bf16 %v2411_v20, %v2410_v63  ;;  %v4795_v20 = vld [vmem:[#allocation13_spill] sm:$0xff] }
 0x525   : > { %v2370_v63 = vsel %vm981_vm3, %v4795_v20, %v4363_v14  ;;  %v2371_v14 = vsel %vm981_vm3, %v4796_v19, %v4369_v49 }
 0x526   : > { %2828 = vst [vmem:[%s4597_s15 + $0x8] sm:$0xff] %v2786_v24   ;;  %v2386_v36 = vsel %vm1955_vm5, %v2370_v63, %v3452_v6  ;;  %v2387_v37 = vsel %vm1955_vm5, %v2371_v14, %v3456_v47 }
 0x528   : > { %v3475_v48 = vpop.permute.xlu0 %3474 }
 0x529   : > { %v3477_v1 = vunpack.i.h.bf16 %v3475_v48  ;;  %v3476_v39 = vunpack.i.l.bf16 %v3475_v48  ;;  %v2385_v48 = vsel %vm1955_vm5, %v2369_v3, %v3451_v25 }
 0x52b   : > { %v2395_v22 = vsel %vm1972_vm6, %v2379_v58, %v3476_v39  ;;  %v2396_v62 = vsel %vm1972_vm6, %v2380_v50, %v3477_v1  ;;  %v4797_v58 = vld [vmem:[#allocation15_spill] sm:$0xff] }
 0x52c   : > { %v2412_v11 = vsel %vm2407_vm10, %v2395_v22, 0.0  ;;  %v2413_v16 = vsel %vm2407_vm10, %v2396_v62, 0.0  ;;  %v2372_v22 = vsel %vm981_vm3, %v4797_v58, %v4375_v29  ;;  %v3462_v29 = vunpack.i.h.bf16 %v4588_v5 }
 0x52d   : > { %v2791_v35 = vpack.c.bf16 %v2413_v16, %v2412_v11  ;;  %v2388_v16 = vsel %vm1955_vm5, %v2372_v22, %v3457_v4 }
 0x52f   : > { %2829 = vst [vmem:[%s4597_s15 + $0x10] sm:$0xff] %v2791_v35   ;;  %v3480_v60 = vpop.permute.xlu1 %3479 }
 0x530   : > { %v3482_v52 = vunpack.i.h.bf16 %v3480_v60  ;;  %v3481_v0 = vunpack.i.l.bf16 %v3480_v60 }
 0x532   : > { %v2398_v7 = vsel %vm1972_vm6, %v2382_v54, %v3482_v52  ;;  %v2397_v43 = vsel %vm1972_vm6, %v2381_v56, %v3481_v0  ;;  %v2373_v52 = vsel %vm981_vm3, %v4798_v40, %v4381_v33  ;;  %v4799_v0 = vld [vmem:[#allocation17_spill] sm:$0xff] }
 0x533   : > { %v2415_v31 = vsel %vm2407_vm10, %v2398_v7, 0.0  ;;  %v2414_v12 = vsel %vm2407_vm10, %v2397_v43, 0.0  ;;  %v2374_v54 = vsel %vm981_vm3, %v4799_v0, %v4387_v34 }
 0x534   : > { %v2796_v55 = vpack.c.bf16 %v2415_v31, %v2414_v12  ;;  %v2390_v43 = vsel %vm1955_vm5, %v2374_v54, %v3462_v29  ;;  %v2389_v31 = vsel %vm1955_vm5, %v2373_v52, %v3461_v51 }
 0x536   : > { %2830 = vst [vmem:[%s4597_s15 + $0x18] sm:$0xff] %v2796_v55  }
 0x538   : > { %v3485_v28 = vpop.permute.xlu0 %3484 }
 0x539   : > { %v3487_v61 = vunpack.i.h.bf16 %v3485_v28  ;;  %v3486_v44 = vunpack.i.l.bf16 %v3485_v28 }
 0x53b   : > { %v2399_v45 = vsel %vm1972_vm6, %v2383_v15, %v3486_v44  ;;  %v2400_v42 = vsel %vm1972_vm6, %v2384_v18, %v3487_v61 }
 0x53c   : > { %v2416_v32 = vsel %vm2407_vm10, %v2399_v45, 0.0  ;;  %v2417_v46 = vsel %vm2407_vm10, %v2400_v42, 0.0  ;;  %v3490_v57 = vpop.permute.xlu1 %3489 }
 0x53d   : > { %v2801_v24 = vpack.c.bf16 %v2417_v46, %v2416_v32  ;;  %v3492_v27 = vunpack.i.h.bf16 %v3490_v57  ;;  %v3491_v8 = vunpack.i.l.bf16 %v3490_v57 }
 0x53f   : > { %2831 = vst [vmem:[%s4597_s15 + $0x20] sm:$0xff] %v2801_v24   ;;  %v2402_v53 = vsel %vm1972_vm6, %v2386_v36, %v3492_v27  ;;  %v2401_v2 = vsel %vm1972_vm6, %v2385_v48, %v3491_v8 }
 0x540   : > { %v2419_v1 = vsel %vm2407_vm10, %v2402_v53, 0.0  ;;  %v2418_v39 = vsel %vm2407_vm10, %v2401_v2, 0.0  ;;  %v3495_v50 = vpop.permute.xlu0 %3494 }
 0x541   : > { %v2806_v30 = vpack.c.bf16 %v2419_v1, %v2418_v39  ;;  %v3497_v62 = vunpack.i.h.bf16 %v3495_v50  ;;  %v3496_v11 = vunpack.i.l.bf16 %v3495_v50 }
 0x543   : > { %2832 = vst [vmem:[%s4597_s15 + $0x28] sm:$0xff] %v2806_v30   ;;  %v2404_v49 = vsel %vm1972_vm6, %v2388_v16, %v3497_v62  ;;  %v2403_v41 = vsel %vm1972_vm6, %v2387_v37, %v3496_v11 }
 0x544   : > { %v2421_v35 = vsel %vm2407_vm10, %v2404_v49, 0.0  ;;  %v2420_v60 = vsel %vm2407_vm10, %v2403_v41, 0.0 }
 0x545   : > { %v2811_v23 = vpack.c.bf16 %v2421_v35, %v2420_v60 }
 0x547   : > { %2833 = vst [vmem:[%s4597_s15 + $0x30] sm:$0xff] %v2811_v23  }
 0x548   : > { %v3500_v26 = vpop.permute.xlu1 %3499 }
 0x549   : > { %v3502_v56 = vunpack.i.h.bf16 %v3500_v26  ;;  %v3501_v7 = vunpack.i.l.bf16 %v3500_v26 }
 0x54b   : > { %v2406_v12 = vsel %vm1972_vm6, %v2390_v43, %v3502_v56  ;;  %v2405_v5 = vsel %vm1972_vm6, %v2389_v31, %v3501_v7 }
 0x54c   : > { %v2423_v55 = vsel %vm2407_vm10, %v2406_v12, 0.0  ;;  %v2422_v38 = vsel %vm2407_vm10, %v2405_v5, 0.0 }
 0x54d   : > { %v2816_v9 = vpack.c.bf16 %v2423_v55, %v2422_v38 }
 0x54f   : > { %2834 = vst [vmem:[%s4597_s15 + $0x38] sm:$0xff] %v2816_v9  }
 0x550 PF: > { %s21_s21 = sadd.s32 1, %s3541_s21   ;;  %s4800_s17 = smov %s3533_s19 }
 0x551   : > { %p18_p7 = scmp.ge.s32.totalorder %s21_s21, 6   ;;  %s4801_s18 = smov %s3537_s20 }
 0x552   : > { %s4802_s19 = smov %s4805_s22  ;;  %s4803_s20 = smov %s4809_s23 }
 0x553   :  { %20 = sbr.rel (!%p18_p7) target bundleno = 3 (0x3), region = 97 }

</bundles_post_ra>
